<compile_context>
chip_gen: v5e
topology: v5e:2x2
jax: 0.10.0
libtpu: 0.0.40
codegen_flags: <defaults>
</compile_context>

<pallas_src>
import numpy as np
import jax
import jax.numpy as jnp
from jax import lax
from jax.experimental import pallas as pl
from jax.experimental.pallas import tpu as pltpu

EPS = 1e-5


# --------------------------- strip sizing ---------------------------
def _pick_strip_h(H, W, C, P, target_bytes=4 * 1024 * 1024):
    """Pick a row-strip height so per-strip temporaries stay ~target_bytes."""
    cmax = max(C, P)
    # per output row: ~4 bf16 copies of W*3*cmax (dx-stacked slab + views)
    #                 + ~3 f32 copies of W*P (matmul acc / relu / residual)
    per_row = W * (3 * cmax * 2 * 4 + P * 4 * 3)
    sh = target_bytes // max(per_row, 1)
    sh = max(8, (sh // 8) * 8)
    return int(min(H, sh))


# --------------------------- kernel factory ---------------------------
def _make_kernel(H, W, Cin, P, strip_h, lane_dense):
    n_strips = -(-H // strip_h)
    aligned = (H % strip_h) == 0

    def kernel(x_ref, wA_ref, wB_ref, bA_ref, bB_ref, out_ref, out1_ref):
        # x_ref   : (H, W, Cin) f32   one image (batch squeezed by BlockSpec)
        # wA_ref  : (3, 3*Cin, P) bf16  folded stage-1 weights (3x3+3x1+1x3+BNs)
        # wB_ref  : (3, 3*P,  P) bf16   folded stage-2 weights (3x3 + bn2)
        # bA_ref  : (1, P) f32          folded stage-1 bias
        # bB_ref  : (1, P) f32          folded stage-2 bias
        # out_ref : (H, W*P) f32  [lane-dense]  or  (H*W, P) f32
        # out1_ref: (H, W, P) f32 scratch -- full-image stage-1 output (post-ReLU)

        def strip_start(s):
            if aligned:
                return pl.multiple_of(s * strip_h, strip_h)
            # last strip overlaps the previous one so reads/writes stay in-bounds
            return jnp.minimum(s * strip_h, H - strip_h)

        def halo_rows(src_ref, start, C):
            # rows [start-1, start+strip_h] with zero rows outside the image
            mid = src_ref[pl.ds(start, strip_h), :, :]                       # (sh, W, C)
            top = src_ref[pl.ds(jnp.maximum(start - 1, 0), 1), :, :]        # (1, W, C)
            bot = src_ref[pl.ds(jnp.minimum(start + strip_h, H - 1), 1), :, :]
            top = jnp.where(start > 0, top, jnp.zeros_like(top))
            bot = jnp.where(start + strip_h < H, bot, jnp.zeros_like(bot))
            return jnp.concatenate([top, mid, bot], axis=0)                 # (sh+2, W, C)

        def conv3x3(rows, w_ref, C):
            # rows: (sh+2, W, C) f32 (halo included); w_ref: (3, 3C, P) bf16
            zc = jnp.zeros((strip_h + 2, 1, C), jnp.float32)
            xh = jnp.concatenate([zc, rows, zc], axis=1)                     # (sh+2, W+2, C)
            # dx-stack the 3 column taps along lanes (K = 3*C); cast each tap
            # slice to bf16 *before* the concatenate that builds the slab.
            slab = jnp.concatenate(
                [xh[:, 0:W, :].astype(jnp.bfloat16),
                 xh[:, 1:W + 1, :].astype(jnp.bfloat16),
                 xh[:, 2:W + 2, :].astype(jnp.bfloat16)], axis=-1)           # (sh+2, W, 3C)
            # accumulate the 3 dy taps: row-shifted views are leading-dim
            # slices of the same slab (nearly free), one MXU matmul each.
            acc = jnp.dot(slab[0:strip_h].reshape(strip_h * W, 3 * C),
                          w_ref[0], preferred_element_type=jnp.float32)
            acc = acc + jnp.dot(slab[1:strip_h + 1].reshape(strip_h * W, 3 * C),
                                w_ref[1], preferred_element_type=jnp.float32)
            acc = acc + jnp.dot(slab[2:strip_h + 2].reshape(strip_h * W, 3 * C),
                                w_ref[2], preferred_element_type=jnp.float32)
            return acc                                                       # (sh*W, P) f32

        # ---- pass 1: stage 1 (merged 3x3/3x1/1x3 + BNs) + ReLU -> out1 scratch
        def stage1(s, carry):
            start = strip_start(s)
            rows = halo_rows(x_ref, start, Cin)
            o1 = jnp.maximum(conv3x3(rows, wA_ref, Cin) + bA_ref[...], 0.0)
            out1_ref[pl.ds(start, strip_h), :, :] = o1.reshape(strip_h, W, P)
            return carry

        # ---- pass 2: stage 2 (3x3 + bn2) + residual + ReLU -> out
        def stage2(s, carry):
            start = strip_start(s)
            rows = halo_rows(out1_ref, start, P)
            a2 = conv3x3(rows, wB_ref, P) + bB_ref[...]
            identity = x_ref[pl.ds(start, strip_h), :, :].reshape(strip_h * W, Cin)
            res = jnp.maximum(a2 + identity, 0.0)                            # (sh*W, P) f32
            if lane_dense:
                out_ref[pl.ds(start, strip_h), :] = res.reshape(strip_h, W * P)
            else:
                out_ref[pl.ds(start * W, strip_h * W), :] = res
            return carry

        unroll = n_strips <= 8
        lax.fori_loop(0, n_strips, stage1, 0, unroll=unroll)
        lax.fori_loop(0, n_strips, stage2, 0, unroll=unroll)

    return kernel


# --------------------------- weight folding ---------------------------
def _fold_params(params):
    """Fold inference-mode BN into the conv weights and merge the three
    stage-1 branches (ACNet-style structural re-parameterization)."""
    def scale_bias(bn):
        g, b, m, v = bn
        s = g / jnp.sqrt(v + EPS)
        return s, b - m * s

    s1, b1 = scale_bias(params["bn1"])
    sv, bv = scale_bias(params["bnv"])
    sh, bh = scale_bias(params["bnh"])
    s2, b2 = scale_bias(params["bn2"])

    # PyTorch OIHW -> HWIO, scale each branch by its BN scale (per out-channel)
    w1 = jnp.transpose(params["w1"], (2, 3, 1, 0)) * s1          # (3,3,Cin,P)
    wv = jnp.transpose(params["wv"], (2, 3, 1, 0))[:, 0] * sv    # (3,Cin,P)
    wh = jnp.transpose(params["wh"], (2, 3, 1, 0))[0] * sh       # (3,Cin,P)
    w2 = jnp.transpose(params["w2"], (2, 3, 1, 0)) * s2          # (3,3,P,P)

    # 3x1 branch lives in the center column, 1x3 branch in the center row
    wA = w1.at[:, 1, :, :].add(wv).at[1, :, :, :].add(wh)        # (3,3,Cin,P)
    bA = b1 + bv + bh                                            # (P,)

    Cin, P = wA.shape[2], wA.shape[3]
    # (dy, dx*C + c, p): matches the dx-stacked slab lane layout in the kernel
    wA = wA.reshape(3, 3 * Cin, P).astype(jnp.bfloat16)
    wB = w2.reshape(3, 3 * P, P).astype(jnp.bfloat16)
    bA = bA[None, :].astype(jnp.float32)                         # (1, P)
    bB = b2[None, :].astype(jnp.float32)
    return wA, bA, wB, bB


# --------------------------- public wrappers ---------------------------
def basic_block_forward_nhwc(x_nhwc, params, *, strip_h=None):
    """x_nhwc: (N, H, W, Cin) float32. Returns (N, H, W, P) float32."""
    N, H, W, Cin = x_nhwc.shape
    P = params["w1"].shape[0]
    assert Cin == P, "stride=1 / downsample=None requires inplanes == planes"

    if strip_h is None:
        strip_h = _pick_strip_h(H, W, Cin, P)
    strip_h = max(1, min(int(strip_h), H))

    # lane-dense output packing only pays (and is only enabled) when the
    # channel count does not already fill the lanes and W*P is lane-aligned.
    lane_dense = (P % 128 != 0) and ((W * P) % 128 == 0)

    wA, bA, wB, bB = _fold_params(params)
    kernel = _make_kernel(H, W, Cin, P, strip_h, lane_dense)

    if lane_dense:
        out_shape = jax.ShapeDtypeStruct((N, H, W * P), jnp.float32)
        out_spec = pl.BlockSpec((None, H, W * P), lambda n: (n, 0, 0))
    else:
        out_shape = jax.ShapeDtypeStruct((N, H * W, P), jnp.float32)
        out_spec = pl.BlockSpec((None, H * W, P), lambda n: (n, 0, 0))

    out_flat = pl.pallas_call(
        kernel,
        out_shape=out_shape,
        grid=(N,),
        in_specs=[
            pl.BlockSpec((None, H, W, Cin), lambda n: (n, 0, 0, 0)),  # x (one image)
            pl.BlockSpec((3, 3 * Cin, P), lambda n: (0, 0, 0)),       # wA (resident)
            pl.BlockSpec((3, 3 * P, P), lambda n: (0, 0, 0)),         # wB (resident)
            pl.BlockSpec((1, P), lambda n: (0, 0)),                   # bA
            pl.BlockSpec((1, P), lambda n: (0, 0)),                   # bB
        ],
        out_specs=out_spec,
        scratch_shapes=[pltpu.VMEM((H, W, P), jnp.float32)],          # stage-1 output
        compiler_params=pltpu.CompilerParams(
            dimension_semantics=("parallel",),          # both TCs on v7x
            # sized for v7x's 64 MiB physical VMEM; v5e/v6e have headroom
            vmem_limit_bytes=48 * 1024 * 1024),
    )(x_nhwc.astype(jnp.float32), wA, wB, bA, bB)

    return out_flat.reshape(N, H, W, P)   # free: same row-major bytes as NHWC


def basic_block_forward(x_nchw, params, *, strip_h=None):
    """PyTorch-layout wrapper. x_nchw: (N, Cin, H, W) f32 -> (N, P, H, W) f32.

    For chains of blocks prefer basic_block_forward_nhwc: each transpose here
    is a separate XLA op costing a full HBM read+write of the tensor.
    """
    x_nhwc = jnp.transpose(x_nchw, (0, 2, 3, 1))
    out = basic_block_forward_nhwc(x_nhwc, params, strip_h=strip_h)
    return jnp.transpose(out, (0, 3, 1, 2))


# ---------------- pure-JAX reference (correctness check) ----------------
def ref_forward(x, params):
    def conv(z, w, pad):
        return jax.lax.conv_general_dilated(
            z, w, window_strides=(1, 1), padding=pad,
            dimension_numbers=("NCHW", "OIHW", "NCHW"))

    def bn(y, p):
        g, b, m, v = p
        inv = 1.0 / jnp.sqrt(v + EPS)
        return (y - m[None, :, None, None]) * (g * inv)[None, :, None, None] \
            + b[None, :, None, None]

    out = bn(conv(x, params["w1"], ((1, 1), (1, 1))), params["bn1"])
    out = out + bn(conv(x, params["wv"], ((1, 1), (0, 0))), params["bnv"])
    out = out + bn(conv(x, params["wh"], ((0, 0), (1, 1))), params["bnh"])
    out = jax.nn.relu(out)
    out = bn(conv(out, params["w2"], ((1, 1), (1, 1))), params["bn2"])
    return jax.nn.relu(out + x)


def make_params(key, inplanes, planes):
    ks = jax.random.split(key, 8)

    def bn_params(k):
        k1, k2, k3, k4 = jax.random.split(k, 4)
        gamma = 1.0 + 0.1 * jax.random.normal(k1, (planes,), jnp.float32)
        beta = 0.1 * jax.random.normal(k2, (planes,), jnp.float32)
        mean = 0.1 * jax.random.normal(k3, (planes,), jnp.float32)
        var = 0.5 + jnp.abs(jax.random.normal(k4, (planes,), jnp.float32))
        return (gamma, beta, mean, var)

    scale = 0.1
    return {
        "w1": scale * jax.random.normal(ks[0], (planes, inplanes, 3, 3), jnp.float32),
        "wv": scale * jax.random.normal(ks[1], (planes, inplanes, 3, 1), jnp.float32),
        "wh": scale * jax.random.normal(ks[2], (planes, inplanes, 1, 3), jnp.float32),
        "w2": scale * jax.random.normal(ks[3], (planes, planes, 3, 3), jnp.float32),
        "bn1": bn_params(ks[4]),
        "bnv": bn_params(ks[5]),
        "bnh": bn_params(ks[6]),
        "bn2": bn_params(ks[7]),
    }


if __name__ == "__main__":
    key = jax.random.PRNGKey(0)
    k_x, k_p = jax.random.split(key)

    # NOTE: toy shape for correctness only; do not tune/benchmark here.
    # Realistic validation shapes: 56x56x64, 28x28x128, 14x14x256.
    N, C, H, W = 2, 4, 16, 16          # inplanes = planes = 4, stride = 1
    x = jax.random.normal(k_x, (N, C, H, W), jnp.float32)
    params = make_params(k_p, C, C)

    ref = jax.block_until_ready(ref_forward(x, params))

    # multi-strip path (2 strips of 8 rows -> exercises the halo handling)
    out = jax.block_until_ready(basic_block_forward(x, params, strip_h=8))
    assert out.shape == (N, C, H, W)
    # bf16 MXU operands (f32 accumulation / bias / residual) => loosened tolerance
    np.testing.assert_allclose(np.asarray(out), np.asarray(ref),
                               rtol=2e-2, atol=2e-2)

    # default strip picker (single strip at this small H) -> same result
    out2 = jax.block_until_ready(basic_block_forward(x, params))
    np.testing.assert_allclose(np.asarray(out2), np.asarray(ref),
                               rtol=2e-2, atol=2e-2)

    print("KERNEL_OK")
</pallas_src>

<mosaic_0001>
module attributes {stable_mosaic.version = 11 : i64} {
  func.func @kernel(%arg0: i32, %arg1: memref<1x16x16x4xf32, #tpu.memory_space<vmem>>, %arg2: memref<3x12x4xbf16, #tpu.memory_space<vmem>>, %arg3: memref<3x12x4xbf16, #tpu.memory_space<vmem>>, %arg4: memref<1x4xf32, #tpu.memory_space<vmem>>, %arg5: memref<1x4xf32, #tpu.memory_space<vmem>>, %arg6: memref<1x256x4xf32, #tpu.memory_space<vmem>>, %arg7: memref<16x16x4xf32, #tpu.memory_space<vmem>>) attributes {dimension_semantics = [#tpu.dimension_semantics<parallel>], iteration_bounds = array<i64: 2>, scalar_prefetch = 0 : i64, scratch_operands = 1 : i64, tpu.core_type = #tpu.core_type<tc>, window_params = [{transform_indices = @transform_0, window_bounds = array<i64: 1, 16, 16, 4>}, {pipeline_mode = #tpu.pipeline_mode<synchronous>, transform_indices = @transform_1, window_bounds = array<i64: 3, 12, 4>}, {pipeline_mode = #tpu.pipeline_mode<synchronous>, transform_indices = @transform_2, window_bounds = array<i64: 3, 12, 4>}, {pipeline_mode = #tpu.pipeline_mode<synchronous>, transform_indices = @transform_3, window_bounds = array<i64: 1, 4>}, {pipeline_mode = #tpu.pipeline_mode<synchronous>, transform_indices = @transform_4, window_bounds = array<i64: 1, 4>}, {transform_indices = @transform_5, window_bounds = array<i64: 1, 256, 4>}]} {
    %c0_i32 = arith.constant 0 : i32
    %c8_i32 = arith.constant 8 : i32
    %0 = arith.muli %c0_i32, %c8_i32 : i32
    %1 = tpu.assume_multiple %0, 8 : i32
    %c0 = arith.constant 0 : index
    %2 = arith.index_cast %1 : i32 to index
    %c0_0 = arith.constant 0 : index
    %c0_1 = arith.constant 0 : index
    %3 = vector.load %arg1[%c0, %2, %c0_0, %c0_1] : memref<1x16x16x4xf32, #tpu.memory_space<vmem>>, vector<1x8x16x4xf32>
    %4 = vector.shape_cast %3 : vector<1x8x16x4xf32> to vector<8x16x4xf32>
    %c1_i32 = arith.constant 1 : i32
    %5 = arith.subi %1, %c1_i32 : i32
    %c0_i32_2 = arith.constant 0 : i32
    %6 = arith.maxsi %5, %c0_i32_2 : i32
    %c0_3 = arith.constant 0 : index
    %7 = arith.index_cast %6 : i32 to index
    %c0_4 = arith.constant 0 : index
    %c0_5 = arith.constant 0 : index
    %8 = vector.load %arg1[%c0_3, %7, %c0_4, %c0_5] : memref<1x16x16x4xf32, #tpu.memory_space<vmem>>, vector<1x1x16x4xf32>
    %9 = vector.shape_cast %8 : vector<1x1x16x4xf32> to vector<1x16x4xf32>
    %c8_i32_6 = arith.constant 8 : i32
    %10 = arith.addi %1, %c8_i32_6 : i32
    %c15_i32 = arith.constant 15 : i32
    %11 = arith.minsi %10, %c15_i32 : i32
    %c0_7 = arith.constant 0 : index
    %12 = arith.index_cast %11 : i32 to index
    %c0_8 = arith.constant 0 : index
    %c0_9 = arith.constant 0 : index
    %13 = vector.load %arg1[%c0_7, %12, %c0_8, %c0_9] : memref<1x16x16x4xf32, #tpu.memory_space<vmem>>, vector<1x1x16x4xf32>
    %14 = vector.shape_cast %13 : vector<1x1x16x4xf32> to vector<1x16x4xf32>
    %c0_i32_10 = arith.constant 0 : i32
    %15 = arith.cmpi sgt, %1, %c0_i32_10 : i32
    %cst = arith.constant 0.000000e+00 : f32
    %16 = vector.broadcast %cst : f32 to vector<1x16x4xf32>
    %17 = arith.select %15, %9, %16 : vector<1x16x4xf32>
    %c8_i32_11 = arith.constant 8 : i32
    %18 = arith.addi %1, %c8_i32_11 : i32
    %c16_i32 = arith.constant 16 : i32
    %19 = arith.cmpi slt, %18, %c16_i32 : i32
    %cst_12 = arith.constant 0.000000e+00 : f32
    %20 = vector.broadcast %cst_12 : f32 to vector<1x16x4xf32>
    %21 = arith.select %19, %14, %20 : vector<1x16x4xf32>
    %22 = tpu.concatenate %17, %4, %21 in 0 : vector<1x16x4xf32>, vector<8x16x4xf32>, vector<1x16x4xf32> -> vector<10x16x4xf32>
    %cst_13 = arith.constant 0.000000e+00 : f32
    %23 = vector.broadcast %cst_13 : f32 to vector<10x1x4xf32>
    %24 = tpu.concatenate %23, %22, %23 in 1 : vector<10x1x4xf32>, vector<10x16x4xf32>, vector<10x1x4xf32> -> vector<10x18x4xf32>
    %25 = vector.extract_strided_slice %24 {offsets = [0, 0, 0], sizes = [10, 16, 4], strides = [1, 1, 1]} : vector<10x18x4xf32> to vector<10x16x4xf32>
    %26 = arith.truncf %25 : vector<10x16x4xf32> to vector<10x16x4xbf16>
    %27 = vector.extract_strided_slice %24 {offsets = [0, 1, 0], sizes = [10, 16, 4], strides = [1, 1, 1]} : vector<10x18x4xf32> to vector<10x16x4xf32>
    %28 = arith.truncf %27 : vector<10x16x4xf32> to vector<10x16x4xbf16>
    %29 = vector.extract_strided_slice %24 {offsets = [0, 2, 0], sizes = [10, 16, 4], strides = [1, 1, 1]} : vector<10x18x4xf32> to vector<10x16x4xf32>
    %30 = arith.truncf %29 : vector<10x16x4xf32> to vector<10x16x4xbf16>
    %31 = tpu.concatenate %26, %28, %30 in 2 : vector<10x16x4xbf16>, vector<10x16x4xbf16>, vector<10x16x4xbf16> -> vector<10x16x12xbf16>
    %32 = vector.extract_strided_slice %31 {offsets = [0, 0, 0], sizes = [8, 16, 12], strides = [1, 1, 1]} : vector<10x16x12xbf16> to vector<8x16x12xbf16>
    %33 = vector.shape_cast %32 : vector<8x16x12xbf16> to vector<128x12xbf16>
    %c0_14 = arith.constant 0 : index
    %c0_15 = arith.constant 0 : index
    %c0_16 = arith.constant 0 : index
    %34 = vector.load %arg2[%c0_14, %c0_15, %c0_16] : memref<3x12x4xbf16, #tpu.memory_space<vmem>>, vector<1x12x4xbf16>
    %35 = vector.shape_cast %34 : vector<1x12x4xbf16> to vector<12x4xbf16>
    %cst_17 = arith.constant dense<0.000000e+00> : vector<128x4xf32>
    %36 = tpu.matmul %33, %35, %cst_17 {dimension_numbers = #tpu.dot_dimension_numbers<[1], [0], [0], [1], [0, 0, 1, 1], [], []>} : vector<128x12xbf16>, vector<12x4xbf16>, vector<128x4xf32> -> vector<128x4xf32>
    %37 = vector.extract_strided_slice %31 {offsets = [1, 0, 0], sizes = [8, 16, 12], strides = [1, 1, 1]} : vector<10x16x12xbf16> to vector<8x16x12xbf16>
    %38 = vector.shape_cast %37 : vector<8x16x12xbf16> to vector<128x12xbf16>
    %c1 = arith.constant 1 : index
    %c0_18 = arith.constant 0 : index
    %c0_19 = arith.constant 0 : index
    %39 = vector.load %arg2[%c1, %c0_18, %c0_19] : memref<3x12x4xbf16, #tpu.memory_space<vmem>>, vector<1x12x4xbf16>
    %40 = vector.shape_cast %39 : vector<1x12x4xbf16> to vector<12x4xbf16>
    %cst_20 = arith.constant dense<0.000000e+00> : vector<128x4xf32>
    %41 = tpu.matmul %38, %40, %cst_20 {dimension_numbers = #tpu.dot_dimension_numbers<[1], [0], [0], [1], [0, 0, 1, 1], [], []>} : vector<128x12xbf16>, vector<12x4xbf16>, vector<128x4xf32> -> vector<128x4xf32>
    %42 = arith.addf %36, %41 : vector<128x4xf32>
    %43 = vector.extract_strided_slice %31 {offsets = [2, 0, 0], sizes = [8, 16, 12], strides = [1, 1, 1]} : vector<10x16x12xbf16> to vector<8x16x12xbf16>
    %44 = vector.shape_cast %43 : vector<8x16x12xbf16> to vector<128x12xbf16>
    %c2 = arith.constant 2 : index
    %c0_21 = arith.constant 0 : index
    %c0_22 = arith.constant 0 : index
    %45 = vector.load %arg2[%c2, %c0_21, %c0_22] : memref<3x12x4xbf16, #tpu.memory_space<vmem>>, vector<1x12x4xbf16>
    %46 = vector.shape_cast %45 : vector<1x12x4xbf16> to vector<12x4xbf16>
    %cst_23 = arith.constant dense<0.000000e+00> : vector<128x4xf32>
    %47 = tpu.matmul %44, %46, %cst_23 {dimension_numbers = #tpu.dot_dimension_numbers<[1], [0], [0], [1], [0, 0, 1, 1], [], []>} : vector<128x12xbf16>, vector<12x4xbf16>, vector<128x4xf32> -> vector<128x4xf32>
    %48 = arith.addf %42, %47 : vector<128x4xf32>
    %c0_24 = arith.constant 0 : index
    %c0_25 = arith.constant 0 : index
    %49 = vector.load %arg4[%c0_24, %c0_25] : memref<1x4xf32, #tpu.memory_space<vmem>>, vector<1x4xf32>
    %50 = vector.broadcast %49 : vector<1x4xf32> to vector<128x4xf32>
    %51 = arith.addf %48, %50 : vector<128x4xf32>
    %cst_26 = arith.constant 0.000000e+00 : f32
    %52 = vector.broadcast %cst_26 : f32 to vector<128x4xf32>
    %53 = arith.maximumf %51, %52 : vector<128x4xf32>
    %54 = vector.shape_cast %53 : vector<128x4xf32> to vector<8x16x4xf32>
    %55 = arith.index_cast %1 : i32 to index
    %c0_27 = arith.constant 0 : index
    %c0_28 = arith.constant 0 : index
    %56 = vector.load %arg7[%55, %c0_27, %c0_28] : memref<16x16x4xf32, #tpu.memory_space<vmem>>, vector<8x16x4xf32>
    tpu.vector_store %arg7[%55, %c0_27, %c0_28], %54 {strides = array<i32>} : memref<16x16x4xf32, #tpu.memory_space<vmem>>, vector<8x16x4xf32>,
    %c1_i32_29 = arith.constant 1 : i32
    %c8_i32_30 = arith.constant 8 : i32
    %57 = arith.muli %c1_i32_29, %c8_i32_30 : i32
    %58 = tpu.assume_multiple %57, 8 : i32
    %c0_31 = arith.constant 0 : index
    %59 = arith.index_cast %58 : i32 to index
    %c0_32 = arith.constant 0 : index
    %c0_33 = arith.constant 0 : index
    %60 = vector.load %arg1[%c0_31, %59, %c0_32, %c0_33] : memref<1x16x16x4xf32, #tpu.memory_space<vmem>>, vector<1x8x16x4xf32>
    %61 = vector.shape_cast %60 : vector<1x8x16x4xf32> to vector<8x16x4xf32>
    %c1_i32_34 = arith.constant 1 : i32
    %62 = arith.subi %58, %c1_i32_34 : i32
    %c0_i32_35 = arith.constant 0 : i32
    %63 = arith.maxsi %62, %c0_i32_35 : i32
    %c0_36 = arith.constant 0 : index
    %64 = arith.index_cast %63 : i32 to index
    %c0_37 = arith.constant 0 : index
    %c0_38 = arith.constant 0 : index
    %65 = vector.load %arg1[%c0_36, %64, %c0_37, %c0_38] : memref<1x16x16x4xf32, #tpu.memory_space<vmem>>, vector<1x1x16x4xf32>
    %66 = vector.shape_cast %65 : vector<1x1x16x4xf32> to vector<1x16x4xf32>
    %c8_i32_39 = arith.constant 8 : i32
    %67 = arith.addi %58, %c8_i32_39 : i32
    %c15_i32_40 = arith.constant 15 : i32
    %68 = arith.minsi %67, %c15_i32_40 : i32
    %c0_41 = arith.constant 0 : index
    %69 = arith.index_cast %68 : i32 to index
    %c0_42 = arith.constant 0 : index
    %c0_43 = arith.constant 0 : index
    %70 = vector.load %arg1[%c0_41, %69, %c0_42, %c0_43] : memref<1x16x16x4xf32, #tpu.memory_space<vmem>>, vector<1x1x16x4xf32>
    %71 = vector.shape_cast %70 : vector<1x1x16x4xf32> to vector<1x16x4xf32>
    %c0_i32_44 = arith.constant 0 : i32
    %72 = arith.cmpi sgt, %58, %c0_i32_44 : i32
    %cst_45 = arith.constant 0.000000e+00 : f32
    %73 = vector.broadcast %cst_45 : f32 to vector<1x16x4xf32>
    %74 = arith.select %72, %66, %73 : vector<1x16x4xf32>
    %c8_i32_46 = arith.constant 8 : i32
    %75 = arith.addi %58, %c8_i32_46 : i32
    %c16_i32_47 = arith.constant 16 : i32
    %76 = arith.cmpi slt, %75, %c16_i32_47 : i32
    %cst_48 = arith.constant 0.000000e+00 : f32
    %77 = vector.broadcast %cst_48 : f32 to vector<1x16x4xf32>
    %78 = arith.select %76, %71, %77 : vector<1x16x4xf32>
    %79 = tpu.concatenate %74, %61, %78 in 0 : vector<1x16x4xf32>, vector<8x16x4xf32>, vector<1x16x4xf32> -> vector<10x16x4xf32>
    %cst_49 = arith.constant 0.000000e+00 : f32
    %80 = vector.broadcast %cst_49 : f32 to vector<10x1x4xf32>
    %81 = tpu.concatenate %80, %79, %80 in 1 : vector<10x1x4xf32>, vector<10x16x4xf32>, vector<10x1x4xf32> -> vector<10x18x4xf32>
    %82 = vector.extract_strided_slice %81 {offsets = [0, 0, 0], sizes = [10, 16, 4], strides = [1, 1, 1]} : vector<10x18x4xf32> to vector<10x16x4xf32>
    %83 = arith.truncf %82 : vector<10x16x4xf32> to vector<10x16x4xbf16>
    %84 = vector.extract_strided_slice %81 {offsets = [0, 1, 0], sizes = [10, 16, 4], strides = [1, 1, 1]} : vector<10x18x4xf32> to vector<10x16x4xf32>
    %85 = arith.truncf %84 : vector<10x16x4xf32> to vector<10x16x4xbf16>
    %86 = vector.extract_strided_slice %81 {offsets = [0, 2, 0], sizes = [10, 16, 4], strides = [1, 1, 1]} : vector<10x18x4xf32> to vector<10x16x4xf32>
    %87 = arith.truncf %86 : vector<10x16x4xf32> to vector<10x16x4xbf16>
    %88 = tpu.concatenate %83, %85, %87 in 2 : vector<10x16x4xbf16>, vector<10x16x4xbf16>, vector<10x16x4xbf16> -> vector<10x16x12xbf16>
    %89 = vector.extract_strided_slice %88 {offsets = [0, 0, 0], sizes = [8, 16, 12], strides = [1, 1, 1]} : vector<10x16x12xbf16> to vector<8x16x12xbf16>
    %90 = vector.shape_cast %89 : vector<8x16x12xbf16> to vector<128x12xbf16>
    %c0_50 = arith.constant 0 : index
    %c0_51 = arith.constant 0 : index
    %c0_52 = arith.constant 0 : index
    %91 = vector.load %arg2[%c0_50, %c0_51, %c0_52] : memref<3x12x4xbf16, #tpu.memory_space<vmem>>, vector<1x12x4xbf16>
    %92 = vector.shape_cast %91 : vector<1x12x4xbf16> to vector<12x4xbf16>
    %cst_53 = arith.constant dense<0.000000e+00> : vector<128x4xf32>
    %93 = tpu.matmul %90, %92, %cst_53 {dimension_numbers = #tpu.dot_dimension_numbers<[1], [0], [0], [1], [0, 0, 1, 1], [], []>} : vector<128x12xbf16>, vector<12x4xbf16>, vector<128x4xf32> -> vector<128x4xf32>
    %94 = vector.extract_strided_slice %88 {offsets = [1, 0, 0], sizes = [8, 16, 12], strides = [1, 1, 1]} : vector<10x16x12xbf16> to vector<8x16x12xbf16>
    %95 = vector.shape_cast %94 : vector<8x16x12xbf16> to vector<128x12xbf16>
    %c1_54 = arith.constant 1 : index
    %c0_55 = arith.constant 0 : index
    %c0_56 = arith.constant 0 : index
    %96 = vector.load %arg2[%c1_54, %c0_55, %c0_56] : memref<3x12x4xbf16, #tpu.memory_space<vmem>>, vector<1x12x4xbf16>
    %97 = vector.shape_cast %96 : vector<1x12x4xbf16> to vector<12x4xbf16>
    %cst_57 = arith.constant dense<0.000000e+00> : vector<128x4xf32>
    %98 = tpu.matmul %95, %97, %cst_57 {dimension_numbers = #tpu.dot_dimension_numbers<[1], [0], [0], [1], [0, 0, 1, 1], [], []>} : vector<128x12xbf16>, vector<12x4xbf16>, vector<128x4xf32> -> vector<128x4xf32>
    %99 = arith.addf %93, %98 : vector<128x4xf32>
    %100 = vector.extract_strided_slice %88 {offsets = [2, 0, 0], sizes = [8, 16, 12], strides = [1, 1, 1]} : vector<10x16x12xbf16> to vector<8x16x12xbf16>
    %101 = vector.shape_cast %100 : vector<8x16x12xbf16> to vector<128x12xbf16>
    %c2_58 = arith.constant 2 : index
    %c0_59 = arith.constant 0 : index
    %c0_60 = arith.constant 0 : index
    %102 = vector.load %arg2[%c2_58, %c0_59, %c0_60] : memref<3x12x4xbf16, #tpu.memory_space<vmem>>, vector<1x12x4xbf16>
    %103 = vector.shape_cast %102 : vector<1x12x4xbf16> to vector<12x4xbf16>
    %cst_61 = arith.constant dense<0.000000e+00> : vector<128x4xf32>
    %104 = tpu.matmul %101, %103, %cst_61 {dimension_numbers = #tpu.dot_dimension_numbers<[1], [0], [0], [1], [0, 0, 1, 1], [], []>} : vector<128x12xbf16>, vector<12x4xbf16>, vector<128x4xf32> -> vector<128x4xf32>
    %105 = arith.addf %99, %104 : vector<128x4xf32>
    %c0_62 = arith.constant 0 : index
    %c0_63 = arith.constant 0 : index
    %106 = vector.load %arg4[%c0_62, %c0_63] : memref<1x4xf32, #tpu.memory_space<vmem>>, vector<1x4xf32>
    %107 = vector.broadcast %106 : vector<1x4xf32> to vector<128x4xf32>
    %108 = arith.addf %105, %107 : vector<128x4xf32>
    %cst_64 = arith.constant 0.000000e+00 : f32
    %109 = vector.broadcast %cst_64 : f32 to vector<128x4xf32>
    %110 = arith.maximumf %108, %109 : vector<128x4xf32>
    %111 = vector.shape_cast %110 : vector<128x4xf32> to vector<8x16x4xf32>
    %112 = arith.index_cast %58 : i32 to index
    %c0_65 = arith.constant 0 : index
    %c0_66 = arith.constant 0 : index
    %113 = vector.load %arg7[%112, %c0_65, %c0_66] : memref<16x16x4xf32, #tpu.memory_space<vmem>>, vector<8x16x4xf32>
    tpu.vector_store %arg7[%112, %c0_65, %c0_66], %111 {strides = array<i32>} : memref<16x16x4xf32, #tpu.memory_space<vmem>>, vector<8x16x4xf32>,
    %c2_i32 = arith.constant 2 : i32
    %c0_i32_67 = arith.constant 0 : i32
    %c8_i32_68 = arith.constant 8 : i32
    %114 = arith.muli %c0_i32_67, %c8_i32_68 : i32
    %115 = tpu.assume_multiple %114, 8 : i32
    %116 = arith.index_cast %115 : i32 to index
    %c0_69 = arith.constant 0 : index
    %c0_70 = arith.constant 0 : index
    %117 = vector.load %arg7[%116, %c0_69, %c0_70] : memref<16x16x4xf32, #tpu.memory_space<vmem>>, vector<8x16x4xf32>
    %c1_i32_71 = arith.constant 1 : i32
    %118 = arith.subi %115, %c1_i32_71 : i32
    %c0_i32_72 = arith.constant 0 : i32
    %119 = arith.maxsi %118, %c0_i32_72 : i32
    %120 = arith.index_cast %119 : i32 to index
    %c0_73 = arith.constant 0 : index
    %c0_74 = arith.constant 0 : index
    %121 = vector.load %arg7[%120, %c0_73, %c0_74] : memref<16x16x4xf32, #tpu.memory_space<vmem>>, vector<1x16x4xf32>
    %c8_i32_75 = arith.constant 8 : i32
    %122 = arith.addi %115, %c8_i32_75 : i32
    %c15_i32_76 = arith.constant 15 : i32
    %123 = arith.minsi %122, %c15_i32_76 : i32
    %124 = arith.index_cast %123 : i32 to index
    %c0_77 = arith.constant 0 : index
    %c0_78 = arith.constant 0 : index
    %125 = vector.load %arg7[%124, %c0_77, %c0_78] : memref<16x16x4xf32, #tpu.memory_space<vmem>>, vector<1x16x4xf32>
    %c0_i32_79 = arith.constant 0 : i32
    %126 = arith.cmpi sgt, %115, %c0_i32_79 : i32
    %cst_80 = arith.constant 0.000000e+00 : f32
    %127 = vector.broadcast %cst_80 : f32 to vector<1x16x4xf32>
    %128 = arith.select %126, %121, %127 : vector<1x16x4xf32>
    %c8_i32_81 = arith.constant 8 : i32
    %129 = arith.addi %115, %c8_i32_81 : i32
    %c16_i32_82 = arith.constant 16 : i32
    %130 = arith.cmpi slt, %129, %c16_i32_82 : i32
    %cst_83 = arith.constant 0.000000e+00 : f32
    %131 = vector.broadcast %cst_83 : f32 to vector<1x16x4xf32>
    %132 = arith.select %130, %125, %131 : vector<1x16x4xf32>
    %133 = tpu.concatenate %128, %117, %132 in 0 : vector<1x16x4xf32>, vector<8x16x4xf32>, vector<1x16x4xf32> -> vector<10x16x4xf32>
    %cst_84 = arith.constant 0.000000e+00 : f32
    %134 = vector.broadcast %cst_84 : f32 to vector<10x1x4xf32>
    %135 = tpu.concatenate %134, %133, %134 in 1 : vector<10x1x4xf32>, vector<10x16x4xf32>, vector<10x1x4xf32> -> vector<10x18x4xf32>
    %136 = vector.extract_strided_slice %135 {offsets = [0, 0, 0], sizes = [10, 16, 4], strides = [1, 1, 1]} : vector<10x18x4xf32> to vector<10x16x4xf32>
    %137 = arith.truncf %136 : vector<10x16x4xf32> to vector<10x16x4xbf16>
    %138 = vector.extract_strided_slice %135 {offsets = [0, 1, 0], sizes = [10, 16, 4], strides = [1, 1, 1]} : vector<10x18x4xf32> to vector<10x16x4xf32>
    %139 = arith.truncf %138 : vector<10x16x4xf32> to vector<10x16x4xbf16>
    %140 = vector.extract_strided_slice %135 {offsets = [0, 2, 0], sizes = [10, 16, 4], strides = [1, 1, 1]} : vector<10x18x4xf32> to vector<10x16x4xf32>
    %141 = arith.truncf %140 : vector<10x16x4xf32> to vector<10x16x4xbf16>
    %142 = tpu.concatenate %137, %139, %141 in 2 : vector<10x16x4xbf16>, vector<10x16x4xbf16>, vector<10x16x4xbf16> -> vector<10x16x12xbf16>
    %143 = vector.extract_strided_slice %142 {offsets = [0, 0, 0], sizes = [8, 16, 12], strides = [1, 1, 1]} : vector<10x16x12xbf16> to vector<8x16x12xbf16>
    %144 = vector.shape_cast %143 : vector<8x16x12xbf16> to vector<128x12xbf16>
    %c0_85 = arith.constant 0 : index
    %c0_86 = arith.constant 0 : index
    %c0_87 = arith.constant 0 : index
    %145 = vector.load %arg3[%c0_85, %c0_86, %c0_87] : memref<3x12x4xbf16, #tpu.memory_space<vmem>>, vector<1x12x4xbf16>
    %146 = vector.shape_cast %145 : vector<1x12x4xbf16> to vector<12x4xbf16>
    %cst_88 = arith.constant dense<0.000000e+00> : vector<128x4xf32>
    %147 = tpu.matmul %144, %146, %cst_88 {dimension_numbers = #tpu.dot_dimension_numbers<[1], [0], [0], [1], [0, 0, 1, 1], [], []>} : vector<128x12xbf16>, vector<12x4xbf16>, vector<128x4xf32> -> vector<128x4xf32>
    %148 = vector.extract_strided_slice %142 {offsets = [1, 0, 0], sizes = [8, 16, 12], strides = [1, 1, 1]} : vector<10x16x12xbf16> to vector<8x16x12xbf16>
    %149 = vector.shape_cast %148 : vector<8x16x12xbf16> to vector<128x12xbf16>
    %c1_89 = arith.constant 1 : index
    %c0_90 = arith.constant 0 : index
    %c0_91 = arith.constant 0 : index
    %150 = vector.load %arg3[%c1_89, %c0_90, %c0_91] : memref<3x12x4xbf16, #tpu.memory_space<vmem>>, vector<1x12x4xbf16>
    %151 = vector.shape_cast %150 : vector<1x12x4xbf16> to vector<12x4xbf16>
    %cst_92 = arith.constant dense<0.000000e+00> : vector<128x4xf32>
    %152 = tpu.matmul %149, %151, %cst_92 {dimension_numbers = #tpu.dot_dimension_numbers<[1], [0], [0], [1], [0, 0, 1, 1], [], []>} : vector<128x12xbf16>, vector<12x4xbf16>, vector<128x4xf32> -> vector<128x4xf32>
    %153 = arith.addf %147, %152 : vector<128x4xf32>
    %154 = vector.extract_strided_slice %142 {offsets = [2, 0, 0], sizes = [8, 16, 12], strides = [1, 1, 1]} : vector<10x16x12xbf16> to vector<8x16x12xbf16>
    %155 = vector.shape_cast %154 : vector<8x16x12xbf16> to vector<128x12xbf16>
    %c2_93 = arith.constant 2 : index
    %c0_94 = arith.constant 0 : index
    %c0_95 = arith.constant 0 : index
    %156 = vector.load %arg3[%c2_93, %c0_94, %c0_95] : memref<3x12x4xbf16, #tpu.memory_space<vmem>>, vector<1x12x4xbf16>
    %157 = vector.shape_cast %156 : vector<1x12x4xbf16> to vector<12x4xbf16>
    %cst_96 = arith.constant dense<0.000000e+00> : vector<128x4xf32>
    %158 = tpu.matmul %155, %157, %cst_96 {dimension_numbers = #tpu.dot_dimension_numbers<[1], [0], [0], [1], [0, 0, 1, 1], [], []>} : vector<128x12xbf16>, vector<12x4xbf16>, vector<128x4xf32> -> vector<128x4xf32>
    %159 = arith.addf %153, %158 : vector<128x4xf32>
    %c0_97 = arith.constant 0 : index
    %c0_98 = arith.constant 0 : index
    %160 = vector.load %arg5[%c0_97, %c0_98] : memref<1x4xf32, #tpu.memory_space<vmem>>, vector<1x4xf32>
    %161 = vector.broadcast %160 : vector<1x4xf32> to vector<128x4xf32>
    %162 = arith.addf %159, %161 : vector<128x4xf32>
    %c0_99 = arith.constant 0 : index
    %163 = arith.index_cast %115 : i32 to index
    %c0_100 = arith.constant 0 : index
    %c0_101 = arith.constant 0 : index
    %164 = vector.load %arg1[%c0_99, %163, %c0_100, %c0_101] : memref<1x16x16x4xf32, #tpu.memory_space<vmem>>, vector<1x8x16x4xf32>
    %165 = vector.shape_cast %164 : vector<1x8x16x4xf32> to vector<8x16x4xf32>
    %166 = vector.shape_cast %165 : vector<8x16x4xf32> to vector<128x4xf32>
    %167 = arith.addf %162, %166 : vector<128x4xf32>
    %cst_102 = arith.constant 0.000000e+00 : f32
    %168 = vector.broadcast %cst_102 : f32 to vector<128x4xf32>
    %169 = arith.maximumf %167, %168 : vector<128x4xf32>
    %c16_i32_103 = arith.constant 16 : i32
    %170 = arith.muli %115, %c16_i32_103 : i32
    %c0_104 = arith.constant 0 : index
    %171 = arith.index_cast %170 : i32 to index
    %c0_105 = arith.constant 0 : index
    %172 = vector.load %arg6[%c0_104, %171, %c0_105] : memref<1x256x4xf32, #tpu.memory_space<vmem>>, vector<1x128x4xf32>
    %173 = vector.shape_cast %172 : vector<1x128x4xf32> to vector<128x4xf32>
    %174 = vector.shape_cast %169 : vector<128x4xf32> to vector<1x128x4xf32>
    tpu.vector_store %arg6[%c0_104, %171, %c0_105], %174 {strides = array<i32>} : memref<1x256x4xf32, #tpu.memory_space<vmem>>, vector<1x128x4xf32>,
    %c1_i32_106 = arith.constant 1 : i32
    %c8_i32_107 = arith.constant 8 : i32
    %175 = arith.muli %c1_i32_106, %c8_i32_107 : i32
    %176 = tpu.assume_multiple %175, 8 : i32
    %177 = arith.index_cast %176 : i32 to index
    %c0_108 = arith.constant 0 : index
    %c0_109 = arith.constant 0 : index
    %178 = vector.load %arg7[%177, %c0_108, %c0_109] : memref<16x16x4xf32, #tpu.memory_space<vmem>>, vector<8x16x4xf32>
    %c1_i32_110 = arith.constant 1 : i32
    %179 = arith.subi %176, %c1_i32_110 : i32
    %c0_i32_111 = arith.constant 0 : i32
    %180 = arith.maxsi %179, %c0_i32_111 : i32
    %181 = arith.index_cast %180 : i32 to index
    %c0_112 = arith.constant 0 : index
    %c0_113 = arith.constant 0 : index
    %182 = vector.load %arg7[%181, %c0_112, %c0_113] : memref<16x16x4xf32, #tpu.memory_space<vmem>>, vector<1x16x4xf32>
    %c8_i32_114 = arith.constant 8 : i32
    %183 = arith.addi %176, %c8_i32_114 : i32
    %c15_i32_115 = arith.constant 15 : i32
    %184 = arith.minsi %183, %c15_i32_115 : i32
    %185 = arith.index_cast %184 : i32 to index
    %c0_116 = arith.constant 0 : index
    %c0_117 = arith.constant 0 : index
    %186 = vector.load %arg7[%185, %c0_116, %c0_117] : memref<16x16x4xf32, #tpu.memory_space<vmem>>, vector<1x16x4xf32>
    %c0_i32_118 = arith.constant 0 : i32
    %187 = arith.cmpi sgt, %176, %c0_i32_118 : i32
    %cst_119 = arith.constant 0.000000e+00 : f32
    %188 = vector.broadcast %cst_119 : f32 to vector<1x16x4xf32>
    %189 = arith.select %187, %182, %188 : vector<1x16x4xf32>
    %c8_i32_120 = arith.constant 8 : i32
    %190 = arith.addi %176, %c8_i32_120 : i32
    %c16_i32_121 = arith.constant 16 : i32
    %191 = arith.cmpi slt, %190, %c16_i32_121 : i32
    %cst_122 = arith.constant 0.000000e+00 : f32
    %192 = vector.broadcast %cst_122 : f32 to vector<1x16x4xf32>
    %193 = arith.select %191, %186, %192 : vector<1x16x4xf32>
    %194 = tpu.concatenate %189, %178, %193 in 0 : vector<1x16x4xf32>, vector<8x16x4xf32>, vector<1x16x4xf32> -> vector<10x16x4xf32>
    %cst_123 = arith.constant 0.000000e+00 : f32
    %195 = vector.broadcast %cst_123 : f32 to vector<10x1x4xf32>
    %196 = tpu.concatenate %195, %194, %195 in 1 : vector<10x1x4xf32>, vector<10x16x4xf32>, vector<10x1x4xf32> -> vector<10x18x4xf32>
    %197 = vector.extract_strided_slice %196 {offsets = [0, 0, 0], sizes = [10, 16, 4], strides = [1, 1, 1]} : vector<10x18x4xf32> to vector<10x16x4xf32>
    %198 = arith.truncf %197 : vector<10x16x4xf32> to vector<10x16x4xbf16>
    %199 = vector.extract_strided_slice %196 {offsets = [0, 1, 0], sizes = [10, 16, 4], strides = [1, 1, 1]} : vector<10x18x4xf32> to vector<10x16x4xf32>
    %200 = arith.truncf %199 : vector<10x16x4xf32> to vector<10x16x4xbf16>
    %201 = vector.extract_strided_slice %196 {offsets = [0, 2, 0], sizes = [10, 16, 4], strides = [1, 1, 1]} : vector<10x18x4xf32> to vector<10x16x4xf32>
    %202 = arith.truncf %201 : vector<10x16x4xf32> to vector<10x16x4xbf16>
    %203 = tpu.concatenate %198, %200, %202 in 2 : vector<10x16x4xbf16>, vector<10x16x4xbf16>, vector<10x16x4xbf16> -> vector<10x16x12xbf16>
    %204 = vector.extract_strided_slice %203 {offsets = [0, 0, 0], sizes = [8, 16, 12], strides = [1, 1, 1]} : vector<10x16x12xbf16> to vector<8x16x12xbf16>
    %205 = vector.shape_cast %204 : vector<8x16x12xbf16> to vector<128x12xbf16>
    %c0_124 = arith.constant 0 : index
    %c0_125 = arith.constant 0 : index
    %c0_126 = arith.constant 0 : index
    %206 = vector.load %arg3[%c0_124, %c0_125, %c0_126] : memref<3x12x4xbf16, #tpu.memory_space<vmem>>, vector<1x12x4xbf16>
    %207 = vector.shape_cast %206 : vector<1x12x4xbf16> to vector<12x4xbf16>
    %cst_127 = arith.constant dense<0.000000e+00> : vector<128x4xf32>
    %208 = tpu.matmul %205, %207, %cst_127 {dimension_numbers = #tpu.dot_dimension_numbers<[1], [0], [0], [1], [0, 0, 1, 1], [], []>} : vector<128x12xbf16>, vector<12x4xbf16>, vector<128x4xf32> -> vector<128x4xf32>
    %209 = vector.extract_strided_slice %203 {offsets = [1, 0, 0], sizes = [8, 16, 12], strides = [1, 1, 1]} : vector<10x16x12xbf16> to vector<8x16x12xbf16>
    %210 = vector.shape_cast %209 : vector<8x16x12xbf16> to vector<128x12xbf16>
    %c1_128 = arith.constant 1 : index
    %c0_129 = arith.constant 0 : index
    %c0_130 = arith.constant 0 : index
    %211 = vector.load %arg3[%c1_128, %c0_129, %c0_130] : memref<3x12x4xbf16, #tpu.memory_space<vmem>>, vector<1x12x4xbf16>
    %212 = vector.shape_cast %211 : vector<1x12x4xbf16> to vector<12x4xbf16>
    %cst_131 = arith.constant dense<0.000000e+00> : vector<128x4xf32>
    %213 = tpu.matmul %210, %212, %cst_131 {dimension_numbers = #tpu.dot_dimension_numbers<[1], [0], [0], [1], [0, 0, 1, 1], [], []>} : vector<128x12xbf16>, vector<12x4xbf16>, vector<128x4xf32> -> vector<128x4xf32>
    %214 = arith.addf %208, %213 : vector<128x4xf32>
    %215 = vector.extract_strided_slice %203 {offsets = [2, 0, 0], sizes = [8, 16, 12], strides = [1, 1, 1]} : vector<10x16x12xbf16> to vector<8x16x12xbf16>
    %216 = vector.shape_cast %215 : vector<8x16x12xbf16> to vector<128x12xbf16>
    %c2_132 = arith.constant 2 : index
    %c0_133 = arith.constant 0 : index
    %c0_134 = arith.constant 0 : index
    %217 = vector.load %arg3[%c2_132, %c0_133, %c0_134] : memref<3x12x4xbf16, #tpu.memory_space<vmem>>, vector<1x12x4xbf16>
    %218 = vector.shape_cast %217 : vector<1x12x4xbf16> to vector<12x4xbf16>
    %cst_135 = arith.constant dense<0.000000e+00> : vector<128x4xf32>
    %219 = tpu.matmul %216, %218, %cst_135 {dimension_numbers = #tpu.dot_dimension_numbers<[1], [0], [0], [1], [0, 0, 1, 1], [], []>} : vector<128x12xbf16>, vector<12x4xbf16>, vector<128x4xf32> -> vector<128x4xf32>
    %220 = arith.addf %214, %219 : vector<128x4xf32>
    %c0_136 = arith.constant 0 : index
    %c0_137 = arith.constant 0 : index
    %221 = vector.load %arg5[%c0_136, %c0_137] : memref<1x4xf32, #tpu.memory_space<vmem>>, vector<1x4xf32>
    %222 = vector.broadcast %221 : vector<1x4xf32> to vector<128x4xf32>
    %223 = arith.addf %220, %222 : vector<128x4xf32>
    %c0_138 = arith.constant 0 : index
    %224 = arith.index_cast %176 : i32 to index
    %c0_139 = arith.constant 0 : index
    %c0_140 = arith.constant 0 : index
    %225 = vector.load %arg1[%c0_138, %224, %c0_139, %c0_140] : memref<1x16x16x4xf32, #tpu.memory_space<vmem>>, vector<1x8x16x4xf32>
    %226 = vector.shape_cast %225 : vector<1x8x16x4xf32> to vector<8x16x4xf32>
    %227 = vector.shape_cast %226 : vector<8x16x4xf32> to vector<128x4xf32>
    %228 = arith.addf %223, %227 : vector<128x4xf32>
    %cst_141 = arith.constant 0.000000e+00 : f32
    %229 = vector.broadcast %cst_141 : f32 to vector<128x4xf32>
    %230 = arith.maximumf %228, %229 : vector<128x4xf32>
    %c16_i32_142 = arith.constant 16 : i32
    %231 = arith.muli %176, %c16_i32_142 : i32
    %c0_143 = arith.constant 0 : index
    %232 = arith.index_cast %231 : i32 to index
    %c0_144 = arith.constant 0 : index
    %233 = vector.load %arg6[%c0_143, %232, %c0_144] : memref<1x256x4xf32, #tpu.memory_space<vmem>>, vector<1x128x4xf32>
    %234 = vector.shape_cast %233 : vector<1x128x4xf32> to vector<128x4xf32>
    %235 = vector.shape_cast %230 : vector<128x4xf32> to vector<1x128x4xf32>
    tpu.vector_store %arg6[%c0_143, %232, %c0_144], %235 {strides = array<i32>} : memref<1x256x4xf32, #tpu.memory_space<vmem>>, vector<1x128x4xf32>,
    %c2_i32_145 = arith.constant 2 : i32
    return
  }
  func.func @transform_0(%arg0: i32) -> (i32, i32, i32, i32) {
    %c0_i32 = arith.constant 0 : i32
    %c0_i32_0 = arith.constant 0 : i32
    %c0_i32_1 = arith.constant 0 : i32
    %c0_i32_2 = arith.constant 0 : i32
    return %arg0, %c0_i32, %c0_i32_0, %c0_i32_1 : i32, i32, i32, i32
  }
  func.func @transform_1(%arg0: i32) -> (i32, i32, i32) {
    %c0_i32 = arith.constant 0 : i32
    %c0_i32_0 = arith.constant 0 : i32
    %c0_i32_1 = arith.constant 0 : i32
    %c0_i32_2 = arith.constant 0 : i32
    return %c0_i32, %c0_i32_0, %c0_i32_1 : i32, i32, i32
  }
  func.func @transform_2(%arg0: i32) -> (i32, i32, i32) {
    %c0_i32 = arith.constant 0 : i32
    %c0_i32_0 = arith.constant 0 : i32
    %c0_i32_1 = arith.constant 0 : i32
    %c0_i32_2 = arith.constant 0 : i32
    return %c0_i32, %c0_i32_0, %c0_i32_1 : i32, i32, i32
  }
  func.func @transform_3(%arg0: i32) -> (i32, i32) {
    %c0_i32 = arith.constant 0 : i32
    %c0_i32_0 = arith.constant 0 : i32
    %c0_i32_1 = arith.constant 0 : i32
    return %c0_i32, %c0_i32_0 : i32, i32
  }
  func.func @transform_4(%arg0: i32) -> (i32, i32) {
    %c0_i32 = arith.constant 0 : i32
    %c0_i32_0 = arith.constant 0 : i32
    %c0_i32_1 = arith.constant 0 : i32
    return %c0_i32, %c0_i32_0 : i32, i32
  }
  func.func @transform_5(%arg0: i32) -> (i32, i32, i32) {
    %c0_i32 = arith.constant 0 : i32
    %c0_i32_0 = arith.constant 0 : i32
    %c0_i32_1 = arith.constant 0 : i32
    return %arg0, %c0_i32, %c0_i32_0 : i32, i32, i32
  }
}

</mosaic_0001>

<bundles_post_ra>
// kernel: tpu_custom_call.1
= control target key start
LH: loop header
LB: loop body
LE: loop exit
PB: predicated region body
PF: predicated region fallthrough
CT: control target
= control target key end

     0   :  { %s3634_s18 = smov 0   ;;  %s4749_s0 = inlined_call_operand.vmem [shape: f32[2,16,16,4], index: 0, kind: input, shape index: {}]   ;;  %s4750_s1 = inlined_call_operand.vmem [shape: bf16[3,12,4], index: 1, kind: input, shape index: {}]   ;;  %s4751_s2 = inlined_call_operand.vmem [shape: bf16[3,12,4], index: 2, kind: input, shape index: {}]   ;;  %s4752_s3 = inlined_call_operand.vmem [shape: f32[1,4], index: 3, kind: input, shape index: {}]   ;;  %s4753_s4 = inlined_call_operand.vmem [shape: f32[1,4], index: 4, kind: input, shape index: {}]   ;;  %s4754_s5 = inlined_call_operand.vmem [shape: f32[2,256,4], index: 5, kind: output, shape index: {}]  }
   0x1 LB: > { %s3339_s19 = sadd.s32 4294967295, %s3599_s18   ;;  %p3343_p0 = scmp.ge.s32.totalorder %s3599_s18, 1  ;;  %s3599_s18 = sphi %s3634_s18, %s15_s18  }
   0x2   : > { %p187_p1 = scmp.lt.s32.totalorder %s3599_s18, 3 }
   0x4   : > { %p188_p2 = pnand %p3343_p0, %p187_p1 }
   0x5   : > { %p215_p3 = scmp.lt.s32.totalorder (!%p188_p2), %s3339_s19, 1  ;;  %s3602_s24 = smov (!%p188_p2), 4  }
   0x6   : > { %191 = sbr.rel (%p188_p2) target bundleno = 903 (0x387), region = 40  ;;  %s3603_s25 = smov (!%p188_p2), 8  }
   0xb   : > { %vm290_vm0 = vcmask 1040384   ;;  %v3601_v0 = vmov 0.0   ;;  %s4756_s19 = smov (!%p215_p3, %s3339_s19), 1  ;;  %vm481_vm1 = vsmask.f32 7424  ;;  %vm622_vm2 = vcmask 1046528  }
   0xc   : > { %v291_v1 = vrot.slane %v3601_v0, 7  ;;  %s3564_s20 = sshll.u32 %s4756_s19, 8  ;;  %vm742_vm3 = vcmask 1045504   ;;  %vm673_vm4 = vcmask 31744   ;;  %vm694_vm5 = vcmask 64512  }
   0xd   : > { %s3652_s23 = scalar_lea.vmem %s4749_s0, %s3564_s20  ;;  %vm725_vm6 = vcmask 97280   ;;  %s4523_s22 = scalar_lea.vmem %s4754_s5, %s3564_s20 }
   0xe   : > { %v351_v2 = vsel %vm290_vm0, 0.0, %v291_v1  ;;  %v361_v3 = vsel %vm290_vm0, %v291_v1, 0.0  ;;  %v372_v4 = vpack.c.bf16 %v291_v1, %v291_v1  ;;  %v228_v10 = vld [vmem:[%s3652_s23] sm:$0xff]  ;;  %v229_v11 = vld [vmem:[%s3652_s23 + $0x8] sm:$0xff]  ;;  %v230_v12 = vld [vmem:[%s3652_s23 + $0x10] sm:$0xff] }
   0xf   : > { %v371_v5 = vpack.c.bf16 %v351_v2, %v351_v2  ;;  %v391_v6 = vpack.c.bf16 %v361_v3, %v361_v3  ;;  %v294_v13 = vrot.slane %v228_v10, 7  ;;  %v295_v14 = vrot.slane %v229_v11, 7  ;;  %v231_v15 = vld [vmem:[%s3652_s23 + $0x18] sm:$0xff]  ;;  %v232_v17 = vld [vmem:[%s3652_s23 + $0x20] sm:$0xff]  ;;  %v233_v37 = vld [vmem:[%s3652_s23 + $0x28] sm:$0xff] }
  0x10   : > { %v422_v7 = vunpack.c.l.b16 %v372_v4  ;;  %v297_v16 = vrot.slane %v230_v12, 7  ;;  %v298_v20 = vrot.slane %v231_v15, 7  ;;  %v300_v24 = vrot.slane %v232_v17, 7  ;;  %v235_v11 = vld [vmem:[%s3652_s23 + $0x38] sm:$0xff]  ;;  %v236_v12 = vld [vmem:[%s3652_s23 + $0x40] sm:$0xff]  ;;  %v237_v17 = vld [vmem:[%s3652_s23 + $0x48] sm:$0xff] }
  0x11   : > { %v421_v8 = vunpack.c.l.b16 %v371_v5  ;;  %v461_v9 = vunpack.c.l.b16 %v391_v6  ;;  %v296_v21 = vsel %vm290_vm0, %v294_v13, %v295_v14  ;;  %v352_v22 = vsel %vm290_vm0, 0.0, %v294_v13  ;;  %v234_v6 = vld [vmem:[%s3652_s23 + $0x30] sm:$0xff] }
  0x12   : > { %v362_v23 = vsel %vm290_vm0, %v295_v14, 0.0  ;;  %v373_v28 = vpack.c.bf16 %v352_v22, %v352_v22  ;;  %v374_v29 = vpack.c.bf16 %v296_v21, %v296_v21  ;;  %v353_v32 = vsel %vm290_vm0, 0.0, %v297_v16 }
  0x13   : > { %v3659_v18 = vpack.c.b16 %v422_v7, %v421_v8  ;;  %v471_v19 = vpack.c.b16 %v461_v9, %v461_v9  ;;  %v392_v30 = vpack.c.bf16 %v362_v23, %v362_v23  ;;  %v299_v36 = vsel %vm290_vm0, %v297_v16, %v298_v20 }
  0x14   : > { %v423_v35 = vunpack.c.l.b16 %v373_v28  ;;  %v424_v38 = vunpack.c.l.b16 %v374_v29  ;;  %v363_v41 = vsel %vm290_vm0, %v298_v20, 0.0  ;;  %v375_v43 = vpack.c.bf16 %v353_v32, %v353_v32 }
  0x15   : > { %v483_v25 = vshrl.u32 %v3659_v18, 16  ;;  %v485_v26 = vshll.u32 %v3659_v18, 16  ;;  %v490_v27 = vshll.u32 %v471_v19, 16  ;;  %v623_v31 = vrot.slane %v3659_v18, 1 }
  0x16   : > { %v462_v39 = vunpack.c.l.b16 %v392_v30  ;;  %v624_v40 = vrot.slane %v471_v19, 1  ;;  %v376_v44 = vpack.c.bf16 %v299_v36, %v299_v36  ;;  %v393_v45 = vpack.c.bf16 %v363_v41, %v363_v41  ;;  %v238_v19 = vld [vmem:[%s3652_s23 + $0x50] sm:$0xff] }
  0x17   : > { %v487_v33 = vrot.slane %v485_v26, 1  ;;  %v492_v34 = vrot.slane %v490_v27, 1  ;;  %v3671_v46 = vpack.c.b16 %v424_v38, %v423_v35  ;;  %v301_v48 = vrot.slane %v233_v37, 7 }
  0x18   : > { %v472_v47 = vpack.c.b16 %v462_v39, %v462_v39  ;;  %v354_v49 = vsel %vm290_vm0, 0.0, %v300_v24  ;;  %v425_v51 = vunpack.c.l.b16 %v375_v43  ;;  %v426_v52 = vunpack.c.l.b16 %v376_v44 }
  0x19   : > { %v488_v42 = vor.u32 %v487_v33, %v483_v25  ;;  %v463_v53 = vunpack.c.l.b16 %v393_v45  ;;  %v495_v54 = vshrl.u32 %v3671_v46, 16  ;;  %v497_v55 = vshll.u32 %v3671_v46, 16 }
  0x1a   : > { %v502_v56 = vshll.u32 %v472_v47, 16  ;;  %v626_v57 = vrot.slane %v3671_v46, 1  ;;  %v3682_v58 = vpack.c.b16 %v426_v52, %v425_v51  ;;  %v627_v60 = vrot.slane %v472_v47, 1 }
  0x1b   : > { %v3675_v50 = vsel %vm481_vm1, %v488_v42, %v492_v34  ;;  %v3684_v59 = vpack.c.b16 %v463_v53, %v463_v53  ;;  %v302_v61 = vsel %vm290_vm0, %v300_v24, %v301_v48  ;;  %v499_v62 = vrot.slane %v497_v55, 1 }
  0x1c   : > { %602 = vrot.lane.b32.xlu1 %v3675_v50, %s3602_s24  ;;  %v504_v63 = vrot.slane %v502_v56, 1  ;;  %v364_v0 = vsel %vm290_vm0, %v301_v48, 0.0  ;;  %v377_v1 = vpack.c.bf16 %v354_v49, %v354_v49  ;;  %v3689_v2 = vsel %vm622_vm2, %v623_v31, %v624_v40  ;;  %v239_v49 = vld [vmem:[%s3652_s23 + $0x58] sm:$0xff] }
  0x1d   : > { %v507_v3 = vshrl.u32 %v3682_v58, 16  ;;  %v509_v4 = vshll.u32 %v3682_v58, 16  ;;  %v514_v5 = vshll.u32 %v3684_v59, 16  ;;  %v500_v7 = vor.u32 %v499_v62, %v495_v54 }
  0x1e   : > { %v628_v8 = vsel %vm622_vm2, %v626_v57, %v627_v60  ;;  %v629_v9 = vrot.slane %v3682_v58, 1  ;;  %v378_v10 = vpack.c.bf16 %v302_v61, %v302_v61  ;;  %v394_v15 = vpack.c.bf16 %v364_v0, %v364_v0 }
  0x1f   : > { %v511_v13 = vrot.slane %v509_v4, 1  ;;  %v516_v14 = vrot.slane %v514_v5, 1  ;;  %v427_v16 = vunpack.c.l.b16 %v377_v1  ;;  %v505_v20 = vsel %vm481_vm1, %v500_v7, %v504_v63 }
  0x20   : > { %v630_v21 = vrot.slane %v3684_v59, 1  ;;  %v428_v22 = vunpack.c.l.b16 %v378_v10  ;;  %v303_v23 = vrot.slane %v234_v6, 7  ;;  %604 = vrot.lane.b32.xlu0 %v505_v20, %s3602_s24  ;;  %v464_v25 = vunpack.c.l.b16 %v394_v15 }
  0x21   : > { %v512_v24 = vor.u32 %v511_v13, %v507_v3  ;;  %v304_v26 = vrot.slane %v235_v11, 7  ;;  %v306_v27 = vrot.slane %v236_v12, 7  ;;  %v307_v30 = vrot.slane %v237_v17, 7 }
  0x22   : > { %v3706_v28 = vpack.c.b16 %v428_v22, %v427_v16  ;;  %v355_v29 = vsel %vm290_vm0, 0.0, %v303_v23  ;;  %v309_v31 = vrot.slane %v238_v19, 7  ;;  %v474_v33 = vpack.c.b16 %v464_v25, %v464_v25 }
  0x23   : > { %v517_v32 = vsel %vm481_vm1, %v512_v24, %v516_v14  ;;  %v305_v34 = vsel %vm290_vm0, %v303_v23, %v304_v26  ;;  %v365_v35 = vsel %vm290_vm0, %v304_v26, 0.0  ;;  %v379_v39 = vpack.c.bf16 %v355_v29, %v355_v29  ;;  %v241_v26 = vld [vmem:[%s3652_s23 + $0x68] sm:$0xff] }
  0x24   : > { %653 = vrot.lane.b32.xlu1 %v3689_v2, %s3603_s25  ;;  %606 = vrot.lane.b32.xlu2 %v517_v32, %s3602_s24  ;;  %v519_v36 = vshrl.u32 %v3706_v28, 16  ;;  %v521_v37 = vshll.u32 %v3706_v28, 16  ;;  %v632_v38 = vrot.slane %v3706_v28, 1  ;;  %v526_v40 = vshll.u32 %v474_v33, 16  ;;  %v3390_v32 = vld [vmem:[%s3652_s23 + $0x80] sm:$0xff] }
  0x25   : > { %v633_v41 = vrot.slane %v474_v33, 1  ;;  %v380_v42 = vpack.c.bf16 %v305_v34, %v305_v34  ;;  %v395_v43 = vpack.c.bf16 %v365_v35, %v365_v35  ;;  %v429_v45 = vunpack.c.l.b16 %v379_v39 }
  0x26   : > { %v523_v44 = vrot.slane %v521_v37, 1  ;;  %v308_v47 = vsel %vm290_vm0, %v306_v27, %v307_v30  ;;  %v356_v48 = vsel %vm290_vm0, 0.0, %v306_v27  ;;  %v528_v51 = vrot.slane %v526_v40, 1 }
  0x27   : > { %v634_v52 = vsel %vm622_vm2, %v632_v38, %v633_v41  ;;  %v430_v53 = vunpack.c.l.b16 %v380_v42  ;;  %v465_v54 = vunpack.c.l.b16 %v395_v43  ;;  %v366_v56 = vsel %vm290_vm0, %v307_v30, 0.0 }
  0x28   : > { %v524_v55 = vor.u32 %v523_v44, %v519_v36  ;;  %v381_v57 = vpack.c.bf16 %v356_v48, %v356_v48  ;;  %v382_v59 = vpack.c.bf16 %v308_v47, %v308_v47  ;;  %655 = vrot.lane.b32.xlu0 %v628_v8, %s3603_s25  ;;  %v631_v60 = vsel %vm622_vm2, %v629_v9, %v630_v21  ;;  %v240_v21 = vld [vmem:[%s3652_s23 + $0x60] sm:$0xff] }
  0x29   : > { %v3723_v61 = vpack.c.b16 %v430_v53, %v429_v45  ;;  %v396_v62 = vpack.c.bf16 %v366_v56, %v366_v56  ;;  %v310_v63 = vrot.slane %v239_v49, 7  ;;  %v475_v0 = vpack.c.b16 %v465_v54, %v465_v54 }
  0x2a   : > { %v431_v1 = vunpack.c.l.b16 %v381_v57  ;;  %v432_v3 = vunpack.c.l.b16 %v382_v59  ;;  %v357_v4 = vsel %vm290_vm0, 0.0, %v309_v31  ;;  %v529_v5 = vsel %vm481_vm1, %v524_v55, %v528_v51  ;;  %v3391_v51 = vld [vmem:[%s3652_s23 + $0x88] sm:$0xff] }
  0x2b   : > { %v466_v6 = vunpack.c.l.b16 %v396_v62  ;;  %v531_v7 = vshrl.u32 %v3723_v61, 16  ;;  %v533_v9 = vshll.u32 %v3723_v61, 16  ;;  %v538_v10 = vshll.u32 %v475_v0, 16 }
  0x2c   : > { %659 = vrot.lane.b32.xlu1 %v634_v52, %s3603_s25  ;;  %657 = vrot.lane.b32.xlu2 %v631_v60, %s3603_s25  ;;  %v3730_v8 = vpack.c.b16 %v432_v3, %v431_v1  ;;  %v311_v11 = vsel %vm290_vm0, %v309_v31, %v310_v63  ;;  %v635_v12 = vrot.slane %v3723_v61, 1  ;;  %v367_v14 = vsel %vm290_vm0, %v310_v63, 0.0 }
  0x2d   : > { %v476_v13 = vpack.c.b16 %v466_v6, %v466_v6  ;;  %v383_v15 = vpack.c.bf16 %v357_v4, %v357_v4  ;;  %v535_v19 = vrot.slane %v533_v9, 1  ;;  %v540_v20 = vrot.slane %v538_v10, 1 }
  0x2e   : > { %v543_v16 = vshrl.u32 %v3730_v8, 16  ;;  %v545_v17 = vshll.u32 %v3730_v8, 16  ;;  %v384_v23 = vpack.c.bf16 %v311_v11, %v311_v11  ;;  %v397_v24 = vpack.c.bf16 %v367_v14, %v367_v14 }
  0x2f   : > { %v550_v22 = vshll.u32 %v476_v13, 16  ;;  %v433_v25 = vunpack.c.l.b16 %v383_v15  ;;  %v636_v27 = vrot.slane %v475_v0, 1  ;;  %v536_v30 = vor.u32 %v535_v19, %v531_v7 }
  0x30   : > { %v547_v29 = vrot.slane %v545_v17, 1  ;;  %v638_v31 = vrot.slane %v3730_v8, 1  ;;  %608 = vrot.lane.b32.xlu0 %v529_v5, %s3602_s24  ;;  %v434_v34 = vunpack.c.l.b16 %v384_v23  ;;  %v467_v35 = vunpack.c.l.b16 %v397_v24 }
  0x31   : > { %v552_v33 = vrot.slane %v550_v22, 1  ;;  %v312_v36 = vrot.slane %v240_v21, 7  ;;  %v541_v38 = vsel %vm481_vm1, %v536_v30, %v540_v20  ;;  %v639_v39 = vrot.slane %v476_v13, 1 }
  0x32   : > { %v548_v37 = vor.u32 %v547_v29, %v543_v16  ;;  %v313_v40 = vrot.slane %v241_v26, 7  ;;  %v3744_v41 = vpack.c.b16 %v434_v34, %v433_v25  ;;  %v477_v42 = vpack.c.b16 %v467_v35, %v467_v35  ;;  %v242_v35 = vld [vmem:[%s3652_s23 + $0x70] sm:$0xff] }
  0x33   : > { %v358_v43 = vsel %vm290_vm0, 0.0, %v312_v36  ;;  %v1052_v44 = vrot.slane %v3390_v32, 7  ;;  %v637_v52 = vsel %vm622_vm2, %v635_v12, %v636_v27  ;;  %v1053_v63 = vrot.slane %v3391_v51, 7 }
  0x34   : > { %v553_v45 = vsel %vm481_vm1, %v548_v37, %v552_v33  ;;  %610 = vrot.lane.b32.xlu2 %v541_v38, %s3602_s24  ;;  %v314_v47 = vsel %vm290_vm0, %v312_v36, %v313_v40  ;;  %v368_v48 = vsel %vm290_vm0, %v313_v40, 0.0  ;;  %v385_v49 = vpack.c.bf16 %v358_v43, %v358_v43  ;;  %v243_v36 = vld [vmem:[%s3652_s23 + $0x78] sm:$0xff] }
  0x35   : > { %612 = vrot.lane.b32.xlu1 %v553_v45, %s3602_s24  ;;  %v557_v53 = vshll.u32 %v3744_v41, 16  ;;  %v562_v54 = vshll.u32 %v477_v42, 16  ;;  %v641_v55 = vrot.slane %v3744_v41, 1  ;;  %v555_v56 = vshrl.u32 %v3744_v41, 16 }
  0x36   : > { %v642_v57 = vrot.slane %v477_v42, 1  ;;  %v386_v59 = vpack.c.bf16 %v314_v47, %v314_v47  ;;  %v398_v60 = vpack.c.bf16 %v368_v48, %v368_v48  ;;  %v1110_v0 = vsel %vm290_vm0, 0.0, %v1052_v44 }
  0x37   : > { %v559_v62 = vrot.slane %v557_v53, 1  ;;  %v564_v1 = vrot.slane %v562_v54, 1  ;;  %v640_v3 = vsel %vm622_vm2, %v638_v31, %v639_v39  ;;  %v435_v4 = vunpack.c.l.b16 %v385_v49 }
  0x38   : > { %v1131_v5 = vpack.c.bf16 %v1110_v0, %v1110_v0  ;;  %661 = vrot.lane.b32.xlu0 %v637_v52, %s3603_s25  ;;  %v643_v6 = vsel %vm622_vm2, %v641_v55, %v642_v57  ;;  %v436_v7 = vunpack.c.l.b16 %v386_v59  ;;  %v1054_v9 = vsel %vm290_vm0, %v1052_v44, %v1053_v63  ;;  %v3380_v59 = vld [vmem:[%s4750_s1 + $0x10] sm:$0xf] }
  0x39   : > { %v1120_v10 = vsel %vm290_vm0, %v1053_v63, 0.0  ;;  %v560_v11 = vor.u32 %v559_v62, %v555_v56  ;;  %v468_v12 = vunpack.c.l.b16 %v398_v60  ;;  %v1132_v13 = vpack.c.bf16 %v1054_v9, %v1054_v9  ;;  %v3568_v62 = vld [vmem:[%s4750_s1 + $0x10] sm:$0x30] }
  0x3a   : > { %v1150_v14 = vpack.c.bf16 %v1120_v10, %v1120_v10  ;;  %v1181_v15 = vunpack.c.l.b16 %v1131_v5  ;;  %v3765_v19 = vpack.c.b16 %v436_v7, %v435_v4  ;;  %v315_v37 = vrot.slane %v242_v35, 7 }
  0x3b   : > { %v1182_v16 = vunpack.c.l.b16 %v1132_v13  ;;  %v565_v20 = vsel %vm481_vm1, %v560_v11, %v564_v1  ;;  %v478_v21 = vpack.c.b16 %v468_v12, %v468_v12  ;;  %v316_v38 = vrot.slane %v243_v36, 7 }
  0x3c   : > { %663 = vrot.lane.b32.xlu2 %v640_v3, %s3603_s25  ;;  %v1220_v17 = vunpack.c.l.b16 %v1150_v14  ;;  %v644_v27 = vrot.slane %v3765_v19, 1  ;;  %v359_v40 = vsel %vm290_vm0, 0.0, %v315_v37  ;;  %v3381_v1 = vor.u32 %v3568_v62, %v3380_v59  ;;  %v3392_v14 = vld [vmem:[%s3652_s23 + $0x90] sm:$0xff] }
  0x3d   : > { %665 = vrot.lane.b32.xlu1 %v643_v6, %s3603_s25  ;;  %v3768_v22 = vpack.c.b16 %v1182_v16, %v1181_v15  ;;  %v645_v29 = vrot.slane %v478_v21, 1  ;;  %v317_v39 = vsel %vm290_vm0, %v315_v37, %v316_v38  ;;  %v387_v42 = vpack.c.bf16 %v359_v40, %v359_v40  ;;  %v3393_v15 = vld [vmem:[%s3652_s23 + $0x98] sm:$0xff] }
  0x3e   : > { %v3770_v23 = vpack.c.b16 %v1220_v17, %v1220_v17  ;;  %v388_v43 = vpack.c.bf16 %v317_v39, %v317_v39  ;;  %v369_v44 = vsel %vm290_vm0, %v316_v38, 0.0  ;;  %v865_v5 = vsel %vm742_vm3, %v3381_v1, 0 }
  0x3f   : > { %v1252_v24 = vshrl.u32 %v3768_v22, 16  ;;  %v1254_v25 = vshll.u32 %v3768_v22, 16  ;;  %v646_v33 = vsel %vm622_vm2, %v644_v27, %v645_v29  ;;  %v399_v45 = vpack.c.bf16 %v369_v44, %v369_v44  ;;  %874 = vmatpush.bf16.msra.mxu2 %v865_v5 }
  0x40   : > { %v1259_v26 = vshll.u32 %v3770_v23, 16  ;;  %614 = vrot.lane.b32.xlu0 %v565_v20, %s3602_s24  ;;  %v437_v47 = vunpack.c.l.b16 %v387_v42  ;;  %v438_v48 = vunpack.c.l.b16 %v388_v43  ;;  %v569_v6 = vshll.u32 %v3765_v19, 16 }
  0x41   : > { %v1256_v30 = vrot.slane %v1254_v25, 1  ;;  %v469_v51 = vunpack.c.l.b16 %v399_v45  ;;  %v567_v7 = vshrl.u32 %v3765_v19, 16  ;;  %v574_v10 = vshll.u32 %v478_v21, 16  ;;  %v3366_v25 = vld [vmem:[%s4750_s1] sm:$0xf] }
  0x42   : > { %v1261_v31 = vrot.slane %v1259_v26, 1  ;;  %v3786_v49 = vpack.c.b16 %v438_v48, %v437_v47  ;;  %v571_v9 = vrot.slane %v569_v6, 1  ;;  %v1055_v16 = vrot.slane %v3392_v14, 7  ;;  %v3566_v26 = vld [vmem:[%s4750_s1] sm:$0x30] }
  0x43   : > { %v1257_v32 = vor.u32 %v1256_v30, %v1252_v24  ;;  %v479_v52 = vpack.c.b16 %v469_v51, %v469_v51  ;;  %v576_v12 = vrot.slane %v574_v10, 1  ;;  %v1056_v17 = vrot.slane %v3393_v15, 7 }
  0x44   : > { %v581_v53 = vshll.u32 %v3786_v49, 16  ;;  %v579_v54 = vshrl.u32 %v3786_v49, 16  ;;  %v647_v57 = vrot.slane %v3786_v49, 1  ;;  %v572_v11 = vor.u32 %v571_v9, %v567_v7 }
  0x45   : > { %v1262_v34 = vsel %vm481_vm1, %v1257_v32, %v1261_v31  ;;  %v586_v56 = vshll.u32 %v479_v52, 16  ;;  %v648_v60 = vrot.slane %v479_v52, 1  ;;  %v1057_v20 = vsel %vm290_vm0, %v1055_v16, %v1056_v17  ;;  %v3394_v31 = vld [vmem:[%s3652_s23 + $0xa0] sm:$0xff] }
  0x46   : > { %1361 = vrot.lane.b32.xlu1 %v1262_v34, %s3602_s24  ;;  %v583_v55 = vrot.slane %v581_v53, 1  ;;  %v577_v13 = vsel %vm481_vm1, %v572_v11, %v576_v12  ;;  %v1111_v24 = vsel %vm290_vm0, 0.0, %v1055_v16  ;;  %v1121_v21 = vsel %vm290_vm0, %v1056_v17, 0.0  ;;  %v3354_v53 = vld [vmem:[%s4750_s1 + $0x8] sm:$0xf] }
  0x47   : > { %v588_v0 = vrot.slane %v586_v56, 1  ;;  %v3798_v3 = vsel %vm622_vm2, %v647_v57, %v648_v60  ;;  %616 = vrot.lane.b32.xlu2 %v577_v13, %s3602_s24  ;;  %v1133_v27 = vpack.c.bf16 %v1111_v24, %v1111_v24  ;;  %v1134_v29 = vpack.c.bf16 %v1057_v20, %v1057_v20 }
  0x48   : > { %667 = vrot.lane.b32.xlu0 %v646_v33, %s3603_s25  ;;  %v584_v63 = vor.u32 %v583_v55, %v579_v54  ;;  %v1151_v30 = vpack.c.bf16 %v1121_v21, %v1121_v21  ;;  %v3367_v32 = vor.u32 %v3566_v26, %v3366_v25  ;;  %v3395_v33 = vld [vmem:[%s3652_s23 + $0xa8] sm:$0xff]  ;;  %v1382_v1 = vrot.slane %v3768_v22, 1 }
  0x49   : > { %v1183_v35 = vunpack.c.l.b16 %v1133_v27  ;;  %v1184_v36 = vunpack.c.l.b16 %v1134_v29  ;;  %v1059_v38 = vrot.slane %v3395_v33, 7  ;;  %v3567_v54 = vld [vmem:[%s4750_s1 + $0x8] sm:$0x30] }
  0x4a   : > { %v589_v4 = vsel %vm481_vm1, %v584_v63, %v588_v0  ;;  %v1221_v37 = vunpack.c.l.b16 %v1151_v30  ;;  %v803_v39 = vsel %vm742_vm3, %v3367_v32, 0  ;;  %v3355_v57 = vor.u32 %v3567_v54, %v3354_v53 }
  0x4b   : > { %812 = vmatpush.bf16.msra.mxu1 %v803_v39  ;;  %v3826_v42 = vpack.c.b16 %v1184_v36, %v1183_v35  ;;  %v1122_v47 = vsel %vm290_vm0, %v1059_v38, 0.0  ;;  %v3397_v35 = vld [vmem:[%s3652_s23 + $0xb8] sm:$0xff] }
  0x4c   : > { %v1231_v43 = vpack.c.b16 %v1221_v37, %v1221_v37  ;;  %v1152_v55 = vpack.c.bf16 %v1122_v47, %v1122_v47  ;;  %v744_v63 = vsel %vm742_vm3, %v3355_v57, 0  ;;  %v1062_v37 = vrot.slane %v3397_v35, 7 }
  0x4d   : > { %v1385_v51 = vrot.slane %v3826_v42, 1  ;;  %753 = vmatpush.bf16.msra.mxu0 %v744_v63  ;;  %v1266_v14 = vshll.u32 %v3826_v42, 16 }
  0x4e   : > { %669 = vrot.lane.b32.xlu1 %v3798_v3, %s3603_s25  ;;  %v1386_v52 = vrot.slane %v1231_v43, 1  ;;  %v1222_v62 = vunpack.c.l.b16 %v1152_v55  ;;  %v1271_v17 = vshll.u32 %v1231_v43, 16  ;;  %v1123_v47 = vsel %vm290_vm0, %v1062_v37, 0.0 }
  0x4f   : > { %v1268_v16 = vrot.slane %v1266_v14, 1 }
  0x50   : > { %618 = vrot.lane.b32.xlu0 %v589_v4, %s3602_s24  ;;  %v1387_v60 = vsel %vm622_vm2, %v1385_v51, %v1386_v52  ;;  %v3844_v5 = vpack.c.b16 %v1222_v62, %v1222_v62  ;;  %v1273_v21 = vrot.slane %v1271_v17, 1  ;;  %v3569_v17 = vld [vmem:[%s4750_s1] sm:$0x30] }
  0x52   : > { %v1283_v10 = vshll.u32 %v3844_v5, 16 }
  0x54   : > { %v1285_v13 = vrot.slane %v1283_v10, 1  ;;  %v3399_v10 = vld [vmem:[%s3652_s23 + $0xc8] sm:$0xff] }
  0x56   : > { %620 = vrot.lane.b32.xlu1 %v1262_v34, %s3602_s24  ;;  %v1058_v34 = vrot.slane %v3394_v31, 7 }
  0x58   : > { %v1112_v40 = vsel %vm290_vm0, 0.0, %v1058_v34  ;;  %v1060_v44 = vsel %vm290_vm0, %v1058_v34, %v1059_v38  ;;  %1413 = vrot.lane.b32.xlu0 %v1387_v60, %s3603_s25  ;;  %v3396_v34 = vld [vmem:[%s3652_s23 + $0xb0] sm:$0xff] }
  0x59   : > { %v1135_v45 = vpack.c.bf16 %v1112_v40, %v1112_v40  ;;  %v1136_v48 = vpack.c.bf16 %v1060_v44, %v1060_v44  ;;  %v1061_v36 = vrot.slane %v3396_v34, 7 }
  0x5b   : > { %v1185_v56 = vunpack.c.l.b16 %v1135_v45  ;;  %v1186_v59 = vunpack.c.l.b16 %v1136_v48  ;;  %v1063_v40 = vsel %vm290_vm0, %v1061_v36, %v1062_v37  ;;  %v1113_v43 = vsel %vm290_vm0, 0.0, %v1061_v36 }
  0x5c   : > { %v1137_v44 = vpack.c.bf16 %v1113_v43, %v1113_v43  ;;  %v1138_v45 = vpack.c.bf16 %v1063_v40, %v1063_v40  ;;  %v1153_v48 = vpack.c.bf16 %v1123_v47, %v1123_v47 }
  0x5d   : > { %v3840_v0 = vpack.c.b16 %v1186_v59, %v1185_v56 }
  0x5e   : > { %1359 = vrot.lane.b32.xlu1 %v589_v4, %s3602_s24  ;;  %v1383_v4 = vrot.slane %v3770_v23, 1  ;;  %v1264_v23 = vshrl.u32 %v3826_v42, 16  ;;  %v1187_v51 = vunpack.c.l.b16 %v1137_v44  ;;  %v1188_v52 = vunpack.c.l.b16 %v1138_v45 }
  0x5f   : > { %v1278_v6 = vshll.u32 %v3840_v0, 16  ;;  %v1276_v9 = vshrl.u32 %v3840_v0, 16 }
  0x60   : > { %v1384_v7 = vsel %vm622_vm2, %v1382_v1, %v1383_v4  ;;  %v1269_v24 = vor.u32 %v1268_v16, %v1264_v23  ;;  %v3880_v53 = vpack.c.b16 %v1188_v52, %v1187_v51  ;;  %v1389_v23 = vrot.slane %v3844_v5, 1  ;;  %v3426_v16 = vld [vmem:[%s4750_s1] sm:$0xf] }
  0x61   : > { %1411 = vrot.lane.b32.xlu2 %v1384_v7, %s3603_s25  ;;  %v1280_v11 = vrot.slane %v1278_v6, 1 }
  0x62   : > { %v1274_v26 = vsel %vm481_vm1, %v1269_v24, %v1273_v21  ;;  %v1290_v57 = vshll.u32 %v3880_v53, 16  ;;  %v1288_v62 = vshrl.u32 %v3880_v53, 16  ;;  %v3427_v21 = vor.u32 %v3569_v17, %v3426_v16 }
  0x63   : > { %v1281_v15 = vor.u32 %v1280_v11, %v1276_v9  ;;  %v3398_v9 = vld [vmem:[%s3652_s23 + $0xc0] sm:$0xff]  ;;  %v1065_v11 = vrot.slane %v3399_v10, 7 }
  0x64   : > { %v1292_v63 = vrot.slane %v1290_v57, 1  ;;  %v1554_v34 = vsel %vm742_vm3, %v3427_v21, 0  ;;  %v3400_v57 = vld [vmem:[%s3652_s23 + $0xd0] sm:$0xff] }
  0x65   : > { %v1286_v20 = vsel %vm481_vm1, %v1281_v15, %v1285_v13  ;;  %v1388_v15 = vrot.slane %v3840_v0, 1  ;;  %v1124_v5 = vsel %vm290_vm0, %v1065_v11, 0.0  ;;  %1563 = vmatpush.bf16.msrb.mxu0 %v1554_v34 }
  0x66   : > { %1365 = vrot.lane.b32.xlu0 %v1286_v20, %s3602_s24  ;;  %v1293_v4 = vor.u32 %v1292_v63, %v1288_v62  ;;  %v1067_v63 = vrot.slane %v3400_v57, 7 }
  0x69   : > { %1363 = vrot.lane.b32.xlu2 %v1274_v26, %s3602_s24  ;;  %v3571_v26 = vld [vmem:[%s4750_s1 + $0x10] sm:$0x30] }
  0x6e   : > { %1409 = vrot.lane.b32.xlu0 %v3798_v3, %s3603_s25 }
  0x71   : > { %671 = vrot.lane.b32.xlu2 %v1384_v7, %s3603_s25 }
  0x7e   : > { %v607_v12 = vpop.permute.xlu2 %606 }
  0x7f   : > { %v679_v25 = vsel %vm673_vm4, %v3682_v58, %v607_v12 }
  0x86   : > { %v658_v27 = vpop.permute.xlu2 %657 }
  0x87   : > { %v3860_v29 = vsel %vm694_vm5, %v679_v25, %v658_v27  ;;  %v3440_v25 = vld [vmem:[%s4750_s1 + $0x10] sm:$0xf]  ;;  %v1390_v27 = vsel %vm622_vm2, %v1388_v15, %v1389_v23 }
  0x88   : > { %3382 = vmatmul.msk.bf16.vlgmr.msra.gmra.mxu2 %vm725_vm6, %v3860_v29  ;;  %1415 = vrot.lane.b32.xlu2 %v1390_v27, %s3603_s25 }
  0x8e   : > { %v603_v30 = vpop.permute.xlu1 %602  ;;  %v611_v14 = vpop.permute.xlu2 %610 }
  0x8f   : > { %v675_v58 = vsel %vm673_vm4, %v3659_v18, %v603_v30  ;;  %v3441_v30 = vor.u32 %v3571_v26, %v3440_v25 }
  0x91   : > { %v1615_v36 = vsel %vm742_vm3, %v3441_v30, 0 }
  0x92   : > { %v605_v31 = vpop.permute.xlu0 %604  ;;  %1624 = vmatpush.bf16.msrb.mxu1 %v1615_v36 }
  0x93   : > { %v677_v38 = vsel %vm673_vm4, %v3671_v46, %v605_v31  ;;  %v1223_v46 = vunpack.c.l.b16 %v1153_v48 }
  0x95   : > { %v3882_v56 = vpack.c.b16 %v1223_v46, %v1223_v46 }
  0x96   : > { %v654_v32 = vpop.permute.xlu1 %653 }
  0x97   : > { %v696_v33 = vsel %vm694_vm5, %v675_v58, %v654_v32  ;;  %v1295_v1 = vshll.u32 %v3882_v56, 16  ;;  %v1154_v58 = vpack.c.bf16 %v1124_v5, %v1124_v5  ;;  %v683_v32 = vsel %vm673_vm4, %v3723_v61, %v611_v14 }
  0x98   : > { %3368 = vmatmul.msk.bf16.vlgmr.msra.gmra.mxu1 %vm725_vm6, %v696_v33 }
  0x99   : > { %v1297_v6 = vrot.slane %v1295_v1, 1  ;;  %v1224_v37 = vunpack.c.l.b16 %v1154_v58 }
  0x9a   : > { %v656_v3 = vpop.permute.xlu0 %655 }
  0x9b   : > { %v698_v39 = vsel %vm694_vm5, %v677_v38, %v656_v3  ;;  %v1298_v7 = vsel %vm481_vm1, %v1293_v4, %v1297_v6  ;;  %v664_v6 = vpop.permute.xlu2 %663 }
  0x9c   : > { %3356 = vmatmul.msk.bf16.vlgmr.msra.gmra.mxu0 %vm725_vm6, %v698_v39  ;;  %1367 = vrot.lane.b32.xlu1 %v1298_v7, %s3602_s24 }
  0x9e   : > { %v660_v54 = vpop.permute.xlu1 %659 }
  0xa2   : > { %v609_v55 = vpop.permute.xlu0 %608 }
  0xa3   : > { %v681_v59 = vsel %vm673_vm4, %v3706_v28, %v609_v55  ;;  %v1064_v28 = vrot.slane %v3398_v9, 7  ;;  %v1392_v55 = vrot.slane %v3882_v56, 1  ;;  %v1115_v9 = vsel %vm290_vm0, 0.0, %v1067_v63 }
  0xa4   : > { %v3888_v60 = vsel %vm694_vm5, %v681_v59, %v660_v54  ;;  %v1391_v54 = vrot.slane %v3880_v53, 1  ;;  %v3401_v59 = vld [vmem:[%s3652_s23 + $0xd8] sm:$0xff]  ;;  %v1141_v10 = vpack.c.bf16 %v1115_v9, %v1115_v9 }
  0xa5   : > { %3383 = vmatmul.msk.bf16.gmra.mxu2 %vm725_vm6, %v3888_v60  ;;  %v1066_v12 = vsel %vm290_vm0, %v1064_v28, %v1065_v11  ;;  %v1114_v13 = vsel %vm290_vm0, 0.0, %v1064_v28  ;;  %v1068_v1 = vrot.slane %v3401_v59, 7 }
  0xa6   : > { %v1139_v20 = vpack.c.bf16 %v1114_v13, %v1114_v13  ;;  %v1140_v24 = vpack.c.bf16 %v1066_v12, %v1066_v12  ;;  %v1393_v62 = vsel %vm622_vm2, %v1391_v54, %v1392_v55  ;;  %v1191_v13 = vunpack.c.l.b16 %v1141_v10 }
  0xa7   : > { %1417 = vrot.lane.b32.xlu2 %v1393_v62, %s3603_s25  ;;  %v1069_v7 = vsel %vm290_vm0, %v1067_v63, %v1068_v1  ;;  %v1125_v56 = vsel %vm290_vm0, %v1068_v1, 0.0 }
  0xa8   : > { %3369 = vmatmul.msk.bf16.gmra.mxu1 %vm725_vm6, %v698_v39  ;;  %v1189_v31 = vunpack.c.l.b16 %v1139_v20  ;;  %v1190_v35 = vunpack.c.l.b16 %v1140_v24  ;;  %v1234_v39 = vpack.c.b16 %v1224_v37, %v1224_v37  ;;  %v1142_v28 = vpack.c.bf16 %v1069_v7, %v1069_v7  ;;  %v3402_v20 = vld [vmem:[%s3652_s23 + $0xe0] sm:$0xff]  ;;  %v3403_v24 = vld [vmem:[%s3652_s23 + $0xe8] sm:$0xff] }
  0xa9   : > { %v1155_v11 = vpack.c.bf16 %v1125_v56, %v1125_v56  ;;  %v1070_v25 = vrot.slane %v3402_v20, 7  ;;  %v1071_v26 = vrot.slane %v3403_v24, 7 }
  0xaa   : > { %v662_v33 = vpop.permute.xlu0 %661  ;;  %v3924_v38 = vpack.c.b16 %v1190_v35, %v1189_v31  ;;  %v1307_v43 = vshll.u32 %v1234_v39, 16  ;;  %v1395_v47 = vrot.slane %v1234_v39, 1  ;;  %v1192_v14 = vunpack.c.l.b16 %v1142_v28 }
  0xab   : > { %v3927_v3 = vsel %vm694_vm5, %v683_v32, %v662_v33  ;;  %v1072_v5 = vsel %vm290_vm0, %v1070_v25, %v1071_v26  ;;  %v1126_v31 = vsel %vm290_vm0, %v1071_v26, 0.0 }
  0xac   : > { %3357 = vmatmul.msk.bf16.gmra.mxu0 %vm725_vm6, %v3860_v29  ;;  %v1302_v40 = vshll.u32 %v3924_v38, 16  ;;  %v1300_v61 = vshrl.u32 %v3924_v38, 16  ;;  %v1394_v45 = vrot.slane %v3924_v38, 1  ;;  %v1309_v48 = vrot.slane %v1307_v43, 1 }
  0xad   : > { %v3960_v15 = vpack.c.b16 %v1192_v14, %v1191_v13  ;;  %v1144_v58 = vpack.c.bf16 %v1072_v5, %v1072_v5  ;;  %v1156_v32 = vpack.c.bf16 %v1126_v31, %v1126_v31 }
  0xae   : > { %v1304_v44 = vrot.slane %v1302_v40, 1  ;;  %v1396_v52 = vsel %vm622_vm2, %v1394_v45, %v1395_v47 }
  0xaf   : > { %1419 = vrot.lane.b32.xlu1 %v1396_v52, %s3603_s25  ;;  %v1397_v16 = vrot.slane %v3960_v15, 1  ;;  %v1194_v34 = vunpack.c.l.b16 %v1144_v58  ;;  %v1226_v39 = vunpack.c.l.b16 %v1156_v32  ;;  %v3404_v52 = vld [vmem:[%s3652_s23 + $0xf0] sm:$0xff]  ;;  %v1314_v55 = vshll.u32 %v3960_v15, 16 }
  0xb0   : > { %v1305_v51 = vor.u32 %v1304_v44, %v1300_v61  ;;  %v1312_v62 = vshrl.u32 %v3960_v15, 16 }
  0xb1   : > { %v1236_v61 = vpack.c.b16 %v1226_v39, %v1226_v39  ;;  %v1316_v63 = vrot.slane %v1314_v55, 1 }
  0xb2   : > { %v1310_v46 = vsel %vm481_vm1, %v1305_v51, %v1309_v48  ;;  %v615_v27 = vpop.permute.xlu0 %614 }
  0xb3   : > { %1369 = vrot.lane.b32.xlu0 %v1310_v46, %s3602_s24  ;;  %v687_v35 = vsel %vm673_vm4, %v3744_v41, %v615_v27  ;;  %v1331_v47 = vshll.u32 %v1236_v61, 16  ;;  %v3405_v46 = vld [vmem:[%s3652_s23 + $0xf8] sm:$0xff]  ;;  %v1317_v9 = vor.u32 %v1316_v63, %v1312_v62 }
  0xb4   : > { %v1074_v54 = vrot.slane %v3405_v46, 7 }
  0xb5   : > { %3384 = vmatmul.msk.bf16.gmra.mxu2 %vm725_vm6, %v3927_v3  ;;  %v1333_v48 = vrot.slane %v1331_v47, 1 }
  0xb8   : > { %3370 = vmatmul.msk.bf16.gmra.mxu1 %vm725_vm6, %v3860_v29  ;;  %v613_v29 = vpop.permute.xlu1 %612 }
  0xb9   : > { %v685_v4 = vsel %vm673_vm4, %v3730_v8, %v613_v29  ;;  %v1225_v8 = vunpack.c.l.b16 %v1155_v11  ;;  %v1073_v29 = vrot.slane %v3404_v52, 7 }
  0xba   : > { %v3954_v12 = vsel %vm694_vm5, %v685_v4, %v664_v6  ;;  %v1127_v6 = vsel %vm290_vm0, %v1074_v54, 0.0  ;;  %v668_v13 = vpop.permute.xlu0 %667 }
  0xbb   : > { %v1235_v23 = vpack.c.b16 %v1225_v8, %v1225_v8  ;;  %v1075_v57 = vsel %vm290_vm0, %v1073_v29, %v1074_v54  ;;  %v1117_v59 = vsel %vm290_vm0, 0.0, %v1073_v29  ;;  %v1157_v10 = vpack.c.bf16 %v1127_v6, %v1127_v6 }
  0xbc   : > { %3358 = vmatmul.msk.bf16.gmra.mxu0 %vm725_vm6, %v3888_v60  ;;  %v1145_v4 = vpack.c.bf16 %v1117_v59, %v1117_v59  ;;  %v1146_v7 = vpack.c.bf16 %v1075_v57, %v1075_v57 }
  0xbd   : > { %v1398_v17 = vrot.slane %v1235_v23, 1  ;;  %v1319_v1 = vshll.u32 %v1235_v23, 16 }
  0xbe   : > { %v1195_v28 = vunpack.c.l.b16 %v1145_v4  ;;  %v1196_v14 = vunpack.c.l.b16 %v1146_v7 }
  0xbf   : > { %v1399_v21 = vsel %vm622_vm2, %v1397_v16, %v1398_v17  ;;  %v1321_v56 = vrot.slane %v1319_v1, 1  ;;  %v1227_v16 = vunpack.c.l.b16 %v1157_v10 }
  0xc0   : > { %1421 = vrot.lane.b32.xlu0 %v1399_v21, %s3603_s25  ;;  %v666_v36 = vpop.permute.xlu1 %665  ;;  %v4000_v17 = vpack.c.b16 %v1196_v14, %v1195_v28 }
  0xc1   : > { %v3977_v40 = vsel %vm694_vm5, %v687_v35, %v666_v36  ;;  %v1322_v8 = vsel %vm481_vm1, %v1317_v9, %v1321_v56  ;;  %v1237_v20 = vpack.c.b16 %v1227_v16, %v1227_v16  ;;  %v4066_v56 = vld [vmem:[%s4752_s3] ss:$0 sm:$0xff] }
  0xc2   : > { %1371 = vrot.lane.b32.xlu2 %v1322_v8, %s3602_s24  ;;  %v1338_v24 = vshll.u32 %v4000_v17, 16  ;;  %v1336_v21 = vshrl.u32 %v4000_v17, 16  ;;  %v1403_v5 = vrot.slane %v4000_v17, 1 }
  0xc4   : > { %v1340_v26 = vrot.slane %v1338_v24, 1 }
  0xc5   : > { %3385 = vmatmul.msk.bf16.gmra.mxu2 %vm725_vm6, %v3954_v12 }
  0xc8   : > { %3371 = vmatmul.msk.bf16.gmra.mxu1 %vm725_vm6, %v3888_v60  ;;  %v1116_v60 = vsel %vm290_vm0, 0.0, %v1070_v25  ;;  %v1343_v25 = vshll.u32 %v1237_v20, 16 }
  0xc9   : > { %v1143_v30 = vpack.c.bf16 %v1116_v60, %v1116_v60  ;;  %v1404_v60 = vrot.slane %v1237_v20, 1 }
  0xca   : > { %v1345_v27 = vrot.slane %v1343_v25, 1 }
  0xcb   : > { %v1193_v33 = vunpack.c.l.b16 %v1143_v30  ;;  %v1341_v30 = vor.u32 %v1340_v26, %v1336_v21  ;;  %v1405_v58 = vsel %vm622_vm2, %v1403_v5, %v1404_v60 }
  0xcc   : > { %3359 = vmatmul.msk.bf16.gmra.mxu0 %vm725_vm6, %v3927_v3 }
  0xcd   : > { %v3974_v37 = vpack.c.b16 %v1194_v34, %v1193_v33  ;;  %v1346_v31 = vsel %vm481_vm1, %v1341_v30, %v1345_v27  ;;  %v1401_v34 = vrot.slane %v1236_v61, 1 }
  0xce   : > { %1375 = vrot.lane.b32.xlu0 %v1346_v31, %s3602_s24 }
  0xcf   : > { %v1326_v43 = vshll.u32 %v3974_v37, 16  ;;  %v1324_v44 = vshrl.u32 %v3974_v37, 16  ;;  %v1400_v33 = vrot.slane %v3974_v37, 1 }
  0xd1   : > { %v1328_v45 = vrot.slane %v1326_v43, 1  ;;  %v1402_v35 = vsel %vm622_vm2, %v1400_v33, %v1401_v34  ;;  %v3414_v43 = vld [vmem:[%s4750_s1 + $0x8] sm:$0xf] }
  0xd2   : > { %1423 = vrot.lane.b32.xlu2 %v1402_v35, %s3603_s25 }
  0xd3   : > { %v1329_v41 = vor.u32 %v1328_v45, %v1324_v44  ;;  %v3570_v44 = vld [vmem:[%s4750_s1 + $0x8] sm:$0x30] }
  0xd4   : > { %v3415_v61 = vor.u32 %v3570_v44, %v3414_v43 }
  0xd5   : > { %3386 = vmatmul.msk.bf16.gmra.mxu2 %vm725_vm6, %v3977_v40  ;;  %v1334_v51 = vsel %vm481_vm1, %v1329_v41, %v1333_v48 }
  0xd6   : > { %1373 = vrot.lane.b32.xlu1 %v1334_v51, %s3602_s24  ;;  %v1495_v41 = vsel %vm742_vm3, %v3415_v61, 0 }
  0xd7   : > { %1504 = vmatpush.bf16.msra.mxu3 %v1495_v41 }
  0xd8   : > { %3372 = vmatmul.msk.bf16.gmra.mxu1 %vm725_vm6, %v3927_v3  ;;  %v617_v3 = vpop.permute.xlu2 %616 }
  0xd9   : > { %v689_v11 = vsel %vm673_vm4, %v3765_v19, %v617_v3  ;;  %v1362_v19 = vpop.permute.xlu1 %1361 }
  0xda   : > { %v710_v23 = vsel %vm694_vm5, %v689_v11, %v668_v13  ;;  %v1432_v45 = vsel %vm673_vm4, %v3768_v22, %v1362_v19 }
  0xdc   : > { %3360 = vmatmul.msk.bf16.gmra.mxu0 %vm725_vm6, %v3954_v12 }
  0xde   : > { %1425 = vrot.lane.b32.xlu1 %v1405_v58, %s3603_s25 }
  0xe0   : > { %v1412_v32 = vpop.permute.xlu2 %1411 }
  0xe1   : > { %v670_v39 = vpop.permute.xlu1 %669  ;;  %v1452_v48 = vsel %vm694_vm5, %v1432_v45, %v1412_v32 }
  0xe2   : > { %3416 = vmatmul.msk.bf16.vlgmr.msra.gmra.mxu3 %vm725_vm6, %v1452_v48 }
  0xe5   : > { %3387 = vmatmul.msk.bf16.gmra.mxu2 %vm725_vm6, %v710_v23 }
  0xe6   : > { %2091 = vrot.lane.b32.xlu1 %v3675_v50, %s3602_s24 }
  0xe8   : > { %3373 = vmatmul.msk.bf16.gmra.mxu1 %vm725_vm6, %v3954_v12  ;;  %v619_v12 = vpop.permute.xlu0 %618  ;;  %v1364_v51 = vpop.permute.xlu2 %1363 }
  0xe9   : > { %v691_v36 = vsel %vm673_vm4, %v3786_v49, %v619_v12  ;;  %v621_v52 = vpop.permute.xlu1 %620  ;;  %v1434_v54 = vsel %vm673_vm4, %v3826_v42, %v1364_v51 }
  0xea   : > { %v712_v47 = vsel %vm694_vm5, %v691_v36, %v670_v39  ;;  %v693_v46 = vsel %vm673_vm4, %v3768_v22, %v621_v52 }
  0xec   : > { %3361 = vmatmul.msk.bf16.gmra.mxu0 %vm725_vm6, %v3977_v40 }
  0xf0   : > { %v672_v29 = vpop.permute.xlu2 %671  ;;  %v1414_v57 = vpop.permute.xlu0 %1413 }
  0xf1   : > { %v714_v55 = vsel %vm694_vm5, %v693_v46, %v672_v29  ;;  %v1360_v62 = vpop.permute.xlu1 %1359 }
  0xf2   : > { %v1430_v4 = vsel %vm673_vm4, %v3786_v49, %v1360_v62 }
  0xf5   : > { %3388 = vmatmul.msk.bf16.gmra.mxu2 %vm725_vm6, %v712_v47 }
  0xf8   : > { %3374 = vmatmul.msk.bf16.gmra.mxu1 %vm725_vm6, %v3977_v40  ;;  %v4045_v40 = vsel %vm694_vm5, %v1434_v54, %v1414_v57  ;;  %v1366_v22 = vpop.permute.xlu0 %1365  ;;  %v1416_v3 = vpop.permute.xlu2 %1415 }
  0xf9   : > { %3417 = vmatmul.msk.bf16.gmra.mxu3 %vm725_vm6, %v4045_v40  ;;  %v1436_v59 = vsel %vm673_vm4, %v3840_v0, %v1366_v22 }
  0xfa   : > { %v4056_v63 = vsel %vm694_vm5, %v1436_v59, %v1416_v3 }
  0xfc   : > { %3362 = vmatmul.msk.bf16.gmra.mxu0 %vm725_vm6, %v710_v23 }
 0x100   : > { %v1410_v6 = vpop.permute.xlu0 %1409 }
 0x101   : > { %v1450_v0 = vsel %vm694_vm5, %v1430_v4, %v1410_v6  ;;  %v1418_v24 = vpop.permute.xlu2 %1417 }
 0x105   : > { %3389 = vmatmul.msk.bf16.gmra.mxu2 %vm725_vm6, %v714_v55 }
 0x108   : > { %3375 = vmatmul.msk.bf16.gmra.mxu1 %vm725_vm6, %v710_v23 }
 0x109   : > { %3418 = vmatmul.msk.bf16.gmra.mxu3 %vm725_vm6, %v4056_v63 }
 0x10b   : > { %v876_v1 = vpop.f32.mrf.mxu2 }
 0x10c   : > { %3363 = vmatmul.msk.bf16.gmra.mxu0 %vm725_vm6, %v712_v47 }
 0x10e   : > { %v1368_v49 = vpop.permute.xlu1 %1367 }
 0x10f   : > { %v1438_v20 = vsel %vm673_vm4, %v3880_v53, %v1368_v49 }
 0x110   : > { %v4076_v25 = vsel %vm694_vm5, %v1438_v20, %v1418_v24 }
 0x113   : > { %v878_v13 = vpop.f32.mrf.mxu2 }
 0x115   : > { %v814_v42 = vpop.f32.mrf.mxu1 }
 0x118   : > { %3442 = vmatmul.msk.bf16.vlgmr.msrb.gmra.mxu1 %vm725_vm6, %v4045_v40 }
 0x119   : > { %v755_v7 = vpop.f32.mrf.mxu0  ;;  %3419 = vmatmul.msk.bf16.gmra.mxu3 %vm725_vm6, %v4076_v25 }
 0x11a   : > { %v815_v9 = vadd.f32 %v814_v42, %v755_v7 }
 0x11c   : > { %v916_v28 = vadd.f32 %v876_v1, %v815_v9  ;;  %3428 = vmatmul.msk.bf16.vlgmr.msrb.gmra.mxu0 %vm725_vm6, %v1450_v0  ;;  %v1372_v24 = vpop.permute.xlu2 %1371 }
 0x11d   : > { %v816_v10 = vpop.f32.mrf.mxu1 }
 0x11e   : > { %v936_v11 = vadd.f32 %v4066_v56, %v916_v28 }
 0x120   : > { %v952_v14 = vmax.f32 %v936_v11, 0.0 }
 0x121   : > { %v757_v8 = vpop.f32.mrf.mxu0  ;;  %v1420_v47 = vpop.permute.xlu1 %1419 }
 0x122   : > { %969 = vst.msk [vmem:[#allocation2] sm:$0xff] %vm673_vm4, %v952_v14  ;;  %v817_v16 = vadd.f32 %v816_v10, %v757_v8 }
 0x124   : > { %v917_v21 = vadd.f32 %v878_v13, %v817_v16 }
 0x125   : > { %v819_v23 = vpop.f32.mrf.mxu1  ;;  %v1370_v12 = vpop.permute.xlu0 %1369 }
 0x126   : > { %v937_v19 = vadd.f32 %v4066_v56, %v917_v21  ;;  %v1440_v61 = vsel %vm673_vm4, %v3924_v38, %v1370_v12 }
 0x127   : > { %v4093_v54 = vsel %vm694_vm5, %v1440_v61, %v1420_v47 }
 0x128   : > { %3443 = vmatmul.msk.bf16.gmra.mxu1 %vm725_vm6, %v4056_v63  ;;  %v953_v26 = vmax.f32 %v937_v19, 0.0  ;;  %v881_v5 = vpop.f32.mrf.mxu2 }
 0x129   : > { %v760_v60 = vpop.f32.mrf.mxu0  ;;  %v1735_v27 = vld [vmem:[#allocation2] sm:$0xff]  ;;  %3420 = vmatmul.msk.bf16.gmra.mxu3 %vm725_vm6, %v4093_v54 }
 0x12a   : > { %970 = vst.msk [vmem:[#allocation2 + $0x8] sm:$0xff] %vm673_vm4, %v953_v26  ;;  %v820_v53 = vadd.f32 %v819_v23, %v760_v60  ;;  %v1784_v31 = vrot.slane %v1735_v27, 7 }
 0x12c   : > { %v918_v58 = vadd.f32 %v881_v5, %v820_v53  ;;  %3429 = vmatmul.msk.bf16.gmra.mxu0 %vm725_vm6, %v1452_v48  ;;  %v1842_v35 = vsel %vm290_vm0, 0.0, %v1784_v31 }
 0x12d   : > { %v821_v30 = vpop.f32.mrf.mxu1  ;;  %v1863_v41 = vpack.c.bf16 %v1842_v35, %v1842_v35 }
 0x12e   : > { %v938_v32 = vadd.f32 %v4066_v56, %v918_v58  ;;  %v1442_v58 = vsel %vm673_vm4, %v3960_v15, %v1372_v24 }
 0x12f   : > { %v1913_v38 = vunpack.c.l.b16 %v1863_v41 }
 0x130   : > { %v954_v33 = vmax.f32 %v938_v32, 0.0  ;;  %v883_v34 = vpop.f32.mrf.mxu2 }
 0x131   : > { %v762_v36 = vpop.f32.mrf.mxu0  ;;  %v1736_v39 = vld [vmem:[#allocation2 + $0x8] sm:$0xff] }
 0x132   : > { %971 = vst.msk [vmem:[#allocation2 + $0x10] sm:$0xff] %vm673_vm4, %v954_v33  ;;  %v822_v43 = vadd.f32 %v821_v30, %v762_v36  ;;  %v1785_v45 = vrot.slane %v1736_v39, 7 }
 0x134   : > { %v919_v48 = vadd.f32 %v883_v34, %v822_v43  ;;  %v1786_v51 = vsel %vm290_vm0, %v1784_v31, %v1785_v45  ;;  %v1852_v52 = vsel %vm290_vm0, %v1785_v45, 0.0  ;;  %v1422_v31 = vpop.permute.xlu0 %1421 }
 0x135   : > { %v824_v44 = vpop.f32.mrf.mxu1  ;;  %v1864_v46 = vpack.c.bf16 %v1786_v51, %v1786_v51  ;;  %v1882_v29 = vpack.c.bf16 %v1852_v52, %v1852_v52  ;;  %v4120_v39 = vsel %vm694_vm5, %v1442_v58, %v1422_v31 }
 0x136   : > { %v939_v55 = vadd.f32 %v4066_v56, %v919_v48 }
 0x137   : > { %v1914_v57 = vunpack.c.l.b16 %v1864_v46  ;;  %v1952_v22 = vunpack.c.l.b16 %v1882_v29 }
 0x138   : > { %3444 = vmatmul.msk.bf16.gmra.mxu1 %vm725_vm6, %v4076_v25  ;;  %v955_v59 = vmax.f32 %v939_v55, 0.0  ;;  %v886_v42 = vpop.f32.mrf.mxu2 }
 0x139   : > { %v765_v3 = vpop.f32.mrf.mxu0  ;;  %v4098_v62 = vpack.c.b16 %v1914_v57, %v1913_v38  ;;  %v1962_v1 = vpack.c.b16 %v1952_v22, %v1952_v22  ;;  %v1737_v4 = vld [vmem:[#allocation2 + $0x10] sm:$0xff]  ;;  %3421 = vmatmul.msk.bf16.gmra.mxu3 %vm725_vm6, %v4120_v39 }
 0x13a   : > { %972 = vst.msk [vmem:[#allocation2 + $0x18] sm:$0xff] %vm673_vm4, %v955_v59  ;;  %v825_v6 = vadd.f32 %v824_v44, %v765_v3  ;;  %v1787_v49 = vrot.slane %v1737_v4, 7 }
 0x13b   : > { %v2114_v0 = vrot.slane %v4098_v62, 1  ;;  %v2115_v9 = vrot.slane %v1962_v1, 1  ;;  %v1986_v10 = vshll.u32 %v4098_v62, 16  ;;  %v1991_v11 = vshll.u32 %v1962_v1, 16 }
 0x13c   : > { %v920_v28 = vadd.f32 %v886_v42, %v825_v6  ;;  %3430 = vmatmul.msk.bf16.gmra.mxu0 %vm725_vm6, %v4045_v40  ;;  %v1984_v14 = vshrl.u32 %v4098_v62, 16  ;;  %v1843_v26 = vsel %vm290_vm0, 0.0, %v1787_v49 }
 0x13d   : > { %v826_v7 = vpop.f32.mrf.mxu1  ;;  %v2116_v13 = vsel %vm622_vm2, %v2114_v0, %v2115_v9  ;;  %v1988_v8 = vrot.slane %v1986_v10, 1  ;;  %v1993_v20 = vrot.slane %v1991_v11, 1  ;;  %v1865_v32 = vpack.c.bf16 %v1843_v26, %v1843_v26 }
 0x13e   : > { %v940_v16 = vadd.f32 %v4066_v56, %v920_v28  ;;  %2143 = vrot.lane.b32.xlu0 %v2116_v13, %s3603_s25 }
 0x13f   : > { %v1989_v23 = vor.u32 %v1988_v8, %v1984_v14  ;;  %v1915_v15 = vunpack.c.l.b16 %v1865_v32 }
 0x140   : > { %v956_v21 = vmax.f32 %v940_v16, 0.0  ;;  %v888_v19 = vpop.f32.mrf.mxu2 }
 0x141   : > { %v767_v5 = vpop.f32.mrf.mxu0  ;;  %v1994_v40 = vsel %vm481_vm1, %v1989_v23, %v1993_v20  ;;  %v1738_v60 = vld [vmem:[#allocation2 + $0x18] sm:$0xff]  ;;  %v1424_v20 = vpop.permute.xlu2 %1423 }
 0x142   : > { %973 = vst.msk [vmem:[#allocation2 + $0x20] sm:$0xff] %vm673_vm4, %v956_v21  ;;  %v827_v27 = vadd.f32 %v826_v7, %v767_v5  ;;  %2093 = vrot.lane.b32.xlu2 %v1994_v40, %s3602_s24  ;;  %v1788_v30 = vrot.slane %v1738_v60, 7 }
 0x144   : > { %v921_v12 = vadd.f32 %v888_v19, %v827_v27  ;;  %v1789_v33 = vsel %vm290_vm0, %v1787_v49, %v1788_v30  ;;  %v1853_v34 = vsel %vm290_vm0, %v1788_v30, 0.0 }
 0x145   : > { %v829_v53 = vpop.f32.mrf.mxu1  ;;  %v1866_v35 = vpack.c.bf16 %v1789_v33, %v1789_v33  ;;  %v1883_v36 = vpack.c.bf16 %v1853_v34, %v1853_v34 }
 0x146   : > { %v941_v43 = vadd.f32 %v4066_v56, %v921_v12 }
 0x147   : > { %v1916_v44 = vunpack.c.l.b16 %v1866_v35  ;;  %v1953_v45 = vunpack.c.l.b16 %v1883_v36 }
 0x148   : > { %3445 = vmatmul.msk.bf16.gmra.mxu1 %vm725_vm6, %v4093_v54  ;;  %v957_v61 = vmax.f32 %v941_v43, 0.0  ;;  %v891_v47 = vpop.f32.mrf.mxu2  ;;  %v1374_v9 = vpop.permute.xlu1 %1373 }
 0x149   : > { %v770_v41 = vpop.f32.mrf.mxu0  ;;  %v4125_v48 = vpack.c.b16 %v1916_v44, %v1915_v15  ;;  %v1963_v51 = vpack.c.b16 %v1953_v45, %v1953_v45  ;;  %v1739_v52 = vld [vmem:[#allocation2 + $0x20] sm:$0xff]  ;;  %v1444_v23 = vsel %vm673_vm4, %v3974_v37, %v1374_v9  ;;  %v3454_v9 = vld [vmem:[%s4751_s2 + $0x8] sm:$0xf] }
 0x14a   : > { %974 = vst.msk [vmem:[#allocation2 + $0x28] sm:$0xff] %vm673_vm4, %v957_v61  ;;  %v830_v46 = vadd.f32 %v829_v53, %v770_v41  ;;  %2141 = vrot.lane.b32.xlu2 %v3689_v2, %s3603_s25  ;;  %v1790_v42 = vrot.slane %v1739_v52, 7  ;;  %v4151_v60 = vsel %vm694_vm5, %v1444_v23, %v1424_v20 }
 0x14b   : > { %v2117_v55 = vrot.slane %v4125_v48, 1  ;;  %v2118_v38 = vrot.slane %v1963_v51, 1  ;;  %v1998_v57 = vshll.u32 %v4125_v48, 16  ;;  %v2003_v59 = vshll.u32 %v1963_v51, 16  ;;  %3422 = vmatmul.msk.bf16.gmra.mxu3 %vm725_vm6, %v4151_v60 }
 0x14c   : > { %v922_v22 = vadd.f32 %v891_v47, %v830_v46  ;;  %3431 = vmatmul.msk.bf16.gmra.mxu0 %vm725_vm6, %v4056_v63  ;;  %v1996_v1 = vshrl.u32 %v4125_v48, 16  ;;  %v1844_v11 = vsel %vm290_vm0, 0.0, %v1790_v42 }
 0x14d   : > { %v831_v29 = vpop.f32.mrf.mxu1  ;;  %v2119_v3 = vsel %vm622_vm2, %v2117_v55, %v2118_v38  ;;  %v2000_v4 = vrot.slane %v1998_v57, 1  ;;  %v2005_v0 = vrot.slane %v2003_v59, 1  ;;  %v1867_v24 = vpack.c.bf16 %v1844_v11, %v1844_v11  ;;  %v1376_v38 = vpop.permute.xlu0 %1375 }
 0x14e   : > { %v942_v6 = vadd.f32 %v4066_v56, %v922_v22  ;;  %2145 = vrot.lane.b32.xlu1 %v2119_v3, %s3603_s25 }
 0x14f   : > { %v2001_v7 = vor.u32 %v2000_v4, %v1996_v1  ;;  %v1917_v37 = vunpack.c.l.b16 %v1867_v24 }
 0x150   : > { %v958_v10 = vmax.f32 %v942_v6, 0.0  ;;  %v893_v28 = vpop.f32.mrf.mxu2 }
 0x151   : > { %v772_v49 = vpop.f32.mrf.mxu0  ;;  %v2006_v63 = vsel %vm481_vm1, %v2001_v7, %v2005_v0  ;;  %v1740_v13 = vld [vmem:[#allocation2 + $0x28] sm:$0xff]  ;;  %v1446_v7 = vsel %vm673_vm4, %v4000_v17, %v1376_v38  ;;  %v1426_v0 = vpop.permute.xlu1 %1425 }
 0x152   : > { %975 = vst.msk [vmem:[#allocation2 + $0x30] sm:$0xff] %vm673_vm4, %v958_v10  ;;  %v832_v14 = vadd.f32 %v831_v29, %v772_v49  ;;  %2095 = vrot.lane.b32.xlu0 %v2006_v63, %s3602_s24  ;;  %1377 = vrot.lane.b32.xlu2 %v3675_v50, %s3602_s24  ;;  %v1791_v16 = vrot.slane %v1740_v13, 7  ;;  %v3573_v10 = vld [vmem:[%s4751_s2 + $0x8] sm:$0x30]  ;;  %v3466_v49 = vld [vmem:[%s4751_s2] sm:$0xf]  ;;  %v1466_v20 = vsel %vm694_vm5, %v1446_v7, %v1426_v0 }
 0x153   : > { %v3455_v11 = vor.u32 %v3573_v10, %v3454_v9  ;;  %v3572_v63 = vld [vmem:[%s4751_s2] sm:$0x30] }
 0x154   : > { %v923_v21 = vadd.f32 %v893_v28, %v832_v14  ;;  %v1792_v19 = vsel %vm290_vm0, %v1790_v42, %v1791_v16  ;;  %v1854_v26 = vsel %vm290_vm0, %v1791_v16, 0.0 }
 0x155   : > { %v834_v8 = vpop.f32.mrf.mxu1  ;;  %v1868_v5 = vpack.c.bf16 %v1792_v19, %v1792_v19  ;;  %v1884_v40 = vpack.c.bf16 %v1854_v26, %v1854_v26  ;;  %v2228_v24 = vsel %vm742_vm3, %v3455_v11, 0 }
 0x156   : > { %v943_v27 = vadd.f32 %v4066_v56, %v923_v21  ;;  %2237 = vmatpush.bf16.msrb.mxu2 %v2228_v24 }
 0x157   : > { %v1918_v53 = vunpack.c.l.b16 %v1868_v5  ;;  %v1954_v30 = vunpack.c.l.b16 %v1884_v40 }
 0x158   : > { %3446 = vmatmul.msk.bf16.gmra.mxu1 %vm725_vm6, %v4120_v39  ;;  %v959_v58 = vmax.f32 %v943_v27, 0.0  ;;  %v896_v31 = vpop.f32.mrf.mxu2 }
 0x159   : > { %v775_v32 = vpop.f32.mrf.mxu0  ;;  %v4156_v12 = vpack.c.b16 %v1918_v53, %v1917_v37  ;;  %v1964_v33 = vpack.c.b16 %v1954_v30, %v1954_v30  ;;  %v1741_v34 = vld [vmem:[#allocation2 + $0x30] sm:$0xff] }
 0x15a   : > { %976 = vst.msk [vmem:[#allocation2 + $0x38] sm:$0xff] %vm673_vm4, %v959_v58  ;;  %v835_v35 = vadd.f32 %v834_v8, %v775_v32  ;;  %1427 = vrot.lane.b32.xlu0 %v3689_v2, %s3603_s25  ;;  %v1793_v47 = vrot.slane %v1741_v34, 7  ;;  %v3467_v8 = vor.u32 %v3572_v63, %v3466_v49 }
 0x15b   : > { %v2120_v43 = vrot.slane %v4156_v12, 1  ;;  %v2121_v15 = vrot.slane %v1964_v33, 1  ;;  %v2010_v44 = vshll.u32 %v4156_v12, 16  ;;  %v2015_v61 = vshll.u32 %v1964_v33, 16  ;;  %3423 = vmatmul.msk.bf16.gmra.mxu3 %vm725_vm6, %v1466_v20 }
 0x15c   : > { %v924_v45 = vadd.f32 %v896_v31, %v835_v35  ;;  %3432 = vmatmul.msk.bf16.gmra.mxu0 %vm725_vm6, %v4076_v25  ;;  %v2008_v51 = vshrl.u32 %v4156_v12, 16  ;;  %v1845_v59 = vsel %vm290_vm0, 0.0, %v1793_v47  ;;  %v2287_v19 = vsel %vm742_vm3, %v3467_v8, 0 }
 0x15d   : > { %v836_v36 = vpop.f32.mrf.mxu1  ;;  %v2122_v41 = vsel %vm622_vm2, %v2120_v43, %v2121_v15  ;;  %v2012_v52 = vrot.slane %v2010_v44, 1  ;;  %v2017_v55 = vrot.slane %v2015_v61, 1  ;;  %v1869_v28 = vpack.c.bf16 %v1845_v59, %v1845_v59  ;;  %2296 = vmatpush.bf16.msrb.mxu3 %v2287_v19 }
 0x15e   : > { %v944_v46 = vadd.f32 %v4066_v56, %v924_v45  ;;  %2147 = vrot.lane.b32.xlu2 %v2122_v41, %s3603_s25 }
 0x15f   : > { %v2013_v29 = vor.u32 %v2012_v52, %v2008_v51  ;;  %v1919_v26 = vunpack.c.l.b16 %v1869_v28 }
 0x160   : > { %v960_v57 = vmax.f32 %v944_v46, 0.0  ;;  %v898_v22 = vpop.f32.mrf.mxu2 }
 0x161   : > { %v777_v42 = vpop.f32.mrf.mxu0  ;;  %v2018_v25 = vsel %vm481_vm1, %v2013_v29, %v2017_v55  ;;  %v1742_v3 = vld [vmem:[#allocation2 + $0x38] sm:$0xff] }
 0x162   : > { %977 = vst.msk [vmem:[#allocation2 + $0x40] sm:$0xff] %vm673_vm4, %v960_v57  ;;  %v837_v1 = vadd.f32 %v836_v36, %v777_v42  ;;  %2097 = vrot.lane.b32.xlu1 %v2018_v25, %s3602_s24  ;;  %v1794_v6 = vrot.slane %v1742_v3, 7 }
 0x164   : > { %v925_v17 = vadd.f32 %v898_v22, %v837_v1  ;;  %v1795_v13 = vsel %vm290_vm0, %v1793_v47, %v1794_v6  ;;  %v1855_v14 = vsel %vm290_vm0, %v1794_v6, 0.0 }
 0x165   : > { %v839_v4 = vpop.f32.mrf.mxu1  ;;  %v1870_v16 = vpack.c.bf16 %v1795_v13, %v1795_v13  ;;  %v1885_v23 = vpack.c.bf16 %v1855_v14, %v1855_v14 }
 0x166   : > { %v945_v21 = vadd.f32 %v4066_v56, %v925_v17 }
 0x167   : > { %v1920_v5 = vunpack.c.l.b16 %v1870_v16  ;;  %v1955_v40 = vunpack.c.l.b16 %v1885_v23 }
 0x168   : > { %3447 = vmatmul.msk.bf16.gmra.mxu1 %vm725_vm6, %v4151_v60  ;;  %v961_v27 = vmax.f32 %v945_v21, 0.0  ;;  %v901_v37 = vpop.f32.mrf.mxu2 }
 0x169   : > { %v780_v53 = vpop.f32.mrf.mxu0  ;;  %v4196_v30 = vpack.c.b16 %v1920_v5, %v1919_v26  ;;  %v1965_v58 = vpack.c.b16 %v1955_v40, %v1955_v40  ;;  %v1743_v31 = vld [vmem:[#allocation2 + $0x40] sm:$0xff]  ;;  %v4223_v40 = vpop.f32.mrf.mxu3 }
 0x16a   : > { %978 = vst.msk [vmem:[#allocation2 + $0x48] sm:$0xff] %vm673_vm4, %v961_v27  ;;  %v840_v32 = vadd.f32 %v839_v4, %v780_v53  ;;  %v1796_v34 = vrot.slane %v1743_v31, 7 }
 0x16b   : > { %v2123_v35 = vrot.slane %v4196_v30, 1  ;;  %v2124_v36 = vrot.slane %v1965_v58, 1  ;;  %v2022_v43 = vshll.u32 %v4196_v30, 16  ;;  %v2027_v44 = vshll.u32 %v1965_v58, 16 }
 0x16c   : > { %v926_v15 = vadd.f32 %v901_v37, %v840_v32  ;;  %3433 = vmatmul.msk.bf16.gmra.mxu0 %vm725_vm6, %v4093_v54  ;;  %v2020_v61 = vshrl.u32 %v4196_v30, 16  ;;  %v1846_v51 = vsel %vm290_vm0, 0.0, %v1796_v34 }
 0x16d   : > { %v841_v33 = vpop.f32.mrf.mxu1  ;;  %v2125_v45 = vsel %vm622_vm2, %v2123_v35, %v2124_v36  ;;  %v2024_v47 = vrot.slane %v2022_v43, 1  ;;  %v2029_v46 = vrot.slane %v2027_v44, 1  ;;  %v1871_v22 = vpack.c.bf16 %v1846_v51, %v1846_v51 }
 0x16e   : > { %v946_v41 = vadd.f32 %v4066_v56, %v926_v15  ;;  %2149 = vrot.lane.b32.xlu1 %v2125_v45, %s3603_s25 }
 0x16f   : > { %v2025_v52 = vor.u32 %v2024_v47, %v2020_v61  ;;  %v1921_v0 = vunpack.c.l.b16 %v1871_v22 }
 0x170   : > { %v962_v29 = vmax.f32 %v946_v41, 0.0  ;;  %v903_v55 = vpop.f32.mrf.mxu2 }
 0x171   : > { %v782_v38 = vpop.f32.mrf.mxu0  ;;  %v2030_v57 = vsel %vm481_vm1, %v2025_v52, %v2029_v46  ;;  %v1744_v54 = vld [vmem:[#allocation2 + $0x48] sm:$0xff] }
 0x172   : > { %979 = vst.msk [vmem:[#allocation2 + $0x50] sm:$0xff] %vm673_vm4, %v962_v29  ;;  %v842_v59 = vadd.f32 %v841_v33, %v782_v38  ;;  %2099 = vrot.lane.b32.xlu0 %v2030_v57, %s3602_s24  ;;  %v1797_v25 = vrot.slane %v1744_v54, 7 }
 0x174   : > { %v927_v3 = vadd.f32 %v903_v55, %v842_v59  ;;  %v1798_v1 = vsel %vm290_vm0, %v1796_v34, %v1797_v25  ;;  %v1856_v4 = vsel %vm290_vm0, %v1797_v25, 0.0  ;;  %v4235_v55 = vpop.f32.mrf.mxu3 }
 0x175   : > { %v844_v42 = vpop.f32.mrf.mxu1  ;;  %v1872_v6 = vpack.c.bf16 %v1798_v1, %v1798_v1  ;;  %v1886_v7 = vpack.c.bf16 %v1856_v4, %v1856_v4 }
 0x176   : > { %v947_v9 = vadd.f32 %v4066_v56, %v927_v3 }
 0x177   : > { %v1922_v10 = vunpack.c.l.b16 %v1872_v6  ;;  %v1956_v28 = vunpack.c.l.b16 %v1886_v7 }
 0x178   : > { %3448 = vmatmul.msk.bf16.gmra.mxu1 %vm725_vm6, %v1466_v20  ;;  %v963_v11 = vmax.f32 %v947_v9, 0.0  ;;  %v906_v49 = vpop.f32.mrf.mxu2 }
 0x179   : > { %v785_v63 = vpop.f32.mrf.mxu0  ;;  %v4215_v17 = vpack.c.b16 %v1922_v10, %v1921_v0  ;;  %v1966_v13 = vpack.c.b16 %v1956_v28, %v1956_v28  ;;  %v1745_v14 = vld [vmem:[#allocation2 + $0x50] sm:$0xff] }
 0x17a   : > { %980 = vst.msk [vmem:[#allocation2 + $0x58] sm:$0xff] %vm673_vm4, %v963_v11  ;;  %v845_v8 = vadd.f32 %v844_v42, %v785_v63  ;;  %v1799_v23 = vrot.slane %v1745_v14, 7 }
 0x17b   : > { %v2126_v24 = vrot.slane %v4215_v17, 1  ;;  %v2127_v21 = vrot.slane %v1966_v13, 1  ;;  %v2032_v20 = vshrl.u32 %v4215_v17, 16  ;;  %v2034_v19 = vshll.u32 %v4215_v17, 16 }
 0x17c   : > { %v928_v26 = vadd.f32 %v906_v49, %v845_v8  ;;  %3434 = vmatmul.msk.bf16.gmra.mxu0 %vm725_vm6, %v4120_v39  ;;  %v2039_v5 = vshll.u32 %v1966_v13, 16  ;;  %v1847_v31 = vsel %vm290_vm0, 0.0, %v1799_v23 }
 0x17d   : > { %v846_v16 = vpop.f32.mrf.mxu1  ;;  %v2128_v27 = vsel %vm622_vm2, %v2126_v24, %v2127_v21  ;;  %v2036_v37 = vrot.slane %v2034_v19, 1  ;;  %v1873_v43 = vpack.c.bf16 %v1847_v31, %v1847_v31  ;;  %v4249_v24 = vpop.f32.mrf.mxu3 }
 0x17e   : > { %v948_v53 = vadd.f32 %v4066_v56, %v928_v26  ;;  %2151 = vrot.lane.b32.xlu0 %v2128_v27, %s3603_s25  ;;  %v2041_v58 = vrot.slane %v2039_v5, 1 }
 0x17f   : > { %v2037_v32 = vor.u32 %v2036_v37, %v2032_v20  ;;  %v1923_v46 = vunpack.c.l.b16 %v1873_v43 }
 0x180   : > { %v964_v33 = vmax.f32 %v948_v53, 0.0  ;;  %v908_v34 = vpop.f32.mrf.mxu2 }
 0x181   : > { %v787_v35 = vpop.f32.mrf.mxu0  ;;  %v2042_v36 = vsel %vm481_vm1, %v2037_v32, %v2041_v58  ;;  %v1746_v39 = vld [vmem:[#allocation2 + $0x58] sm:$0xff] }
 0x182   : > { %981 = vst.msk [vmem:[#allocation2 + $0x60] sm:$0xff] %vm673_vm4, %v964_v33  ;;  %v847_v15 = vadd.f32 %v846_v16, %v787_v35  ;;  %2101 = vrot.lane.b32.xlu2 %v2042_v36, %s3602_s24  ;;  %v1800_v45 = vrot.slane %v1746_v39, 7 }
 0x184   : > { %v929_v61 = vadd.f32 %v908_v34, %v847_v15  ;;  %v1801_v47 = vsel %vm290_vm0, %v1799_v23, %v1800_v45  ;;  %v1857_v41 = vsel %vm290_vm0, %v1800_v45, 0.0 }
 0x185   : > { %v849_v44 = vpop.f32.mrf.mxu1  ;;  %v1874_v51 = vpack.c.bf16 %v1801_v47, %v1801_v47  ;;  %v1887_v52 = vpack.c.bf16 %v1857_v41, %v1857_v41  ;;  %v4264_v41 = vld [vmem:[%s4752_s3] ss:$0 sm:$0xff] }
 0x186   : > { %v949_v29 = vadd.f32 %v4066_v56, %v929_v61 }
 0x187   : > { %v1924_v38 = vunpack.c.l.b16 %v1874_v51  ;;  %v1957_v57 = vunpack.c.l.b16 %v1887_v52 }
 0x188   : > { %v965_v54 = vmax.f32 %v949_v29, 0.0  ;;  %v911_v22 = vpop.f32.mrf.mxu2 }
 0x189   : > { %v790_v59 = vpop.f32.mrf.mxu0  ;;  %v4237_v42 = vpack.c.b16 %v1924_v38, %v1923_v46  ;;  %v1967_v25 = vpack.c.b16 %v1957_v57, %v1957_v57  ;;  %v1747_v3 = vld [vmem:[#allocation2 + $0x60] sm:$0xff]  ;;  %v4269_v57 = vpop.f32.mrf.mxu3 }
 0x18a   : > { %982 = vst.msk [vmem:[#allocation2 + $0x68] sm:$0xff] %vm673_vm4, %v965_v54  ;;  %v850_v1 = vadd.f32 %v849_v44, %v790_v59  ;;  %v1802_v6 = vrot.slane %v1747_v3, 7 }
 0x18b   : > { %v2044_v7 = vshrl.u32 %v4237_v42, 16  ;;  %v2046_v0 = vshll.u32 %v4237_v42, 16  ;;  %v2051_v9 = vshll.u32 %v1967_v25, 16  ;;  %v2129_v10 = vrot.slane %v4237_v42, 1 }
 0x18c   : > { %v930_v28 = vadd.f32 %v911_v22, %v850_v1  ;;  %3435 = vmatmul.msk.bf16.gmra.mxu0 %vm725_vm6, %v4151_v60  ;;  %v2130_v11 = vrot.slane %v1967_v25, 1  ;;  %v1848_v14 = vsel %vm290_vm0, 0.0, %v1802_v6 }
 0x18d   : > { %v851_v4 = vpop.f32.mrf.mxu1  ;;  %v2048_v49 = vrot.slane %v2046_v0, 1  ;;  %v2053_v63 = vrot.slane %v2051_v9, 1  ;;  %v1875_v26 = vpack.c.bf16 %v1848_v14, %v1848_v14 }
 0x18e   : > { %v950_v13 = vadd.f32 %v4066_v56, %v930_v28  ;;  %v2131_v8 = vsel %vm622_vm2, %v2129_v10, %v2130_v11 }
 0x18f   : > { %v2049_v16 = vor.u32 %v2048_v49, %v2044_v7  ;;  %2153 = vrot.lane.b32.xlu2 %v2131_v8, %s3603_s25  ;;  %v1925_v34 = vunpack.c.l.b16 %v1875_v26  ;;  %v2092_v7 = vpop.permute.xlu1 %2091  ;;  %v3480_v49 = vld [vmem:[%s4751_s2 + $0x10] sm:$0xf] }
 0x190   : > { %v966_v23 = vmax.f32 %v950_v13, 0.0  ;;  %v913_v19 = vpop.f32.mrf.mxu2  ;;  %v2162_v14 = vsel %vm673_vm4, %v3659_v18, %v2092_v7 }
 0x191   : > { %v792_v21 = vpop.f32.mrf.mxu0  ;;  %v2054_v20 = vsel %vm481_vm1, %v2049_v16, %v2053_v63  ;;  %v1748_v60 = vld [vmem:[#allocation2 + $0x68] sm:$0xff]  ;;  %v3574_v63 = vld [vmem:[%s4751_s2 + $0x10] sm:$0x30] }
 0x192   : > { %983 = vst.msk [vmem:[#allocation2 + $0x70] sm:$0xff] %vm673_vm4, %v966_v23  ;;  %v852_v5 = vadd.f32 %v851_v4, %v792_v21  ;;  %2103 = vrot.lane.b32.xlu1 %v2054_v20, %s3602_s24  ;;  %v1803_v37 = vrot.slane %v1748_v60, 7  ;;  %v3481_v23 = vor.u32 %v3574_v63, %v3480_v49 }
 0x194   : > { %v931_v53 = vadd.f32 %v913_v19, %v852_v5  ;;  %v1804_v58 = vsel %vm290_vm0, %v1802_v6, %v1803_v37  ;;  %v1858_v31 = vsel %vm290_vm0, %v1803_v37, 0.0  ;;  %v2349_v26 = vsel %vm742_vm3, %v3481_v23, 0 }
 0x195   : > { %v1626_v27 = vpop.f32.mrf.mxu1  ;;  %v1876_v32 = vpack.c.bf16 %v1804_v58, %v1804_v58  ;;  %v1888_v33 = vpack.c.bf16 %v1858_v31, %v1858_v31  ;;  %2358 = vmatpush.bf16.msra.mxu0 %v2349_v26 }
 0x196   : > { %v951_v35 = vadd.f32 %v4066_v56, %v931_v53  ;;  %v1516_v53 = vpop.f32.mrf.mxu3 }
 0x197   : > { %v1926_v36 = vunpack.c.l.b16 %v1876_v32  ;;  %v1958_v39 = vunpack.c.l.b16 %v1888_v33 }
 0x198   : > { %v967_v43 = vmax.f32 %v951_v35, 0.0 }
 0x199   : > { %v1565_v15 = vpop.f32.mrf.mxu0  ;;  %v4257_v44 = vpack.c.b16 %v1926_v36, %v1925_v34  ;;  %v1968_v45 = vpack.c.b16 %v1958_v39, %v1958_v39  ;;  %v1749_v61 = vld [vmem:[#allocation2 + $0x70] sm:$0xff] }
 0x19a   : > { %984 = vst.msk [vmem:[#allocation2 + $0x78] sm:$0xff] %vm673_vm4, %v967_v43  ;;  %v1566_v47 = vadd.f32 %v1565_v15, %v4223_v40  ;;  %v1805_v52 = vrot.slane %v1749_v61, 7 }
 0x19b   : > { %v2056_v56 = vshrl.u32 %v4257_v44, 16  ;;  %v2058_v46 = vshll.u32 %v4257_v44, 16  ;;  %v2063_v29 = vshll.u32 %v1968_v45, 16  ;;  %v2132_v38 = vrot.slane %v4257_v44, 1 }
 0x19c   : > { %v1666_v54 = vadd.f32 %v1626_v27, %v1566_v47  ;;  %v4271_v22 = vpop.permute.xlu2 %2093  ;;  %v2133_v40 = vrot.slane %v1968_v45, 1  ;;  %v1849_v4 = vsel %vm290_vm0, 0.0, %v1805_v52 }
 0x19d   : > { %v1628_v51 = vpop.f32.mrf.mxu1  ;;  %v2060_v59 = vrot.slane %v2058_v46, 1  ;;  %v2065_v25 = vrot.slane %v2063_v29, 1  ;;  %v1877_v11 = vpack.c.bf16 %v1849_v4, %v1849_v4 }
 0x19e   : > { %v1686_v3 = vadd.f32 %v4264_v41, %v1666_v54  ;;  %v2134_v1 = vsel %vm622_vm2, %v2132_v38, %v2133_v40 }
 0x19f   : > { %v2061_v6 = vor.u32 %v2060_v59, %v2056_v56  ;;  %2155 = vrot.lane.b32.xlu1 %v2134_v1, %s3603_s25  ;;  %v1927_v37 = vunpack.c.l.b16 %v1877_v11 }
 0x1a0   : > { %v1702_v0 = vmax.f32 %v1686_v3, 0.0  ;;  %v2164_v3 = vsel %vm673_vm4, %v4098_v62, %v4271_v22 }
 0x1a1   : > { %v1567_v9 = vpop.f32.mrf.mxu0  ;;  %v2066_v10 = vsel %vm481_vm1, %v2061_v6, %v2065_v25  ;;  %v1750_v28 = vld [vmem:[#allocation2 + $0x78] sm:$0xff]  ;;  %v1518_v25 = vpop.f32.mrf.mxu3 }
 0x1a2   : > { %1719 = vst.msk [vmem:[#allocation2 + $0x80] sm:$0xff] %vm673_vm4, %v1702_v0  ;;  %v1568_v13 = vadd.f32 %v1567_v9, %v4235_v55  ;;  %2105 = vrot.lane.b32.xlu0 %v2066_v10, %s3602_s24  ;;  %v1806_v16 = vrot.slane %v1750_v28, 7 }
 0x1a4   : > { %v1667_v21 = vadd.f32 %v1628_v51, %v1568_v13  ;;  %v2142_v20 = vpop.permute.xlu2 %2141  ;;  %v1807_v19 = vsel %vm290_vm0, %v1805_v52, %v1806_v16  ;;  %v1859_v60 = vsel %vm290_vm0, %v1806_v16, 0.0 }
 0x1a5   : > { %v1631_v8 = vpop.f32.mrf.mxu1  ;;  %v2182_v5 = vsel %vm694_vm5, %v2162_v14, %v2142_v20  ;;  %v1878_v27 = vpack.c.bf16 %v1807_v19, %v1807_v19  ;;  %v1889_v55 = vpack.c.bf16 %v1859_v60, %v1859_v60 }
 0x1a6   : > { %v1687_v58 = vadd.f32 %v4264_v41, %v1667_v21  ;;  %3468 = vmatmul.msk.bf16.vlgmr.msrb.gmra.mxu3 %vm725_vm6, %v2182_v5 }
 0x1a7   : > { %v1928_v31 = vunpack.c.l.b16 %v1878_v27  ;;  %v1959_v32 = vunpack.c.l.b16 %v1889_v55 }
 0x1a8   : > { %v1703_v33 = vmax.f32 %v1687_v58, 0.0 }
 0x1a9   : > { %v1570_v34 = vpop.f32.mrf.mxu0  ;;  %v4295_v35 = vpack.c.b16 %v1928_v31, %v1927_v37  ;;  %v1969_v36 = vpack.c.b16 %v1959_v32, %v1959_v32  ;;  %v2501_v39 = vld [vmem:[#allocation2 + $0x80] sm:$0xff]  ;;  %v1521_v26 = vpop.f32.mrf.mxu3 }
 0x1aa   : > { %1720 = vst.msk [vmem:[#allocation2 + $0x88] sm:$0xff] %vm673_vm4, %v1703_v33  ;;  %v1571_v43 = vadd.f32 %v1570_v34, %v4249_v24  ;;  %v2550_v45 = vrot.slane %v2501_v39, 7 }
 0x1ab   : > { %v2135_v61 = vrot.slane %v4295_v35, 1  ;;  %v2136_v47 = vrot.slane %v1969_v36, 1  ;;  %v2738_v51 = vshrl.u32 %v4295_v35, 16  ;;  %v2740_v52 = vshll.u32 %v4295_v35, 16 }
 0x1ac   : > { %v1668_v56 = vadd.f32 %v1631_v8, %v1571_v43  ;;  %v2745_v46 = vshll.u32 %v1969_v36, 16  ;;  %v2608_v24 = vsel %vm290_vm0, 0.0, %v2550_v45 }
 0x1ad   : > { %v1633_v15 = vpop.f32.mrf.mxu1  ;;  %v2137_v29 = vsel %vm622_vm2, %v2135_v61, %v2136_v47  ;;  %v2742_v38 = vrot.slane %v2740_v52, 1  ;;  %v2629_v10 = vpack.c.bf16 %v2608_v24, %v2608_v24 }
 0x1ae   : > { %v1688_v54 = vadd.f32 %v4264_v41, %v1668_v56  ;;  %2157 = vrot.lane.b32.xlu0 %v2137_v29, %s3603_s25  ;;  %v2747_v40 = vrot.slane %v2745_v46, 1 }
 0x1af   : > { %v2743_v59 = vor.u32 %v2742_v38, %v2738_v51  ;;  %v2679_v8 = vunpack.c.l.b16 %v2629_v10 }
 0x1b0   : > { %v1704_v1 = vmax.f32 %v1688_v54, 0.0  ;;  %v2144_v4 = vpop.permute.xlu0 %2143 }
 0x1b1   : > { %v2184_v6 = vsel %vm694_vm5, %v2164_v3, %v2144_v4  ;;  %v1572_v7 = vpop.f32.mrf.mxu0  ;;  %v2748_v0 = vsel %vm481_vm1, %v2743_v59, %v2747_v40  ;;  %v2502_v9 = vld [vmem:[#allocation2 + $0x88] sm:$0xff] }
 0x1b2   : > { %1721 = vst.msk [vmem:[#allocation2 + $0x90] sm:$0xff] %vm673_vm4, %v1704_v1  ;;  %v1573_v28 = vadd.f32 %v1572_v7, %v4269_v57  ;;  %2857 = vrot.lane.b32.xlu1 %v2748_v0, %s3602_s24  ;;  %3456 = vmatmul.msk.bf16.vlgmr.msrb.gmra.mxu2 %vm725_vm6, %v2184_v6  ;;  %v2551_v49 = vrot.slane %v2502_v9, 7 }
 0x1b3   : > { %2107 = vrot.lane.b32.xlu2 %v2748_v0, %s3602_s24 }
 0x1b4   : > { %v1669_v62 = vadd.f32 %v1633_v15, %v1573_v28  ;;  %v2552_v22 = vsel %vm290_vm0, %v2550_v45, %v2551_v49  ;;  %v2618_v63 = vsel %vm290_vm0, %v2551_v49, 0.0  ;;  %v1378_v28 = vpop.permute.xlu2 %1377 }
 0x1b5   : > { %v1636_v11 = vpop.f32.mrf.mxu1  ;;  %v2630_v13 = vpack.c.bf16 %v2552_v22, %v2552_v22  ;;  %v2648_v14 = vpack.c.bf16 %v2618_v63, %v2618_v63  ;;  %v1448_v22 = vsel %vm673_vm4, %v3659_v18, %v1378_v28 }
 0x1b6   : > { %v1689_v16 = vadd.f32 %v4264_v41, %v1669_v62  ;;  %3469 = vmatmul.msk.bf16.gmra.mxu3 %vm725_vm6, %v2184_v6 }
 0x1b7   : > { %v2680_v57 = vunpack.c.l.b16 %v2630_v13  ;;  %v2718_v23 = vunpack.c.l.b16 %v2648_v14 }
 0x1b8   : > { %v1705_v21 = vmax.f32 %v1689_v16, 0.0 }
 0x1b9   : > { %v1575_v20 = vpop.f32.mrf.mxu0  ;;  %v4320_v19 = vpack.c.b16 %v2680_v57, %v2679_v8  ;;  %v4322_v60 = vpack.c.b16 %v2718_v23, %v2718_v23  ;;  %v2503_v5 = vld [vmem:[#allocation2 + $0x90] sm:$0xff] }
 0x1ba   : > { %1722 = vst.msk [vmem:[#allocation2 + $0x98] sm:$0xff] %vm673_vm4, %v1705_v21  ;;  %v1576_v27 = vadd.f32 %v1575_v20, %v1516_v53  ;;  %v2553_v37 = vrot.slane %v2503_v5, 7 }
 0x1bb   : > { %2907 = vrot.lane.b32.xlu2 %v2137_v29, %s3603_s25  ;;  %v2750_v58 = vshrl.u32 %v4320_v19, 16  ;;  %v2752_v31 = vshll.u32 %v4320_v19, 16  ;;  %v2757_v32 = vshll.u32 %v4322_v60, 16  ;;  %v1523_v29 = vpop.f32.mrf.mxu3 }
 0x1bc   : > { %v1670_v33 = vadd.f32 %v1636_v11, %v1576_v27  ;;  %v2609_v43 = vsel %vm290_vm0, 0.0, %v2553_v37 }
 0x1bd   : > { %v1638_v55 = vpop.f32.mrf.mxu1  ;;  %v2754_v34 = vrot.slane %v2752_v31, 1  ;;  %v2759_v36 = vrot.slane %v2757_v32, 1  ;;  %v2631_v51 = vpack.c.bf16 %v2609_v43, %v2609_v43 }
 0x1be   : > { %v1690_v39 = vadd.f32 %v4264_v41, %v1670_v33 }
 0x1bf   : > { %v2755_v15 = vor.u32 %v2754_v34, %v2750_v58  ;;  %v2681_v6 = vunpack.c.l.b16 %v2631_v51  ;;  %v2880_v51 = vrot.slane %v4320_v19, 1 }
 0x1c0   : > { %v1706_v45 = vmax.f32 %v1690_v39, 0.0  ;;  %v2146_v59 = vpop.permute.xlu1 %2145 }
 0x1c1   : > { %v1577_v53 = vpop.f32.mrf.mxu0  ;;  %v4332_v61 = vsel %vm481_vm1, %v2755_v15, %v2759_v36  ;;  %v2504_v47 = vld [vmem:[#allocation2 + $0x98] sm:$0xff] }
 0x1c2   : > { %1723 = vst.msk [vmem:[#allocation2 + $0xa0] sm:$0xff] %vm673_vm4, %v1706_v45  ;;  %v1578_v52 = vadd.f32 %v1577_v53, %v1518_v25  ;;  %v2554_v46 = vrot.slane %v2504_v47, 7 }
 0x1c3   : > { %2859 = vrot.lane.b32.xlu2 %v4332_v61, %s3602_s24  ;;  %v1526_v58 = vpop.f32.mrf.mxu3 }
 0x1c4   : > { %v1671_v38 = vadd.f32 %v1638_v55, %v1578_v52  ;;  %v2096_v54 = vpop.permute.xlu0 %2095  ;;  %v2555_v40 = vsel %vm290_vm0, %v2553_v37, %v2554_v46  ;;  %v2619_v24 = vsel %vm290_vm0, %v2554_v46, 0.0  ;;  %v2881_v52 = vrot.slane %v4322_v60, 1 }
 0x1c5   : > { %v1641_v56 = vpop.f32.mrf.mxu1  ;;  %v2166_v3 = vsel %vm673_vm4, %v4125_v48, %v2096_v54  ;;  %v2632_v1 = vpack.c.bf16 %v2555_v40, %v2555_v40  ;;  %v2649_v4 = vpack.c.bf16 %v2619_v24, %v2619_v24  ;;  %v2148_v40 = vpop.permute.xlu2 %2147 }
 0x1c6   : > { %v1691_v25 = vadd.f32 %v4264_v41, %v1671_v38  ;;  %v2186_v7 = vsel %vm694_vm5, %v2166_v3, %v2146_v59  ;;  %v4374_v60 = vsel %vm622_vm2, %v2880_v51, %v2881_v52 }
 0x1c7   : > { %3457 = vmatmul.msk.bf16.gmra.mxu2 %vm725_vm6, %v2186_v7  ;;  %3470 = vmatmul.msk.bf16.gmra.mxu3 %vm725_vm6, %v2186_v7  ;;  %v2682_v0 = vunpack.c.l.b16 %v2632_v1  ;;  %v2719_v9 = vunpack.c.l.b16 %v2649_v4 }
 0x1c8   : > { %v1707_v10 = vmax.f32 %v1691_v25, 0.0  ;;  %3482 = vmatmul.msk.bf16.vlgmr.msra.gmra.mxu0 %vm725_vm6, %v2186_v7 }
 0x1c9   : > { %v1580_v11 = vpop.f32.mrf.mxu0  ;;  %v4346_v49 = vpack.c.b16 %v2682_v0, %v2681_v6  ;;  %v2729_v48 = vpack.c.b16 %v2719_v9, %v2719_v9  ;;  %v2505_v62 = vld [vmem:[#allocation2 + $0xa0] sm:$0xff] }
 0x1ca   : > { %1724 = vst.msk [vmem:[#allocation2 + $0xa8] sm:$0xff] %vm673_vm4, %v1707_v10  ;;  %v1581_v63 = vadd.f32 %v1580_v11, %v1521_v26  ;;  %v2556_v14 = vrot.slane %v2505_v62, 7 }
 0x1cb   : > { %v2762_v8 = vshrl.u32 %v4346_v49, 16  ;;  %v2764_v16 = vshll.u32 %v4346_v49, 16  ;;  %v2769_v57 = vshll.u32 %v2729_v48, 16  ;;  %v2883_v23 = vrot.slane %v4346_v49, 1  ;;  %v1528_v7 = vpop.f32.mrf.mxu3 }
 0x1cc   : > { %v1672_v21 = vadd.f32 %v1641_v56, %v1581_v63  ;;  %v1428_v20 = vpop.permute.xlu0 %1427  ;;  %v2884_v5 = vrot.slane %v2729_v48, 1  ;;  %v2610_v32 = vsel %vm290_vm0, 0.0, %v2556_v14 }
 0x1cd   : > { %v1643_v13 = vpop.f32.mrf.mxu1  ;;  %v1468_v27 = vsel %vm694_vm5, %v1448_v22, %v1428_v20  ;;  %v2766_v55 = vrot.slane %v2764_v16, 1  ;;  %v2771_v37 = vrot.slane %v2769_v57, 1  ;;  %v2633_v15 = vpack.c.bf16 %v2610_v32, %v2610_v32 }
 0x1ce   : > { %v1692_v31 = vadd.f32 %v4264_v41, %v1672_v21  ;;  %3449 = vmatmul.msk.bf16.gmra.mxu1 %vm725_vm6, %v1468_v27  ;;  %v2885_v26 = vsel %vm622_vm2, %v2883_v23, %v2884_v5 }
 0x1cf   : > { %v2767_v33 = vor.u32 %v2766_v55, %v2762_v8  ;;  %2911 = vrot.lane.b32.xlu1 %v2885_v26, %s3603_s25  ;;  %v2683_v3 = vunpack.c.l.b16 %v2633_v15 }
 0x1d0   : > { %v1708_v34 = vmax.f32 %v1692_v31, 0.0 }
 0x1d1   : > { %v1582_v36 = vpop.f32.mrf.mxu0  ;;  %v2772_v39 = vsel %vm481_vm1, %v2767_v33, %v2771_v37  ;;  %v2506_v43 = vld [vmem:[#allocation2 + $0xa8] sm:$0xff] }
 0x1d2   : > { %1725 = vst.msk [vmem:[#allocation2 + $0xb0] sm:$0xff] %vm673_vm4, %v1708_v34  ;;  %v1583_v45 = vadd.f32 %v1582_v36, %v1523_v29  ;;  %2861 = vrot.lane.b32.xlu0 %v2772_v39, %s3602_s24  ;;  %v2557_v47 = vrot.slane %v2506_v43, 7  ;;  %v3506_v34 = vld [vmem:[%s4751_s2] sm:$0xf]  ;;  %v3575_v36 = vld [vmem:[%s4751_s2] sm:$0x30] }
 0x1d3   : > { %v1531_v31 = vpop.f32.mrf.mxu3  ;;  %v3507_v15 = vor.u32 %v3575_v36, %v3506_v34 }
 0x1d4   : > { %v1673_v56 = vadd.f32 %v1643_v13, %v1583_v45  ;;  %v2098_v46 = vpop.permute.xlu1 %2097  ;;  %v2558_v38 = vsel %vm290_vm0, %v2556_v14, %v2557_v47  ;;  %v2620_v54 = vsel %vm290_vm0, %v2557_v47, 0.0  ;;  %v3520_v45 = vld [vmem:[%s4751_s2 + $0x10] sm:$0xf] }
 0x1d5   : > { %v1646_v53 = vpop.f32.mrf.mxu1  ;;  %v2168_v24 = vsel %vm673_vm4, %v4156_v12, %v2098_v46  ;;  %v2634_v59 = vpack.c.bf16 %v2558_v38, %v2558_v38  ;;  %v2650_v29 = vpack.c.bf16 %v2620_v54, %v2620_v54 }
 0x1d6   : > { %v1693_v1 = vadd.f32 %v4264_v41, %v1673_v56  ;;  %v2188_v4 = vsel %vm694_vm5, %v2168_v24, %v2148_v40 }
 0x1d7   : > { %3458 = vmatmul.msk.bf16.gmra.mxu2 %vm725_vm6, %v2188_v4  ;;  %3471 = vmatmul.msk.bf16.gmra.mxu3 %vm725_vm6, %v2188_v4  ;;  %v2684_v6 = vunpack.c.l.b16 %v2634_v59  ;;  %v2720_v25 = vunpack.c.l.b16 %v2650_v29  ;;  %v3052_v59 = vsel %vm742_vm3, %v3507_v15, 0 }
 0x1d8   : > { %v1709_v0 = vmax.f32 %v1693_v1, 0.0  ;;  %3483 = vmatmul.msk.bf16.gmra.mxu0 %vm725_vm6, %v2188_v4  ;;  %3061 = vmatpush.bf16.msra.mxu2 %v3052_v59 }
 0x1d9   : > { %v1585_v12 = vpop.f32.mrf.mxu0  ;;  %v4377_v9 = vpack.c.b16 %v2684_v6, %v2683_v3  ;;  %v2730_v10 = vpack.c.b16 %v2720_v25, %v2720_v25  ;;  %v2507_v28 = vld [vmem:[#allocation2 + $0xb0] sm:$0xff] }
 0x1da   : > { %1726 = vst.msk [vmem:[#allocation2 + $0xb8] sm:$0xff] %vm673_vm4, %v1709_v0  ;;  %v1586_v11 = vadd.f32 %v1585_v12, %v1526_v58  ;;  %2909 = vrot.lane.b32.xlu0 %v4374_v60, %s3603_s25  ;;  %v2559_v8 = vrot.slane %v2507_v28, 7 }
 0x1db   : > { %v2886_v62 = vrot.slane %v4377_v9, 1  ;;  %v2887_v22 = vrot.slane %v2730_v10, 1  ;;  %v2776_v63 = vshll.u32 %v4377_v9, 16  ;;  %v2781_v14 = vshll.u32 %v2730_v10, 16 }
 0x1dc   : > { %v1674_v13 = vadd.f32 %v1646_v53, %v1586_v11  ;;  %v2774_v57 = vshrl.u32 %v4377_v9, 16  ;;  %v2611_v55 = vsel %vm290_vm0, 0.0, %v2559_v8  ;;  %v3577_v53 = vld [vmem:[%s4751_s2 + $0x10] sm:$0x30] }
 0x1dd   : > { %v1648_v48 = vpop.f32.mrf.mxu1  ;;  %v2888_v16 = vsel %vm622_vm2, %v2886_v62, %v2887_v22  ;;  %v2778_v23 = vrot.slane %v2776_v63, 1  ;;  %v2783_v5 = vrot.slane %v2781_v14, 1  ;;  %v2635_v43 = vpack.c.bf16 %v2611_v55, %v2611_v55  ;;  %v3576_v62 = vld [vmem:[%s4751_s2 + $0x8] sm:$0x30] }
 0x1de   : > { %v1694_v21 = vadd.f32 %v4264_v41, %v1674_v13  ;;  %2913 = vrot.lane.b32.xlu2 %v2888_v16, %s3603_s25  ;;  %v3521_v46 = vor.u32 %v3577_v53, %v3520_v45  ;;  %v1533_v13 = vpop.f32.mrf.mxu3 }
 0x1df   : > { %v2779_v20 = vor.u32 %v2778_v23, %v2774_v57  ;;  %v2685_v4 = vunpack.c.l.b16 %v2635_v43 }
 0x1e0   : > { %v1710_v27 = vmax.f32 %v1694_v21, 0.0  ;;  %v2150_v38 = vpop.permute.xlu1 %2149  ;;  %v3113_v1 = vsel %vm742_vm3, %v3521_v46, 0 }
 0x1e1   : > { %v1587_v37 = vpop.f32.mrf.mxu0  ;;  %v2784_v58 = vsel %vm481_vm1, %v2779_v20, %v2783_v5  ;;  %v2508_v26 = vld [vmem:[#allocation2 + $0xb8] sm:$0xff]  ;;  %3122 = vmatpush.bf16.msra.mxu3 %v3113_v1 }
 0x1e2   : > { %1727 = vst.msk [vmem:[#allocation2 + $0xc0] sm:$0xff] %vm673_vm4, %v1710_v27  ;;  %v1588_v32 = vadd.f32 %v1587_v37, %v1528_v7  ;;  %2863 = vrot.lane.b32.xlu1 %v2784_v58, %s3602_s24  ;;  %v2560_v33 = vrot.slane %v2508_v26, 7 }
 0x1e4   : > { %v1675_v47 = vadd.f32 %v1648_v48, %v1588_v32  ;;  %v2100_v51 = vpop.permute.xlu0 %2099  ;;  %v2561_v52 = vsel %vm290_vm0, %v2559_v8, %v2560_v33  ;;  %v2621_v56 = vsel %vm290_vm0, %v2560_v33, 0.0  ;;  %v3494_v48 = vld [vmem:[%s4751_s2 + $0x8] sm:$0xf] }
 0x1e5   : > { %v1651_v39 = vpop.f32.mrf.mxu1  ;;  %v2170_v54 = vsel %vm673_vm4, %v4196_v30, %v2100_v51  ;;  %v2636_v40 = vpack.c.bf16 %v2561_v52, %v2561_v52  ;;  %v2651_v24 = vpack.c.bf16 %v2621_v56, %v2621_v56  ;;  %v3495_v57 = vor.u32 %v3576_v62, %v3494_v48 }
 0x1e6   : > { %v1695_v29 = vadd.f32 %v4264_v41, %v1675_v47  ;;  %v2190_v3 = vsel %vm694_vm5, %v2170_v54, %v2150_v38  ;;  %v1536_v56 = vpop.f32.mrf.mxu3 }
 0x1e7   : > { %3459 = vmatmul.msk.bf16.gmra.mxu2 %vm725_vm6, %v2190_v3  ;;  %3472 = vmatmul.msk.bf16.gmra.mxu3 %vm725_vm6, %v2190_v3  ;;  %v2686_v6 = vunpack.c.l.b16 %v2636_v40  ;;  %v2721_v25 = vunpack.c.l.b16 %v2651_v24  ;;  %v2993_v37 = vsel %vm742_vm3, %v3495_v57, 0 }
 0x1e8   : > { %v1711_v7 = vmax.f32 %v1695_v29, 0.0  ;;  %3484 = vmatmul.msk.bf16.gmra.mxu0 %vm725_vm6, %v2190_v3  ;;  %3002 = vmatpush.bf16.msra.mxu1 %v2993_v37 }
 0x1e9   : > { %v1590_v30 = vpop.f32.mrf.mxu0  ;;  %v4415_v0 = vpack.c.b16 %v2686_v6, %v2685_v4  ;;  %v2731_v12 = vpack.c.b16 %v2721_v25, %v2721_v25  ;;  %v2509_v10 = vld [vmem:[#allocation2 + $0xc0] sm:$0xff] }
 0x1ea   : > { %1728 = vst.msk [vmem:[#allocation2 + $0xc8] sm:$0xff] %vm673_vm4, %v1711_v7  ;;  %v1591_v28 = vadd.f32 %v1590_v30, %v1531_v31  ;;  %v2562_v11 = vrot.slane %v2509_v10, 7 }
 0x1eb   : > { %v2889_v22 = vrot.slane %v4415_v0, 1  ;;  %v2890_v63 = vrot.slane %v2731_v12, 1  ;;  %v2788_v14 = vshll.u32 %v4415_v0, 16  ;;  %v2793_v16 = vshll.u32 %v2731_v12, 16 }
 0x1ec   : > { %v1676_v8 = vadd.f32 %v1651_v39, %v1591_v28  ;;  %v2786_v21 = vshrl.u32 %v4415_v0, 16  ;;  %v2612_v55 = vsel %vm290_vm0, 0.0, %v2562_v11  ;;  %v2102_v39 = vpop.permute.xlu2 %2101 }
 0x1ed   : > { %v2891_v23 = vsel %vm622_vm2, %v2889_v22, %v2890_v63  ;;  %v2790_v20 = vrot.slane %v2788_v14, 1  ;;  %v1653_v5 = vpop.f32.mrf.mxu1  ;;  %v2795_v31 = vrot.slane %v2793_v16, 1  ;;  %v2637_v36 = vpack.c.bf16 %v2612_v55, %v2612_v55 }
 0x1ee   : > { %v1696_v27 = vadd.f32 %v4264_v41, %v1676_v8  ;;  %2915 = vrot.lane.b32.xlu1 %v2891_v23, %s3603_s25  ;;  %v2172_v52 = vsel %vm673_vm4, %v4215_v17, %v2102_v39  ;;  %v1538_v16 = vpop.f32.mrf.mxu3 }
 0x1ef   : > { %v2791_v58 = vor.u32 %v2790_v20, %v2786_v21  ;;  %v2687_v54 = vunpack.c.l.b16 %v2637_v36 }
 0x1f0   : > { %v1712_v26 = vmax.f32 %v1696_v27, 0.0  ;;  %v2152_v45 = vpop.permute.xlu0 %2151 }
 0x1f1   : > { %v1592_v32 = vpop.f32.mrf.mxu0  ;;  %v2796_v33 = vsel %vm481_vm1, %v2791_v58, %v2795_v31  ;;  %v2510_v34 = vld [vmem:[#allocation2 + $0xc8] sm:$0xff]  ;;  %v2192_v40 = vsel %vm694_vm5, %v2172_v52, %v2152_v45 }
 0x1f2   : > { %1729 = vst.msk [vmem:[#allocation2 + $0xd0] sm:$0xff] %vm673_vm4, %v1712_v26  ;;  %v1593_v43 = vadd.f32 %v1592_v32, %v1533_v13  ;;  %2865 = vrot.lane.b32.xlu0 %v2796_v33, %s3602_s24  ;;  %v2563_v15 = vrot.slane %v2510_v34, 7 }
 0x1f4   : > { %v1677_v53 = vadd.f32 %v1653_v5, %v1593_v43  ;;  %v2564_v47 = vsel %vm290_vm0, %v2562_v11, %v2563_v15  ;;  %v2622_v51 = vsel %vm290_vm0, %v2563_v15, 0.0  ;;  %v2154_v31 = vpop.permute.xlu2 %2153 }
 0x1f5   : > { %v2638_v46 = vpack.c.bf16 %v2564_v47, %v2564_v47  ;;  %v2652_v38 = vpack.c.bf16 %v2622_v51, %v2622_v51  ;;  %v1656_v59 = vpop.f32.mrf.mxu1 }
 0x1f6   : > { %v1697_v24 = vadd.f32 %v4264_v41, %v1677_v53 }
 0x1f7   : > { %3460 = vmatmul.msk.bf16.gmra.mxu2 %vm725_vm6, %v2192_v40  ;;  %3473 = vmatmul.msk.bf16.gmra.mxu3 %vm725_vm6, %v2192_v40  ;;  %v2688_v29 = vunpack.c.l.b16 %v2638_v46  ;;  %v2722_v3 = vunpack.c.l.b16 %v2652_v38 }
 0x1f8   : > { %v1713_v1 = vmax.f32 %v1697_v24, 0.0  ;;  %3485 = vmatmul.msk.bf16.gmra.mxu0 %vm725_vm6, %v2192_v40 }
 0x1f9   : > { %v1595_v4 = vpop.f32.mrf.mxu0  ;;  %v4444_v17 = vpack.c.b16 %v2688_v29, %v2687_v54  ;;  %v2732_v6 = vpack.c.b16 %v2722_v3, %v2722_v3  ;;  %v2511_v25 = vld [vmem:[#allocation2 + $0xd0] sm:$0xff] }
 0x1fa   : > { %1730 = vst.msk [vmem:[#allocation2 + $0xd8] sm:$0xff] %vm673_vm4, %v1713_v1  ;;  %v1596_v7 = vadd.f32 %v1595_v4, %v1536_v56  ;;  %v2565_v30 = vrot.slane %v2511_v25, 7 }
 0x1fb   : > { %v2892_v12 = vrot.slane %v4444_v17, 1  ;;  %v2893_v10 = vrot.slane %v2732_v6, 1  ;;  %v2798_v28 = vshrl.u32 %v4444_v17, 16  ;;  %v2800_v11 = vshll.u32 %v4444_v17, 16 }
 0x1fc   : > { %v1678_v48 = vadd.f32 %v1656_v59, %v1596_v7  ;;  %v2805_v62 = vshll.u32 %v2732_v6, 16  ;;  %v2613_v8 = vsel %vm290_vm0, 0.0, %v2565_v30 }
 0x1fd   : > { %v2894_v22 = vsel %vm622_vm2, %v2892_v12, %v2893_v10  ;;  %v2802_v63 = vrot.slane %v2800_v11, 1  ;;  %v1658_v5 = vpop.f32.mrf.mxu1  ;;  %v2639_v55 = vpack.c.bf16 %v2613_v8, %v2613_v8 }
 0x1fe   : > { %v1698_v13 = vadd.f32 %v4264_v41, %v1678_v48  ;;  %2917 = vrot.lane.b32.xlu0 %v2894_v22, %s3603_s25  ;;  %v2807_v14 = vrot.slane %v2805_v62, 1 }
 0x1ff   : > { %v2803_v57 = vor.u32 %v2802_v63, %v2798_v28  ;;  %v2689_v15 = vunpack.c.l.b16 %v2639_v55  ;;  %v1541_v63 = vpop.f32.mrf.mxu3 }
 0x200   : > { %v1714_v23 = vmax.f32 %v1698_v13, 0.0 }
 0x201   : > { %v1597_v21 = vpop.f32.mrf.mxu0  ;;  %v2808_v20 = vsel %vm481_vm1, %v2803_v57, %v2807_v14  ;;  %v2512_v27 = vld [vmem:[#allocation2 + $0xd8] sm:$0xff] }
 0x202   : > { %1731 = vst.msk [vmem:[#allocation2 + $0xe0] sm:$0xff] %vm673_vm4, %v1714_v23  ;;  %v1598_v37 = vadd.f32 %v1597_v21, %v1538_v16  ;;  %2867 = vrot.lane.b32.xlu2 %v2808_v20, %s3602_s24  ;;  %v2566_v58 = vrot.slane %v2512_v27, 7 }
 0x204   : > { %v1679_v26 = vadd.f32 %v1658_v5, %v1598_v37  ;;  %v2104_v32 = vpop.permute.xlu1 %2103  ;;  %v2567_v33 = vsel %vm290_vm0, %v2565_v30, %v2566_v58  ;;  %v2623_v34 = vsel %vm290_vm0, %v2566_v58, 0.0 }
 0x205   : > { %v2174_v36 = vsel %vm673_vm4, %v4237_v42, %v2104_v32  ;;  %v2640_v39 = vpack.c.bf16 %v2567_v33, %v2567_v33  ;;  %v2653_v43 = vpack.c.bf16 %v2623_v34, %v2623_v34 }
 0x206   : > { %v1699_v45 = vadd.f32 %v4264_v41, %v1679_v26  ;;  %v2194_v53 = vsel %vm694_vm5, %v2174_v36, %v2154_v31 }
 0x207   : > { %3461 = vmatmul.msk.bf16.gmra.mxu2 %vm725_vm6, %v2194_v53  ;;  %3474 = vmatmul.msk.bf16.gmra.mxu3 %vm725_vm6, %v2194_v53  ;;  %v2690_v47 = vunpack.c.l.b16 %v2640_v39  ;;  %v2723_v51 = vunpack.c.l.b16 %v2653_v43  ;;  %v1543_v32 = vpop.f32.mrf.mxu3 }
 0x208   : > { %v1715_v52 = vmax.f32 %v1699_v45, 0.0  ;;  %3486 = vmatmul.msk.bf16.gmra.mxu0 %vm725_vm6, %v2194_v53 }
 0x209   : > { %v4466_v56 = vpack.c.b16 %v2690_v47, %v2689_v15  ;;  %v2733_v46 = vpack.c.b16 %v2723_v51, %v2723_v51  ;;  %v2513_v42 = vld [vmem:[#allocation2 + $0xe0] sm:$0xff]  ;;  %v1600_v51 = vpop.f32.mrf.mxu0 }
 0x20a   : > { %1732 = vst.msk [vmem:[#allocation2 + $0xe8] sm:$0xff] %vm673_vm4, %v1715_v52  ;;  %v2568_v38 = vrot.slane %v2513_v42, 7 }
 0x20b   : > { %v2810_v54 = vshrl.u32 %v4466_v56, 16  ;;  %v2812_v40 = vshll.u32 %v4466_v56, 16  ;;  %v2817_v24 = vshll.u32 %v2733_v46, 16  ;;  %v2895_v59 = vrot.slane %v4466_v56, 1 }
 0x20c   : > { %v2896_v29 = vrot.slane %v2733_v46, 1  ;;  %v2614_v4 = vsel %vm290_vm0, 0.0, %v2568_v38 }
 0x20d   : > { %v2814_v3 = vrot.slane %v2812_v40, 1  ;;  %v2819_v1 = vrot.slane %v2817_v24, 1  ;;  %v2641_v12 = vpack.c.bf16 %v2614_v4, %v2614_v4  ;;  %v2108_v36 = vpop.permute.xlu2 %2107 }
 0x20e   : > { %v2897_v6 = vsel %vm622_vm2, %v2895_v59, %v2896_v29  ;;  %v2178_v43 = vsel %vm673_vm4, %v4295_v35, %v2108_v36  ;;  %v4510_v29 = vld [vmem:[%s4753_s4] ss:$0 sm:$0xff] }
 0x20f   : > { %v2815_v25 = vor.u32 %v2814_v3, %v2810_v54  ;;  %2919 = vrot.lane.b32.xlu2 %v2897_v6, %s3603_s25  ;;  %v2691_v8 = vunpack.c.l.b16 %v2641_v12  ;;  %v1601_v12 = vadd.f32 %v1600_v51, %v1541_v63 }
 0x211   : > { %v2820_v7 = vsel %vm481_vm1, %v2815_v25, %v2819_v1  ;;  %v2514_v30 = vld [vmem:[#allocation2 + $0xe8] sm:$0xff]  ;;  %v2156_v28 = vpop.permute.xlu1 %2155  ;;  %v1602_v54 = vpop.f32.mrf.mxu0  ;;  %v2436_v25 = vld [vmem:[%s3652_s23] sm:$0xff] }
 0x212   : > { %2869 = vrot.lane.b32.xlu1 %v2820_v7, %s3602_s24  ;;  %v2569_v10 = vrot.slane %v2514_v30, 7 }
 0x214   : > { %v2106_v11 = vpop.permute.xlu0 %2105  ;;  %v2570_v48 = vsel %vm290_vm0, %v2568_v38, %v2569_v10  ;;  %v2624_v62 = vsel %vm290_vm0, %v2569_v10, 0.0 }
 0x215   : > { %v2176_v22 = vsel %vm673_vm4, %v4257_v44, %v2106_v11  ;;  %v2642_v13 = vpack.c.bf16 %v2570_v48, %v2570_v48  ;;  %v2654_v14 = vpack.c.bf16 %v2624_v62, %v2624_v62  ;;  %v2908_v46 = vpop.permute.xlu2 %2907 }
 0x216   : > { %v2196_v16 = vsel %vm694_vm5, %v2176_v22, %v2156_v28 }
 0x217   : > { %3462 = vmatmul.msk.bf16.gmra.mxu2 %vm725_vm6, %v2196_v16  ;;  %3475 = vmatmul.msk.bf16.gmra.mxu3 %vm725_vm6, %v2196_v16  ;;  %v2692_v57 = vunpack.c.l.b16 %v2642_v13  ;;  %v2724_v23 = vunpack.c.l.b16 %v2654_v14 }
 0x218   : > { %3487 = vmatmul.msk.bf16.gmra.mxu0 %vm725_vm6, %v2196_v16 }
 0x219   : > { %v4485_v21 = vpack.c.b16 %v2692_v57, %v2691_v8  ;;  %v2734_v20 = vpack.c.b16 %v2724_v23, %v2724_v23  ;;  %v2437_v23 = vld [vmem:[%s3652_s23 + $0x8] sm:$0xff] }
 0x21b   : > { %v2898_v5 = vrot.slane %v4485_v21, 1  ;;  %v2899_v44 = vrot.slane %v2734_v20, 1  ;;  %v2822_v27 = vshrl.u32 %v4485_v21, 16  ;;  %v2824_v55 = vshll.u32 %v4485_v21, 16 }
 0x21c   : > { %v2829_v37 = vshll.u32 %v2734_v20, 16 }
 0x21d   : > { %v2900_v58 = vsel %vm622_vm2, %v2898_v5, %v2899_v44  ;;  %v2826_v31 = vrot.slane %v2824_v55, 1  ;;  %v2860_v30 = vpop.permute.xlu2 %2859  ;;  %v1603_v44 = vadd.f32 %v1602_v54, %v1543_v32 }
 0x21e   : > { %2921 = vrot.lane.b32.xlu1 %v2900_v58, %s3603_s25  ;;  %v2831_v26 = vrot.slane %v2829_v37, 1  ;;  %v2930_v48 = vsel %vm673_vm4, %v4320_v19, %v2860_v30 }
 0x21f   : > { %v2827_v33 = vor.u32 %v2826_v31, %v2822_v27 }
 0x220   : > { %v2158_v39 = vpop.permute.xlu0 %2157 }
 0x221   : > { %v2832_v34 = vsel %vm481_vm1, %v2827_v33, %v2831_v26  ;;  %v2198_v15 = vsel %vm694_vm5, %v2178_v43, %v2158_v39 }
 0x222   : > { %2871 = vrot.lane.b32.xlu0 %v2832_v34, %s3602_s24 }
 0x224   : > { %v2858_v53 = vpop.permute.xlu1 %2857 }
 0x225   : > { %v2928_v52 = vsel %vm673_vm4, %v4295_v35, %v2858_v53  ;;  %v2438_v53 = vld [vmem:[%s3652_s23 + $0x10] sm:$0xff] }
 0x226   : > { %2875 = vrot.lane.b32.xlu1 %v3675_v50, %s3602_s24  ;;  %v2948_v42 = vsel %vm694_vm5, %v2928_v52, %v2908_v46 }
 0x227   : > { %3463 = vmatmul.msk.bf16.gmra.mxu2 %vm725_vm6, %v2198_v15 }
 0x228   : > { %3488 = vmatmul.msk.bf16.gmra.mxu0 %vm725_vm6, %v2198_v15 }
 0x229   : > { %v2298_v45 = vpop.f32.mrf.mxu3 }
 0x22e   : > { %2159 = vrot.lane.b32.xlu1 %v4374_v60, %s3603_s25 }
 0x231   : > { %v2300_v47 = vpop.f32.mrf.mxu3 }
 0x235   : > { %v2239_v50 = vpop.f32.mrf.mxu2 }
 0x236   : > { %v2299_v60 = vadd.f32 %v2298_v45, %v2239_v50 }
 0x237   : > { %3508 = vmatmul.msk.bf16.vlgmr.msra.gmra.mxu2 %vm725_vm6, %v2948_v42 }
 0x238   : > { %v2914_v36 = vpop.permute.xlu2 %2913 }
 0x239   : > { %v2303_v38 = vpop.f32.mrf.mxu3 }
 0x23d   : > { %v2241_v24 = vpop.f32.mrf.mxu2 }
 0x23e   : > { %v2301_v62 = vadd.f32 %v2300_v47, %v2241_v24 }
 0x241   : > { %v2305_v40 = vpop.f32.mrf.mxu3  ;;  %v2912_v59 = vpop.permute.xlu1 %2911 }
 0x244   : > { %v2862_v35 = vpop.permute.xlu0 %2861 }
 0x245   : > { %v2360_v3 = vpop.f32.mrf.mxu0  ;;  %v2932_v1 = vsel %vm673_vm4, %v4346_v49, %v2862_v35 }
 0x246   : > { %v2400_v4 = vadd.f32 %v2360_v3, %v2299_v60  ;;  %v2952_v6 = vsel %vm694_vm5, %v2932_v1, %v2912_v59  ;;  %v2439_v59 = vld [vmem:[%s3652_s23 + $0x18] sm:$0xff] }
 0x247   : > { %3522 = vmatmul.msk.bf16.vlgmr.msra.gmra.mxu3 %vm725_vm6, %v2952_v6 }
 0x248   : > { %v2420_v7 = vadd.f32 %v4510_v29, %v2400_v4 }
 0x24a   : > { %v2452_v10 = vadd.f32 %v2436_v25, %v2420_v7  ;;  %v2244_v28 = vpop.f32.mrf.mxu2  ;;  %v2308_v11 = vpop.f32.mrf.mxu3 }
 0x24b   : > { %v1661_v49 = vpop.f32.mrf.mxu1  ;;  %v2304_v31 = vadd.f32 %v2303_v38, %v2244_v28 }
 0x24c   : > { %v2468_v22 = vmax.f32 %v2452_v10, 0.0  ;;  %v1680_v13 = vadd.f32 %v1661_v49, %v1601_v12  ;;  %v2910_v14 = vpop.permute.xlu0 %2909 }
 0x24d   : > { %v2362_v63 = vpop.f32.mrf.mxu0  ;;  %v2950_v8 = vsel %vm694_vm5, %v2930_v48, %v2910_v14 }
 0x24e   : > { %2485 = vst.msk [vmem:[%s4523_s22] sm:$0xff] %vm673_vm4, %v2468_v22  ;;  %v1700_v16 = vadd.f32 %v4264_v41, %v1680_v13  ;;  %v2401_v57 = vadd.f32 %v2362_v63, %v2301_v62  ;;  %3496 = vmatmul.msk.bf16.vlgmr.msra.gmra.mxu1 %vm725_vm6, %v2950_v8  ;;  %3509 = vmatmul.msk.bf16.gmra.mxu2 %vm725_vm6, %v2950_v8  ;;  %v2440_v8 = vld [vmem:[%s3652_s23 + $0x20] sm:$0xff] }
 0x250   : > { %v1716_v20 = vmax.f32 %v1700_v16, 0.0  ;;  %v2421_v5 = vadd.f32 %v4510_v29, %v2401_v57 }
 0x252   : > { %1733 = vst.msk [vmem:[#allocation2 + $0xf0] sm:$0xff] %vm673_vm4, %v1716_v20  ;;  %v2453_v27 = vadd.f32 %v2437_v23, %v2421_v5  ;;  %v2246_v55 = vpop.f32.mrf.mxu2  ;;  %v4536_v37 = vpop.f32.mrf.mxu3 }
 0x253   : > { %v1663_v58 = vpop.f32.mrf.mxu1 }
 0x254   : > { %v2469_v26 = vmax.f32 %v2453_v27, 0.0  ;;  %v1681_v33 = vadd.f32 %v1663_v58, %v1603_v44  ;;  %v2864_v34 = vpop.permute.xlu1 %2863 }
 0x255   : > { %v2934_v39 = vsel %vm673_vm4, %v4377_v9, %v2864_v34  ;;  %v2365_v43 = vpop.f32.mrf.mxu0 }
 0x256   : > { %2486 = vst.msk [vmem:[%s4523_s22 + $0x8] sm:$0xff] %vm673_vm4, %v2469_v26  ;;  %v1701_v32 = vadd.f32 %v4264_v41, %v1681_v33  ;;  %v2402_v15 = vadd.f32 %v2365_v43, %v2304_v31  ;;  %v4544_v45 = vsel %vm694_vm5, %v2934_v39, %v2914_v36  ;;  %v2306_v41 = vadd.f32 %v2305_v40, %v2246_v55 }
 0x257   : > { %3523 = vmatmul.msk.bf16.gmra.mxu3 %vm725_vm6, %v4544_v45 }
 0x258   : > { %v1717_v47 = vmax.f32 %v1701_v32, 0.0  ;;  %v2422_v51 = vadd.f32 %v4510_v29, %v2402_v15 }
 0x259   : > { %v2515_v52 = vld [vmem:[#allocation2 + $0xf0] sm:$0xff] }
 0x25a   : > { %1734 = vst.msk [vmem:[#allocation2 + $0xf8] sm:$0xff] %vm673_vm4, %v1717_v47  ;;  %v2454_v9 = vadd.f32 %v2438_v53, %v2422_v51  ;;  %v2249_v46 = vpop.f32.mrf.mxu2  ;;  %v4551_v42 = vpop.f32.mrf.mxu3  ;;  %v2571_v38 = vrot.slane %v2515_v52, 7 }
 0x25b   : > { %v2309_v30 = vadd.f32 %v2308_v11, %v2249_v46 }
 0x25c   : > { %v2470_v50 = vmax.f32 %v2454_v9, 0.0  ;;  %v2615_v35 = vsel %vm290_vm0, 0.0, %v2571_v38  ;;  %v2868_v52 = vpop.permute.xlu2 %2867 }
 0x25d   : > { %v2367_v54 = vpop.f32.mrf.mxu0  ;;  %v2643_v7 = vpack.c.bf16 %v2615_v35, %v2615_v35 }
 0x25e   : > { %2487 = vst.msk [vmem:[%s4523_s22 + $0x10] sm:$0xff] %vm673_vm4, %v2470_v50  ;;  %v2403_v24 = vadd.f32 %v2367_v54, %v2306_v41  ;;  %3497 = vmatmul.msk.bf16.gmra.mxu1 %vm725_vm6, %v2952_v6  ;;  %3510 = vmatmul.msk.bf16.gmra.mxu2 %vm725_vm6, %v2952_v6 }
 0x25f   : > { %v2693_v11 = vunpack.c.l.b16 %v2643_v7 }
 0x260   : > { %v2423_v60 = vadd.f32 %v4510_v29, %v2403_v24  ;;  %v2916_v49 = vpop.permute.xlu1 %2915  ;;  %v2938_v24 = vsel %vm673_vm4, %v4444_v17, %v2868_v52 }
 0x261   : > { %v2516_v3 = vld [vmem:[#allocation2 + $0xf8] sm:$0xff] }
 0x262   : > { %v2455_v1 = vadd.f32 %v2439_v59, %v2423_v60  ;;  %v2251_v4 = vpop.f32.mrf.mxu2  ;;  %v4560_v40 = vpop.f32.mrf.mxu3  ;;  %v2572_v25 = vrot.slane %v2516_v3, 7  ;;  %v2442_v3 = vld [vmem:[%s3652_s23 + $0x30] sm:$0xff] }
 0x263   : > { %v2311_v58 = vadd.f32 %v4536_v37, %v2251_v4  ;;  %v2441_v37 = vld [vmem:[%s3652_s23 + $0x28] sm:$0xff] }
 0x264   : > { %v2471_v12 = vmax.f32 %v2455_v1, 0.0  ;;  %v2866_v10 = vpop.permute.xlu0 %2865  ;;  %v2573_v28 = vsel %vm290_vm0, %v2571_v38, %v2572_v25  ;;  %v2625_v6 = vsel %vm290_vm0, %v2572_v25, 0.0 }
 0x265   : > { %v2370_v48 = vpop.f32.mrf.mxu0  ;;  %v2936_v62 = vsel %vm673_vm4, %v4415_v0, %v2866_v10  ;;  %v2644_v22 = vpack.c.bf16 %v2573_v28, %v2573_v28  ;;  %v2655_v13 = vpack.c.bf16 %v2625_v6, %v2625_v6 }
 0x266   : > { %2488 = vst.msk [vmem:[%s4523_s22 + $0x18] sm:$0xff] %vm673_vm4, %v2471_v12  ;;  %v2404_v14 = vadd.f32 %v2370_v48, %v2309_v30  ;;  %v2956_v63 = vsel %vm694_vm5, %v2936_v62, %v2916_v49 }
 0x267   : > { %3524 = vmatmul.msk.bf16.gmra.mxu3 %vm725_vm6, %v2956_v63  ;;  %v2694_v16 = vunpack.c.l.b16 %v2644_v22  ;;  %v2725_v57 = vunpack.c.l.b16 %v2655_v13 }
 0x268   : > { %v2424_v23 = vadd.f32 %v4510_v29, %v2404_v14 }
 0x269   : > { %v4572_v20 = vpack.c.b16 %v2694_v16, %v2693_v11  ;;  %v2735_v5 = vpack.c.b16 %v2725_v57, %v2725_v57  ;;  %v2920_v48 = vpop.permute.xlu2 %2919 }
 0x26a   : > { %v2456_v0 = vadd.f32 %v2440_v8, %v2424_v23  ;;  %v2254_v44 = vpop.f32.mrf.mxu2  ;;  %v2318_v26 = vpop.f32.mrf.mxu3 }
 0x26b   : > { %v2901_v27 = vrot.slane %v4572_v20, 1  ;;  %v2902_v55 = vrot.slane %v2735_v5, 1  ;;  %v2836_v33 = vshll.u32 %v4572_v20, 16  ;;  %v2841_v34 = vshll.u32 %v2735_v5, 16 }
 0x26c   : > { %v2472_v31 = vmax.f32 %v2456_v0, 0.0  ;;  %v2834_v32 = vshrl.u32 %v4572_v20, 16  ;;  %v2314_v38 = vadd.f32 %v4551_v42, %v2254_v44  ;;  %v2445_v44 = vld [vmem:[%s3652_s23 + $0x48] sm:$0xff] }
 0x26d   : > { %v2372_v36 = vpop.f32.mrf.mxu0  ;;  %v2903_v39 = vsel %vm622_vm2, %v2901_v27, %v2902_v55  ;;  %v2838_v15 = vrot.slane %v2836_v33, 1  ;;  %v2843_v51 = vrot.slane %v2841_v34, 1 }
 0x26e   : > { %2489 = vst.msk [vmem:[%s4523_s22 + $0x20] sm:$0xff] %vm673_vm4, %v2472_v31  ;;  %v2405_v43 = vadd.f32 %v2372_v36, %v2311_v58  ;;  %2923 = vrot.lane.b32.xlu0 %v2903_v39, %s3603_s25  ;;  %3498 = vmatmul.msk.bf16.gmra.mxu1 %vm725_vm6, %v4544_v45 }
 0x26f   : > { %3511 = vmatmul.msk.bf16.gmra.mxu2 %vm725_vm6, %v4544_v45  ;;  %v2839_v47 = vor.u32 %v2838_v15, %v2834_v32 }
 0x270   : > { %v2425_v53 = vadd.f32 %v4510_v29, %v2405_v43  ;;  %v2918_v50 = vpop.permute.xlu0 %2917 }
 0x271   : > { %v2844_v46 = vsel %vm481_vm1, %v2839_v47, %v2843_v51  ;;  %v2958_v59 = vsel %vm694_vm5, %v2938_v24, %v2918_v50  ;;  %v2447_v50 = vld [vmem:[%s3652_s23 + $0x58] sm:$0xff] }
 0x272   : > { %v2457_v9 = vadd.f32 %v2441_v37, %v2425_v53  ;;  %v2256_v41 = vpop.f32.mrf.mxu2  ;;  %2873 = vrot.lane.b32.xlu2 %v2844_v46, %s3602_s24  ;;  %v2320_v60 = vpop.f32.mrf.mxu3  ;;  %v2446_v37 = vld [vmem:[%s3652_s23 + $0x50] sm:$0xff] }
 0x273   : > { %v2316_v17 = vadd.f32 %v4560_v40, %v2256_v41 }
 0x274   : > { %v2473_v54 = vmax.f32 %v2457_v9, 0.0 }
 0x275   : > { %v2375_v45 = vpop.f32.mrf.mxu0 }
 0x276   : > { %2490 = vst.msk [vmem:[%s4523_s22 + $0x28] sm:$0xff] %vm673_vm4, %v2473_v54  ;;  %v2406_v35 = vadd.f32 %v2375_v45, %v2314_v38  ;;  %2109 = vrot.lane.b32.xlu0 %v4332_v61, %s3602_s24  ;;  %v2443_v61 = vld [vmem:[%s3652_s23 + $0x38] sm:$0xff] }
 0x277   : > { %3525 = vmatmul.msk.bf16.gmra.mxu3 %vm725_vm6, %v2958_v59 }
 0x278   : > { %v2426_v42 = vadd.f32 %v4510_v29, %v2406_v35 }
 0x27a   : > { %v2458_v1 = vadd.f32 %v2442_v3, %v2426_v42  ;;  %v2259_v4 = vpop.f32.mrf.mxu2  ;;  %2925 = vrot.lane.b32.xlu2 %v3689_v2, %s3603_s25  ;;  %v2323_v12 = vpop.f32.mrf.mxu3  ;;  %v2448_v3 = vld [vmem:[%s3652_s23 + $0x60] sm:$0xff] }
 0x27b   : > { %v2319_v2 = vadd.f32 %v2318_v26, %v2259_v4 }
 0x27c   : > { %v2474_v25 = vmax.f32 %v2458_v1, 0.0 }
 0x27d   : > { %v2377_v7 = vpop.f32.mrf.mxu0 }
 0x27e   : > { %2491 = vst.msk [vmem:[%s4523_s22 + $0x30] sm:$0xff] %vm673_vm4, %v2474_v25  ;;  %v2407_v30 = vadd.f32 %v2377_v7, %v2316_v17  ;;  %3499 = vmatmul.msk.bf16.gmra.mxu1 %vm725_vm6, %v2956_v63 }
 0x27f   : > { %3512 = vmatmul.msk.bf16.gmra.mxu2 %vm725_vm6, %v2956_v63  ;;  %v2444_v63 = vld [vmem:[%s3652_s23 + $0x40] sm:$0xff] }
 0x280   : > { %v2427_v10 = vadd.f32 %v4510_v29, %v2407_v30 }
 0x282   : > { %v2459_v28 = vadd.f32 %v2443_v61, %v2427_v10  ;;  %v2261_v6 = vpop.f32.mrf.mxu2  ;;  %v2325_v11 = vpop.f32.mrf.mxu3  ;;  %v2449_v10 = vld [vmem:[%s3652_s23 + $0x68] sm:$0xff] }
 0x283   : > { %v2321_v23 = vadd.f32 %v2320_v60, %v2261_v6 }
 0x284   : > { %v2475_v49 = vmax.f32 %v2459_v28, 0.0  ;;  %v2870_v40 = vpop.permute.xlu1 %2869 }
 0x285   : > { %v2940_v62 = vsel %vm673_vm4, %v4466_v56, %v2870_v40  ;;  %v2380_v22 = vpop.f32.mrf.mxu0 }
 0x286   : > { %2492 = vst.msk [vmem:[%s4523_s22 + $0x38] sm:$0xff] %vm673_vm4, %v2475_v49  ;;  %v2408_v13 = vadd.f32 %v2380_v22, %v2319_v2  ;;  %v2960_v14 = vsel %vm694_vm5, %v2940_v62, %v2920_v48 }
 0x287   : > { %3526 = vmatmul.msk.bf16.gmra.mxu3 %vm725_vm6, %v2960_v14 }
 0x288   : > { %v2428_v8 = vadd.f32 %v4510_v29, %v2408_v13 }
 0x28a   : > { %v2460_v16 = vadd.f32 %v2444_v63, %v2428_v8  ;;  %v2264_v57 = vpop.f32.mrf.mxu2  ;;  %v2328_v26 = vpop.f32.mrf.mxu3  ;;  %v4657_v8 = vld [vmem:[%s4753_s4] ss:$0 sm:$0xff] }
 0x28b   : > { %v2324_v31 = vadd.f32 %v2323_v12, %v2264_v57 }
 0x28c   : > { %v2476_v5 = vmax.f32 %v2460_v16, 0.0  ;;  %v3530_v16 = vld [vmem:[%s3652_s23 + $0x80] sm:$0xff] }
 0x28d   : > { %v2382_v0 = vpop.f32.mrf.mxu0 }
 0x28e   : > { %2493 = vst.msk [vmem:[%s4523_s22 + $0x40] sm:$0xff] %vm673_vm4, %v2476_v5  ;;  %v2409_v56 = vadd.f32 %v2382_v0, %v2321_v23  ;;  %3500 = vmatmul.msk.bf16.gmra.mxu1 %vm725_vm6, %v2958_v59 }
 0x28f   : > { %3513 = vmatmul.msk.bf16.gmra.mxu2 %vm725_vm6, %v2958_v59 }
 0x290   : > { %v2429_v27 = vadd.f32 %v4510_v29, %v2409_v56  ;;  %v2922_v36 = vpop.permute.xlu1 %2921 }
 0x292   : > { %v2461_v55 = vadd.f32 %v2445_v44, %v2429_v27  ;;  %v2266_v58 = vpop.f32.mrf.mxu2  ;;  %v2330_v41 = vpop.f32.mrf.mxu3 }
 0x293   : > { %v2326_v52 = vadd.f32 %v2325_v11, %v2266_v58  ;;  %v3531_v58 = vld [vmem:[%s3652_s23 + $0x88] sm:$0xff] }
 0x294   : > { %v2477_v33 = vmax.f32 %v2461_v55, 0.0  ;;  %v2872_v34 = vpop.permute.xlu0 %2871 }
 0x295   : > { %v2385_v39 = vpop.f32.mrf.mxu0  ;;  %v2942_v43 = vsel %vm673_vm4, %v4485_v21, %v2872_v34 }
 0x296   : > { %2494 = vst.msk [vmem:[%s4523_s22 + $0x48] sm:$0xff] %vm673_vm4, %v2477_v33  ;;  %v2410_v32 = vadd.f32 %v2385_v39, %v2324_v31  ;;  %v2962_v15 = vsel %vm694_vm5, %v2942_v43, %v2922_v36 }
 0x297   : > { %3527 = vmatmul.msk.bf16.gmra.mxu3 %vm725_vm6, %v2962_v15 }
 0x298   : > { %v2430_v53 = vadd.f32 %v4510_v29, %v2410_v32 }
 0x29a   : > { %v2462_v47 = vadd.f32 %v2446_v37, %v2430_v53  ;;  %v2269_v51 = vpop.f32.mrf.mxu2  ;;  %v2333_v42 = vpop.f32.mrf.mxu3  ;;  %v3532_v53 = vld [vmem:[%s3652_s23 + $0x90] sm:$0xff] }
 0x29b   : > { %v2329_v45 = vadd.f32 %v2328_v26, %v2269_v51  ;;  %v2876_v37 = vpop.permute.xlu1 %2875 }
 0x29c   : > { %v2478_v9 = vmax.f32 %v2462_v47, 0.0 }
 0x29d   : > { %v2387_v46 = vpop.f32.mrf.mxu0 }
 0x29e   : > { %2495 = vst.msk [vmem:[%s4523_s22 + $0x50] sm:$0xff] %vm673_vm4, %v2478_v9  ;;  %v2411_v21 = vadd.f32 %v2387_v46, %v2326_v52  ;;  %3501 = vmatmul.msk.bf16.gmra.mxu1 %vm725_vm6, %v2960_v14 }
 0x29f   : > { %3514 = vmatmul.msk.bf16.gmra.mxu2 %vm725_vm6, %v2960_v14 }
 0x2a0   : > { %v2431_v38 = vadd.f32 %v4510_v29, %v2411_v21 }
 0x2a2   : > { %v2463_v54 = vadd.f32 %v2447_v50, %v2431_v38  ;;  %v2271_v24 = vpop.f32.mrf.mxu2  ;;  %v2335_v6 = vpop.f32.mrf.mxu3 }
 0x2a3   : > { %v2331_v7 = vadd.f32 %v2330_v41, %v2271_v24 }
 0x2a4   : > { %v2479_v59 = vmax.f32 %v2463_v54, 0.0 }
 0x2a5   : > { %v2390_v60 = vpop.f32.mrf.mxu0 }
 0x2a6   : > { %2496 = vst.msk [vmem:[%s4523_s22 + $0x58] sm:$0xff] %vm673_vm4, %v2479_v59  ;;  %v2412_v35 = vadd.f32 %v2390_v60, %v2329_v45  ;;  %v2160_v60 = vpop.permute.xlu1 %2159 }
 0x2a8   : > { %v2432_v1 = vadd.f32 %v4510_v29, %v2412_v35 }
 0x2aa   : > { %v2464_v4 = vadd.f32 %v2448_v3, %v2432_v1  ;;  %v2274_v17 = vpop.f32.mrf.mxu2 }
 0x2ab   : > { %v4642_v25 = vadd.f32 %v2333_v42, %v2274_v17 }
 0x2ac   : > { %v2480_v30 = vmax.f32 %v2464_v4, 0.0 }
 0x2ad   : > { %v2392_v61 = vpop.f32.mrf.mxu0 }
 0x2ae   : > { %2497 = vst.msk [vmem:[%s4523_s22 + $0x60] sm:$0xff] %vm673_vm4, %v2480_v30  ;;  %v2413_v12 = vadd.f32 %v2392_v61, %v2331_v7  ;;  %3502 = vmatmul.msk.bf16.gmra.mxu1 %vm725_vm6, %v2962_v15  ;;  %v2946_v7 = vsel %vm673_vm4, %v3659_v18, %v2876_v37 }
 0x2af   : > { %3515 = vmatmul.msk.bf16.gmra.mxu2 %vm725_vm6, %v2962_v15 }
 0x2b0   : > { %v2433_v28 = vadd.f32 %v4510_v29, %v2413_v12 }
 0x2b2   : > { %v2465_v2 = vadd.f32 %v2449_v10, %v2433_v28  ;;  %v2276_v49 = vpop.f32.mrf.mxu2 }
 0x2b3   : > { %v4650_v40 = vadd.f32 %v2335_v6, %v2276_v49 }
 0x2b4   : > { %v2481_v48 = vmax.f32 %v2465_v2, 0.0 }
 0x2b6   : > { %2498 = vst.msk [vmem:[%s4523_s22 + $0x68] sm:$0xff] %vm673_vm4, %v2481_v48 }
 0x2ba   : > { %v3063_v62 = vpop.f32.mrf.mxu2 }
 0x2c2   : > { %v3065_v22 = vpop.f32.mrf.mxu2 }
 0x2ca   : > { %v3124_v13 = vpop.f32.mrf.mxu3 }
 0x2cb   : > { %v3004_v14 = vpop.f32.mrf.mxu1 }
 0x2cc   : > { %v3064_v63 = vadd.f32 %v3063_v62, %v3004_v14  ;;  %v2874_v32 = vpop.permute.xlu2 %2873  ;;  %v3535_v14 = vld [vmem:[%s3652_s23 + $0xa8] sm:$0xff] }
 0x2cd   : > { %v2944_v47 = vsel %vm673_vm4, %v4572_v20, %v2874_v32  ;;  %v3533_v20 = vld [vmem:[%s3652_s23 + $0x98] sm:$0xff] }
 0x2ce   : > { %v3164_v11 = vadd.f32 %v3124_v13, %v3064_v63 }
 0x2d0   : > { %v3184_v57 = vadd.f32 %v4657_v8, %v3164_v11 }
 0x2d1   : > { %v3068_v23 = vpop.f32.mrf.mxu2 }
 0x2d2   : > { %v3216_v5 = vadd.f32 %v3530_v16, %v3184_v57  ;;  %v3126_v0 = vpop.f32.mrf.mxu3 }
 0x2d3   : > { %v3006_v56 = vpop.f32.mrf.mxu1 }
 0x2d4   : > { %v3232_v44 = vmax.f32 %v3216_v5, 0.0  ;;  %v3066_v27 = vadd.f32 %v3065_v22, %v3006_v56  ;;  %v2926_v12 = vpop.permute.xlu2 %2925 }
 0x2d5   : > { %v2966_v28 = vsel %vm694_vm5, %v2946_v7, %v2926_v12 }
 0x2d6   : > { %3546 = vst.msk [vmem:[%s4523_s22 + $0x80] sm:$0xff] %vm673_vm4, %v3232_v44  ;;  %v3165_v55 = vadd.f32 %v3126_v0, %v3066_v27  ;;  %v3536_v44 = vld [vmem:[%s3652_s23 + $0xb0] sm:$0xff] }
 0x2d8   : > { %v3185_v31 = vadd.f32 %v4657_v8, %v3165_v55 }
 0x2d9   : > { %v3070_v26 = vpop.f32.mrf.mxu2 }
 0x2da   : > { %v3217_v33 = vadd.f32 %v3531_v58, %v3185_v31  ;;  %v3129_v34 = vpop.f32.mrf.mxu3 }
 0x2db   : > { %v3009_v36 = vpop.f32.mrf.mxu1 }
 0x2dc   : > { %v3233_v39 = vmax.f32 %v3217_v33, 0.0  ;;  %v3069_v43 = vadd.f32 %v3068_v23, %v3009_v36 }
 0x2de   : > { %3547 = vst.msk [vmem:[%s4523_s22 + $0x88] sm:$0xff] %vm673_vm4, %v3233_v39  ;;  %v3166_v15 = vadd.f32 %v3129_v34, %v3069_v43  ;;  %v3537_v39 = vld [vmem:[%s3652_s23 + $0xb8] sm:$0xff] }
 0x2e0   : > { %v3186_v51 = vadd.f32 %v4657_v8, %v3166_v15  ;;  %v2924_v52 = vpop.permute.xlu0 %2923 }
 0x2e1   : > { %v2964_v9 = vsel %vm694_vm5, %v2944_v47, %v2924_v52  ;;  %v3073_v46 = vpop.f32.mrf.mxu2 }
 0x2e2   : > { %v3218_v41 = vadd.f32 %v3532_v53, %v3186_v51  ;;  %3503 = vmatmul.msk.bf16.gmra.mxu1 %vm725_vm6, %v2964_v9  ;;  %v3131_v21 = vpop.f32.mrf.mxu3  ;;  %3528 = vmatmul.msk.bf16.gmra.mxu3 %vm725_vm6, %v2964_v9  ;;  %v3538_v9 = vld [vmem:[%s3652_s23 + $0xc0] sm:$0xff] }
 0x2e3   : > { %v3011_v50 = vpop.f32.mrf.mxu1 }
 0x2e4   : > { %v3234_v38 = vmax.f32 %v3218_v41, 0.0  ;;  %v3071_v54 = vadd.f32 %v3070_v26, %v3011_v50 }
 0x2e6   : > { %3548 = vst.msk [vmem:[%s4523_s22 + $0x90] sm:$0xff] %vm673_vm4, %v3234_v38  ;;  %v3167_v24 = vadd.f32 %v3131_v21, %v3071_v54 }
 0x2e8   : > { %v3187_v45 = vadd.f32 %v4657_v8, %v3167_v24  ;;  %v2110_v59 = vpop.permute.xlu0 %2109 }
 0x2e9   : > { %v2180_v35 = vsel %vm673_vm4, %v4320_v19, %v2110_v59  ;;  %v3075_v3 = vpop.f32.mrf.mxu2  ;;  %v3534_v19 = vld [vmem:[%s3652_s23 + $0xa0] sm:$0xff] }
 0x2ea   : > { %v3219_v42 = vadd.f32 %v3533_v20, %v3187_v45  ;;  %v3134_v1 = vpop.f32.mrf.mxu3  ;;  %v2200_v4 = vsel %vm694_vm5, %v2180_v35, %v2160_v60  ;;  %v3539_v20 = vld [vmem:[%s3652_s23 + $0xc8] sm:$0xff] }
 0x2eb   : > { %3489 = vmatmul.msk.bf16.gmra.mxu0 %vm725_vm6, %v2200_v4  ;;  %v3014_v17 = vpop.f32.mrf.mxu1 }
 0x2ec   : > { %v3235_v30 = vmax.f32 %v3219_v42, 0.0  ;;  %v3074_v61 = vadd.f32 %v3073_v46, %v3014_v17  ;;  %v3540_v17 = vld [vmem:[%s3652_s23 + $0xd0] sm:$0xff] }
 0x2ee   : > { %3549 = vst.msk [vmem:[%s4523_s22 + $0x98] sm:$0xff] %vm673_vm4, %v3235_v30  ;;  %v3168_v10 = vadd.f32 %v3134_v1, %v3074_v61 }
 0x2f0   : > { %v3188_v6 = vadd.f32 %v4657_v8, %v3168_v10 }
 0x2f2   : > { %v3220_v2 = vadd.f32 %v3534_v19, %v3188_v6  ;;  %v3078_v49 = vpop.f32.mrf.mxu2  ;;  %v3136_v48 = vpop.f32.mrf.mxu3  ;;  %3529 = vmatmul.msk.bf16.gmra.mxu3 %vm725_vm6, %v2966_v28 }
 0x2f3   : > { %v3016_v18 = vpop.f32.mrf.mxu1 }
 0x2f4   : > { %v3236_v62 = vmax.f32 %v3220_v2, 0.0  ;;  %v3076_v22 = vadd.f32 %v3075_v3, %v3016_v18  ;;  %v3541_v2 = vld [vmem:[%s3652_s23 + $0xd8] sm:$0xff] }
 0x2f6   : > { %3550 = vst.msk [vmem:[%s4523_s22 + $0xa0] sm:$0xff] %vm673_vm4, %v3236_v62  ;;  %v3169_v13 = vadd.f32 %v3136_v48, %v3076_v22 }
 0x2f8   : > { %v3189_v63 = vadd.f32 %v4657_v8, %v3169_v13 }
 0x2fa   : > { %v3221_v11 = vadd.f32 %v3535_v14, %v3189_v63  ;;  %v3139_v16 = vpop.f32.mrf.mxu3  ;;  %v3080_v57 = vpop.f32.mrf.mxu2 }
 0x2fb   : > { %v3019_v23 = vpop.f32.mrf.mxu1 }
 0x2fc   : > { %v3237_v5 = vmax.f32 %v3221_v11, 0.0  ;;  %v3079_v0 = vadd.f32 %v3078_v49, %v3019_v23 }
 0x2fe   : > { %3551 = vst.msk [vmem:[%s4523_s22 + $0xa8] sm:$0xff] %vm673_vm4, %v3237_v5  ;;  %v3170_v56 = vadd.f32 %v3139_v16, %v3079_v0 }
 0x300   : > { %v3190_v27 = vadd.f32 %v4657_v8, %v3170_v56 }
 0x302   : > { %v3222_v55 = vadd.f32 %v3536_v44, %v3190_v27  ;;  %v3141_v58 = vpop.f32.mrf.mxu3  ;;  %v3083_v34 = vpop.f32.mrf.mxu2  ;;  %v2450_v44 = vld [vmem:[%s3652_s23 + $0x70] sm:$0xff] }
 0x303   : > { %v3021_v31 = vpop.f32.mrf.mxu1 }
 0x304   : > { %v3238_v26 = vmax.f32 %v3222_v55, 0.0  ;;  %v3081_v33 = vadd.f32 %v3080_v57, %v3021_v31  ;;  %v3542_v57 = vld [vmem:[%s3652_s23 + $0xe0] sm:$0xff] }
 0x306   : > { %3552 = vst.msk [vmem:[%s4523_s22 + $0xb0] sm:$0xff] %vm673_vm4, %v3238_v26  ;;  %v3171_v36 = vadd.f32 %v3141_v58, %v3081_v33 }
 0x308   : > { %v3191_v43 = vadd.f32 %v4657_v8, %v3171_v36 }
 0x30a   : > { %v3223_v32 = vadd.f32 %v3537_v39, %v3191_v43  ;;  %v3144_v15 = vpop.f32.mrf.mxu3  ;;  %v3085_v52 = vpop.f32.mrf.mxu2  ;;  %v3543_v39 = vld [vmem:[%s3652_s23 + $0xe8] sm:$0xff] }
 0x30b   : > { %v3024_v37 = vpop.f32.mrf.mxu1 }
 0x30c   : > { %v3239_v53 = vmax.f32 %v3223_v32, 0.0  ;;  %v3084_v47 = vadd.f32 %v3083_v34, %v3024_v37 }
 0x30e   : > { %3553 = vst.msk [vmem:[%s4523_s22 + $0xb8] sm:$0xff] %vm673_vm4, %v3239_v53  ;;  %v3172_v51 = vadd.f32 %v3144_v15, %v3084_v47  ;;  %v2451_v53 = vld [vmem:[%s3652_s23 + $0x78] sm:$0xff] }
 0x310   : > { %v3192_v46 = vadd.f32 %v4657_v8, %v3172_v51 }
 0x312   : > { %v3224_v41 = vadd.f32 %v3538_v9, %v3192_v46  ;;  %v3146_v21 = vpop.f32.mrf.mxu3  ;;  %v3088_v59 = vpop.f32.mrf.mxu2 }
 0x313   : > { %v3026_v50 = vpop.f32.mrf.mxu1 }
 0x314   : > { %v3240_v38 = vmax.f32 %v3224_v41, 0.0  ;;  %v3086_v54 = vadd.f32 %v3085_v52, %v3026_v50  ;;  %v3544_v50 = vld [vmem:[%s3652_s23 + $0xf0] sm:$0xff] }
 0x316   : > { %3554 = vst.msk [vmem:[%s4523_s22 + $0xc0] sm:$0xff] %vm673_vm4, %v3240_v38  ;;  %v3173_v24 = vadd.f32 %v3146_v21, %v3086_v54 }
 0x318   : > { %v3193_v45 = vadd.f32 %v4657_v8, %v3173_v24 }
 0x31a   : > { %v3225_v60 = vadd.f32 %v3539_v20, %v3193_v45  ;;  %v3149_v35 = vpop.f32.mrf.mxu3  ;;  %v3090_v61 = vpop.f32.mrf.mxu2 }
 0x31b   : > { %v3029_v3 = vpop.f32.mrf.mxu1 }
 0x31c   : > { %v3241_v42 = vmax.f32 %v3225_v60, 0.0  ;;  %v3089_v1 = vadd.f32 %v3088_v59, %v3029_v3  ;;  %v3545_v60 = vld [vmem:[%s3652_s23 + $0xf8] sm:$0xff] }
 0x31e   : > { %3555 = vst.msk [vmem:[%s4523_s22 + $0xc8] sm:$0xff] %vm673_vm4, %v3241_v42  ;;  %v3174_v4 = vadd.f32 %v3149_v35, %v3089_v1 }
 0x320   : > { %v3194_v7 = vadd.f32 %v4657_v8, %v3174_v4 }
 0x322   : > { %v3226_v30 = vadd.f32 %v3540_v17, %v3194_v7  ;;  %v3151_v28 = vpop.f32.mrf.mxu3  ;;  %v3093_v62 = vpop.f32.mrf.mxu2 }
 0x323   : > { %v3031_v12 = vpop.f32.mrf.mxu1 }
 0x324   : > { %v3242_v10 = vmax.f32 %v3226_v30, 0.0  ;;  %v3091_v19 = vadd.f32 %v3090_v61, %v3031_v12 }
 0x326   : > { %3556 = vst.msk [vmem:[%s4523_s22 + $0xd0] sm:$0xff] %vm673_vm4, %v3242_v10  ;;  %v3175_v6 = vadd.f32 %v3151_v28, %v3091_v19 }
 0x328   : > { %v3195_v49 = vadd.f32 %v4657_v8, %v3175_v6 }
 0x32a   : > { %v3227_v48 = vadd.f32 %v3541_v2, %v3195_v49  ;;  %v3095_v11 = vpop.f32.mrf.mxu2 }
 0x32b   : > { %v3034_v22 = vpop.f32.mrf.mxu1 }
 0x32c   : > { %v3243_v18 = vmax.f32 %v3227_v48, 0.0  ;;  %v3094_v13 = vadd.f32 %v3093_v62, %v3034_v22 }
 0x32e   : > { %3557 = vst.msk [vmem:[%s4523_s22 + $0xd8] sm:$0xff] %vm673_vm4, %v3243_v18 }
 0x332   : > { %v3098_v32 = vpop.f32.mrf.mxu2 }
 0x333   : > { %v3036_v16 = vpop.f32.mrf.mxu1 }
 0x334   : > { %v3096_v55 = vadd.f32 %v3095_v11, %v3036_v16 }
 0x33a   : > { %v3100_v24 = vpop.f32.mrf.mxu2 }
 0x35f   : > { %v3039_v34 = vpop.f32.mrf.mxu1 }
 0x360   : > { %v3099_v51 = vadd.f32 %v3098_v32, %v3039_v34 }
 0x365   : > { %v3154_v14 = vpop.f32.mrf.mxu3 }
 0x366   : > { %v3176_v63 = vadd.f32 %v3154_v14, %v3094_v13 }
 0x367   : > { %v3041_v54 = vpop.f32.mrf.mxu1 }
 0x368   : > { %v3196_v23 = vadd.f32 %v4657_v8, %v3176_v63  ;;  %v2395_v5 = vpop.f32.mrf.mxu0 }
 0x369   : > { %v2414_v0 = vadd.f32 %v2395_v5, %v4642_v25 }
 0x36a   : > { %v3228_v56 = vadd.f32 %v3542_v57, %v3196_v23 }
 0x36b   : > { %v2434_v27 = vadd.f32 %v4510_v29, %v2414_v0 }
 0x36c   : > { %v3244_v58 = vmax.f32 %v3228_v56, 0.0 }
 0x36d   : > { %v2466_v31 = vadd.f32 %v2450_v44, %v2434_v27  ;;  %v3156_v26 = vpop.f32.mrf.mxu3 }
 0x36e   : > { %3558 = vst.msk [vmem:[%s4523_s22 + $0xe0] sm:$0xff] %vm673_vm4, %v3244_v58  ;;  %v3177_v33 = vadd.f32 %v3156_v26, %v3096_v55 }
 0x36f   : > { %v2482_v36 = vmax.f32 %v2466_v31, 0.0 }
 0x370   : > { %v3197_v25 = vadd.f32 %v4657_v8, %v3177_v33  ;;  %v2397_v43 = vpop.f32.mrf.mxu0 }
 0x371   : > { %2499 = vst.msk [vmem:[%s4523_s22 + $0x70] sm:$0xff] %vm673_vm4, %v2482_v36  ;;  %v2415_v15 = vadd.f32 %v2397_v43, %v4650_v40 }
 0x372   : > { %v3229_v37 = vadd.f32 %v3543_v39, %v3197_v25 }
 0x373   : > { %v2435_v47 = vadd.f32 %v4510_v29, %v2415_v15  ;;  %v3101_v29 = vadd.f32 %v3100_v24, %v3041_v54 }
 0x374   : > { %v3245_v52 = vmax.f32 %v3229_v37, 0.0 }
 0x375   : > { %v2467_v9 = vadd.f32 %v2451_v53, %v2435_v47  ;;  %v3159_v46 = vpop.f32.mrf.mxu3 }
 0x376   : > { %3559 = vst.msk [vmem:[%s4523_s22 + $0xe8] sm:$0xff] %vm673_vm4, %v3245_v52  ;;  %v3178_v41 = vadd.f32 %v3159_v46, %v3099_v51 }
 0x377   : > { %v2483_v21 = vmax.f32 %v2467_v9, 0.0 }
 0x378   : > { %v3198_v38 = vadd.f32 %v4657_v8, %v3178_v41 }
 0x379   : > { %2500 = vst.msk [vmem:[%s4523_s22 + $0x78] sm:$0xff] %vm673_vm4, %v2483_v21 }
 0x37a   : > { %v3230_v40 = vadd.f32 %v3544_v50, %v3198_v38 }
 0x37c   : > { %v3246_v20 = vmax.f32 %v3230_v40, 0.0 }
 0x37d   : > { %v3161_v45 = vpop.f32.mrf.mxu3 }
 0x37e   : > { %3560 = vst.msk [vmem:[%s4523_s22 + $0xf0] sm:$0xff] %vm673_vm4, %v3246_v20  ;;  %v3179_v59 = vadd.f32 %v3161_v45, %v3101_v29 }
 0x380   : > { %v3199_v35 = vadd.f32 %v4657_v8, %v3179_v59 }
 0x382   : > { %v3231_v3 = vadd.f32 %v3545_v60, %v3199_v35 }
 0x384   : > { %v3247_v42 = vmax.f32 %v3231_v3, 0.0 }
 0x386   : > { %3561 = vst.msk [vmem:[%s4523_s22 + $0xf8] sm:$0xff] %vm673_vm4, %v3247_v42 }
 0x387 PF: > { %s15_s18 = sadd.s32 1, %s3599_s18  }
 0x388   : > { %p12_p4 = scmp.ge.s32.totalorder %s15_s18, 4  }
 0x38a   :  { %14 = sbr.rel (!%p12_p4) target bundleno = 1 (0x1), region = 88 }

</bundles_post_ra>
